<compile_context>
chip_gen: v6e
topology: v6e:2x2x1
jax: 0.10.0
libtpu: 0.0.40
codegen_flags: <defaults>
</compile_context>

<pallas_src>
import functools
import math

import jax
import jax.numpy as jnp
from jax.experimental import pallas as pl
from jax.experimental.pallas import tpu as pltpu

BN_EPS = 1e-5
LANE = 128

_COMPILER_PARAMS = pltpu.CompilerParams(
    dimension_semantics=("parallel",),    # batch steps are independent
    vmem_limit_bytes=16 * 1024 * 1024,    # fused block uses ~1.5 MiB
)


def _round_up(n, m):
    return ((n + m - 1) // m) * m


# ----------------------------------------------------------------------------
# Fused MBConv kernel: one grid step == one batch element, everything in VMEM.
# ----------------------------------------------------------------------------
def _mbconv_kernel(x_ref, we_ref, s0_ref, b0_ref, dw_ref, s1_ref, b1_ref,
                   wr_ref, br_ref, wx_ref, bx_ref, wpj_ref, s2_ref, b2_ref,
                   o_ref, hp_ref, h2_ref,
                   *, H, W, Ho, Wo, stride, pad_t, pad_l, has_residual):
    cin = x_ref.shape[-1]
    oup = hp_ref.shape[-1]
    cout = o_ref.shape[-1]

    # --- expand 1x1 + folded BN0 + swish, written into padded VMEM scratch ---
    hp_ref[...] = jnp.zeros_like(hp_ref)          # zero halo ('same' padding)
    x2d = x_ref[...].reshape(H * W, cin)
    h = jnp.dot(x2d, we_ref[...], preferred_element_type=jnp.float32)
    h = h * s0_ref[...] + b0_ref[...]
    h = h * jax.nn.sigmoid(h)                     # swish
    hp_ref[pl.ds(pad_t, H), pl.ds(pad_l, W), :] = h.reshape(H, W, oup)

    # --- depthwise 3x3 + folded BN1 + swish (taps read in-kernel) ---
    for k in range(9):
        ky, kx = divmod(k, 3)
        if stride == 1:
            tap = hp_ref[pl.ds(ky, Ho), pl.ds(kx, Wo), :]
        else:
            tap = hp_ref[pl.ds(ky, Ho, stride), pl.ds(kx, Wo, stride), :]
        term = tap * dw_ref[k, :]
        if k == 0:
            h2_ref[...] = term
        else:
            h2_ref[...] += term
    a = h2_ref[...].reshape(Ho * Wo, oup) * s1_ref[...] + b1_ref[...]
    h2_ref[...] = (a * jax.nn.sigmoid(a)).reshape(Ho, Wo, oup)

    # --- squeeze & excite, fully on-chip ---
    pooled = jnp.sum(h2_ref[...].reshape(Ho * Wo, oup), axis=0, keepdims=True)
    pooled = pooled * (1.0 / float(Ho * Wo))
    se = jnp.dot(pooled, wr_ref[...], preferred_element_type=jnp.float32)
    se = se + br_ref[...]
    se = se * jax.nn.sigmoid(se)                  # swish
    se = jnp.dot(se, wx_ref[...], preferred_element_type=jnp.float32)
    se = jax.nn.sigmoid(se + bx_ref[...])         # (1, oup)

    # --- SE rescale + project 1x1 + folded BN2 (+ fused residual) ---
    h3 = h2_ref[...].reshape(Ho * Wo, oup) * se
    out = jnp.dot(h3, wpj_ref[...], preferred_element_type=jnp.float32)
    out = out * s2_ref[...] + b2_ref[...]
    if has_residual:
        out = out + x_ref[...].reshape(H * W, cin)
    o_ref[...] = out.reshape(1, Ho, Wo, cout)


# ----------------------------------------------------------------------------
# JAX wrapper: layout conversion, BN folding, lane padding, pallas_call glue.
# ----------------------------------------------------------------------------
def _fold_bn(bn):
    gamma, beta, mean, var = bn
    scale = gamma / jnp.sqrt(var + BN_EPS)
    bias = beta - mean * scale
    return scale, bias


def _pad_row(v, n):
    v = v.astype(jnp.float32)
    return jnp.pad(v, (0, n - v.shape[0])).reshape(1, n)


def mbconv_block(x_nchw, params, *, stride):
    """Fused MBConvBlock forward (eval-mode BN).  x: (B, Cin, H, W) NCHW."""
    B, Cin, H, W = x_nchw.shape
    oup, _, kh, kw = params["dw_w"].shape
    assert (kh, kw) == (3, 3), "fused kernel is specialised to kernel_size == 3"
    Cout = params["project_w"].shape[0]
    sq = params["se_reduce_w"].shape[0]

    Cin_p = _round_up(Cin, LANE)
    Cout_p = _round_up(Cout, LANE)
    oup_p = _round_up(oup, LANE)

    # Conv2dStaticSamePadding geometry (k=3, dilation=1).
    Ho, Wo = -(-H // stride), -(-W // stride)
    pad_h = max((Ho - 1) * stride + 3 - H, 0)
    pad_w = max((Wo - 1) * stride + 3 - W, 0)
    pad_t, pad_l = pad_h // 2, pad_w // 2
    Hp, Wp = H + pad_h, W + pad_w

    has_residual = (stride == 1 and Cin == Cout)
    if has_residual:
        assert Cin_p == Cout_p

    f32 = jnp.float32
    # NHWC + zero lane padding (padded channels stay zero through the block).
    x = jnp.transpose(x_nchw, (0, 2, 3, 1)).astype(f32)
    x = jnp.pad(x, ((0, 0), (0, 0), (0, 0), (0, Cin_p - Cin)))

    we = params["expand_w"].reshape(oup, Cin).T.astype(f32)
    we = jnp.pad(we, ((0, Cin_p - Cin), (0, oup_p - oup)))
    s0, b0 = _fold_bn(params["bn0"])
    dw = params["dw_w"].reshape(oup, 9).T.astype(f32)
    dw = jnp.pad(dw, ((0, 0), (0, oup_p - oup)))
    s1, b1 = _fold_bn(params["bn1"])
    wr = params["se_reduce_w"].reshape(sq, oup).T.astype(f32)
    wr = jnp.pad(wr, ((0, oup_p - oup), (0, 0)))
    br = params["se_reduce_b"].reshape(1, sq).astype(f32)
    wx = params["se_expand_w"].reshape(oup, sq).T.astype(f32)
    wx = jnp.pad(wx, ((0, 0), (0, oup_p - oup)))
    bx = _pad_row(params["se_expand_b"], oup_p)
    wpj = params["project_w"].reshape(Cout, oup).T.astype(f32)
    wpj = jnp.pad(wpj, ((0, oup_p - oup), (0, Cout_p - Cout)))
    s2, b2 = _fold_bn(params["bn2"])

    s0, b0 = _pad_row(s0, oup_p), _pad_row(b0, oup_p)
    s1, b1 = _pad_row(s1, oup_p), _pad_row(b1, oup_p)
    s2, b2 = _pad_row(s2, Cout_p), _pad_row(b2, Cout_p)

    kernel = functools.partial(
        _mbconv_kernel, H=H, W=W, Ho=Ho, Wo=Wo, stride=stride,
        pad_t=pad_t, pad_l=pad_l, has_residual=has_residual)

    full2d = lambda b: (0, 0)
    out = pl.pallas_call(
        kernel,
        out_shape=jax.ShapeDtypeStruct((B, Ho, Wo, Cout_p), jnp.float32),
        grid=(B,),
        in_specs=[
            pl.BlockSpec((1, H, W, Cin_p), lambda b: (b, 0, 0, 0)),  # x (+residual)
            pl.BlockSpec((Cin_p, oup_p), full2d),                    # expand W
            pl.BlockSpec((1, oup_p), full2d),                        # bn0 scale
            pl.BlockSpec((1, oup_p), full2d),                        # bn0 bias
            pl.BlockSpec((9, oup_p), full2d),                        # depthwise W
            pl.BlockSpec((1, oup_p), full2d),                        # bn1 scale
            pl.BlockSpec((1, oup_p), full2d),                        # bn1 bias
            pl.BlockSpec((oup_p, sq), full2d),                       # se reduce W
            pl.BlockSpec((1, sq), full2d),                           # se reduce b
            pl.BlockSpec((sq, oup_p), full2d),                       # se expand W
            pl.BlockSpec((1, oup_p), full2d),                        # se expand b
            pl.BlockSpec((oup_p, Cout_p), full2d),                   # project W
            pl.BlockSpec((1, Cout_p), full2d),                       # bn2 scale
            pl.BlockSpec((1, Cout_p), full2d),                       # bn2 bias
        ],
        out_specs=pl.BlockSpec((1, Ho, Wo, Cout_p), lambda b: (b, 0, 0, 0)),
        scratch_shapes=[
            pltpu.VMEM((Hp, Wp, oup_p), jnp.float32),   # padded expand output
            pltpu.VMEM((Ho, Wo, oup_p), jnp.float32),   # depthwise / SE buffer
        ],
        compiler_params=_COMPILER_PARAMS,
    )(x, we, s0, b0, dw, s1, b1, wr, br, wx, bx, wpj, s2, b2)

    out = out[..., :Cout]
    return jnp.transpose(out, (0, 3, 1, 2))   # back to NCHW


# ----------------------------------------------------------------------------
# Pure-JAX reference (eval-mode BN) for validation.
# ----------------------------------------------------------------------------
def mbconv_reference(x, p, *, stride):
    def bn(h, bnp):
        g, b, m, v = bnp
        s = g / jnp.sqrt(v + BN_EPS)
        return h * s[None, :, None, None] + (b - m * s)[None, :, None, None]

    swish = lambda t: t * jax.nn.sigmoid(t)
    hi = jax.lax.Precision.HIGHEST
    B, Cin, H, W = x.shape
    oup = p["expand_w"].shape[0]
    Cout = p["project_w"].shape[0]
    sq = p["se_reduce_w"].shape[0]

    h = jnp.einsum("oc,nchw->nohw", p["expand_w"].reshape(oup, Cin), x,
                   precision=hi)
    h = swish(bn(h, p["bn0"]))

    Ho, Wo = -(-H // stride), -(-W // stride)
    pad_h = max((Ho - 1) * stride + 3 - H, 0)
    pad_w = max((Wo - 1) * stride + 3 - W, 0)
    hp = jnp.pad(h, ((0, 0), (0, 0),
                     (pad_h // 2, pad_h - pad_h // 2),
                     (pad_w // 2, pad_w - pad_w // 2)))
    h = jax.lax.conv_general_dilated(
        hp, p["dw_w"], (stride, stride), "VALID",
        dimension_numbers=("NCHW", "OIHW", "NCHW"),
        feature_group_count=oup, precision=hi)
    h = swish(bn(h, p["bn1"]))

    se = jnp.mean(h, axis=(2, 3))
    se = swish(jnp.einsum("sc,nc->ns", p["se_reduce_w"].reshape(sq, oup), se,
                          precision=hi) + p["se_reduce_b"])
    se = jax.nn.sigmoid(
        jnp.einsum("cs,ns->nc", p["se_expand_w"].reshape(oup, sq), se,
                   precision=hi) + p["se_expand_b"])
    h = h * se[:, :, None, None]

    h = jnp.einsum("oc,nchw->nohw", p["project_w"].reshape(Cout, oup), h,
                   precision=hi)
    h = bn(h, p["bn2"])
    if stride == 1 and Cin == Cout:
        h = h + x
    return h


# ----------------------------------------------------------------------------
# Deterministic synthetic parameters.
# ----------------------------------------------------------------------------
def init_mbconv_params(key, in_f, out_f, expand_ratio):
    oup = in_f * expand_ratio
    sq = max(1, in_f // 4)
    keys = jax.random.split(key, 10)

    def conv_w(k, co, ci, kh, kw):
        fan_in = ci * kh * kw
        return jax.random.normal(k, (co, ci, kh, kw), jnp.float32) * (
            0.5 / math.sqrt(fan_in))

    def bn_p(k, n):
        k1, k2, k3, k4 = jax.random.split(k, 4)
        return (1.0 + 0.05 * jax.random.normal(k1, (n,), jnp.float32),
                0.05 * jax.random.normal(k2, (n,), jnp.float32),
                0.05 * jax.random.normal(k3, (n,), jnp.float32),
                1.0 + 0.05 * jax.random.uniform(k4, (n,), jnp.float32))

    return {
        "expand_w": conv_w(keys[0], oup, in_f, 1, 1),
        "bn0": bn_p(keys[1], oup),
        "dw_w": conv_w(keys[2], oup, 1, 3, 3),
        "bn1": bn_p(keys[3], oup),
        "se_reduce_w": conv_w(keys[4], sq, oup, 1, 1),
        "se_reduce_b": 0.05 * jax.random.normal(keys[5], (sq,), jnp.float32),
        "se_expand_w": conv_w(keys[6], oup, sq, 1, 1),
        "se_expand_b": 0.05 * jax.random.normal(keys[7], (oup,), jnp.float32),
        "project_w": conv_w(keys[8], out_f, oup, 1, 1),
        "bn2": bn_p(keys[9], out_f),
    }


# ----------------------------------------------------------------------------
if __name__ == "__main__":
    key = jax.random.PRNGKey(0)
    pkey, xkey = jax.random.split(key)

    B, IN_F, OUT_F, EXPAND, IMG = 2, 32, 32, 4, 16
    params = init_mbconv_params(pkey, IN_F, OUT_F, EXPAND)
    x = jax.random.normal(xkey, (B, IN_F, IMG, IMG), jnp.float32)

    # Exercise both the residual stride-1 path and the stride-2 path.
    for stride in (1, 2):
        fwd = jax.jit(functools.partial(mbconv_block, params=params,
                                        stride=stride))
        y = fwd(x)
        jax.block_until_ready(y)
        Ho = -(-IMG // stride)
        assert y.shape == (B, OUT_F, Ho, Ho), y.shape
        y_ref = mbconv_reference(x, params, stride=stride)
        err = float(jnp.max(jnp.abs(y - y_ref)))
        assert math.isfinite(err) and err < 5e-2, (
            f"stride={stride} max|diff|={err}")

    print("KERNEL_OK")
</pallas_src>

<mosaic_0001>
module attributes {stable_mosaic.version = 11 : i64} {
  func.func @_mbconv_kernel(%arg0: i32, %arg1: memref<1x16x16x128xf32, #tpu.memory_space<vmem>>, %arg2: memref<128x128xf32, #tpu.memory_space<vmem>>, %arg3: memref<1x128xf32, #tpu.memory_space<vmem>>, %arg4: memref<1x128xf32, #tpu.memory_space<vmem>>, %arg5: memref<9x128xf32, #tpu.memory_space<vmem>>, %arg6: memref<1x128xf32, #tpu.memory_space<vmem>>, %arg7: memref<1x128xf32, #tpu.memory_space<vmem>>, %arg8: memref<128x8xf32, #tpu.memory_space<vmem>>, %arg9: memref<1x8xf32, #tpu.memory_space<vmem>>, %arg10: memref<8x128xf32, #tpu.memory_space<vmem>>, %arg11: memref<1x128xf32, #tpu.memory_space<vmem>>, %arg12: memref<128x128xf32, #tpu.memory_space<vmem>>, %arg13: memref<1x128xf32, #tpu.memory_space<vmem>>, %arg14: memref<1x128xf32, #tpu.memory_space<vmem>>, %arg15: memref<1x16x16x128xf32, #tpu.memory_space<vmem>>, %arg16: memref<18x18x128xf32, #tpu.memory_space<vmem>>, %arg17: memref<16x16x128xf32, #tpu.memory_space<vmem>>) attributes {dimension_semantics = [#tpu.dimension_semantics<parallel>], iteration_bounds = array<i64: 2>, scalar_prefetch = 0 : i64, scratch_operands = 2 : i64, tpu.core_type = #tpu.core_type<tc>, window_params = [{transform_indices = @transform_0, window_bounds = array<i64: 1, 16, 16, 128>}, {pipeline_mode = #tpu.pipeline_mode<synchronous>, transform_indices = @transform_1, window_bounds = array<i64: 128, 128>}, {pipeline_mode = #tpu.pipeline_mode<synchronous>, transform_indices = @transform_2, window_bounds = array<i64: 1, 128>}, {pipeline_mode = #tpu.pipeline_mode<synchronous>, transform_indices = @transform_3, window_bounds = array<i64: 1, 128>}, {pipeline_mode = #tpu.pipeline_mode<synchronous>, transform_indices = @transform_4, window_bounds = array<i64: 9, 128>}, {pipeline_mode = #tpu.pipeline_mode<synchronous>, transform_indices = @transform_5, window_bounds = array<i64: 1, 128>}, {pipeline_mode = #tpu.pipeline_mode<synchronous>, transform_indices = @transform_6, window_bounds = array<i64: 1, 128>}, {pipeline_mode = #tpu.pipeline_mode<synchronous>, transform_indices = @transform_7, window_bounds = array<i64: 128, 8>}, {pipeline_mode = #tpu.pipeline_mode<synchronous>, transform_indices = @transform_8, window_bounds = array<i64: 1, 8>}, {pipeline_mode = #tpu.pipeline_mode<synchronous>, transform_indices = @transform_9, window_bounds = array<i64: 8, 128>}, {pipeline_mode = #tpu.pipeline_mode<synchronous>, transform_indices = @transform_10, window_bounds = array<i64: 1, 128>}, {pipeline_mode = #tpu.pipeline_mode<synchronous>, transform_indices = @transform_11, window_bounds = array<i64: 128, 128>}, {pipeline_mode = #tpu.pipeline_mode<synchronous>, transform_indices = @transform_12, window_bounds = array<i64: 1, 128>}, {pipeline_mode = #tpu.pipeline_mode<synchronous>, transform_indices = @transform_13, window_bounds = array<i64: 1, 128>}, {transform_indices = @transform_14, window_bounds = array<i64: 1, 16, 16, 128>}]} {
    %cst = arith.constant 0.000000e+00 : f32
    %0 = vector.broadcast %cst : f32 to vector<18x18x128xf32>
    %c0 = arith.constant 0 : index
    %c0_0 = arith.constant 0 : index
    %c0_1 = arith.constant 0 : index
    %1 = vector.load %arg16[%c0, %c0_0, %c0_1] : memref<18x18x128xf32, #tpu.memory_space<vmem>>, vector<18x18x128xf32>
    tpu.vector_store %arg16[%c0, %c0_0, %c0_1], %0 {strides = array<i32>} : memref<18x18x128xf32, #tpu.memory_space<vmem>>, vector<18x18x128xf32>,
    %c0_2 = arith.constant 0 : index
    %c0_3 = arith.constant 0 : index
    %c0_4 = arith.constant 0 : index
    %c0_5 = arith.constant 0 : index
    %2 = vector.load %arg1[%c0_2, %c0_3, %c0_4, %c0_5] : memref<1x16x16x128xf32, #tpu.memory_space<vmem>>, vector<1x16x16x128xf32>
    %3 = vector.shape_cast %2 : vector<1x16x16x128xf32> to vector<256x128xf32>
    %c0_6 = arith.constant 0 : index
    %c0_7 = arith.constant 0 : index
    %4 = vector.load %arg2[%c0_6, %c0_7] : memref<128x128xf32, #tpu.memory_space<vmem>>, vector<128x128xf32>
    %cst_8 = arith.constant dense<0.000000e+00> : vector<256x128xf32>
    %5 = tpu.matmul %3, %4, %cst_8 {dimension_numbers = #tpu.dot_dimension_numbers<[1], [0], [0], [1], [0, 0, 1, 1], [], []>} : vector<256x128xf32>, vector<128x128xf32>, vector<256x128xf32> -> vector<256x128xf32>
    %c0_9 = arith.constant 0 : index
    %c0_10 = arith.constant 0 : index
    %6 = vector.load %arg3[%c0_9, %c0_10] : memref<1x128xf32, #tpu.memory_space<vmem>>, vector<1x128xf32>
    %7 = vector.broadcast %6 : vector<1x128xf32> to vector<256x128xf32>
    %8 = arith.mulf %5, %7 : vector<256x128xf32>
    %c0_11 = arith.constant 0 : index
    %c0_12 = arith.constant 0 : index
    %9 = vector.load %arg4[%c0_11, %c0_12] : memref<1x128xf32, #tpu.memory_space<vmem>>, vector<1x128xf32>
    %10 = vector.broadcast %9 : vector<1x128xf32> to vector<256x128xf32>
    %11 = arith.addf %8, %10 : vector<256x128xf32>
    %12 = arith.negf %11 : vector<256x128xf32>
    %13 = math.exp %12 : vector<256x128xf32>
    %cst_13 = arith.constant 1.000000e+00 : f32
    %14 = vector.broadcast %cst_13 : f32 to vector<256x128xf32>
    %15 = arith.addf %14, %13 : vector<256x128xf32>
    %16 = arith.divf %14, %15 : vector<256x128xf32>
    %17 = arith.mulf %11, %16 : vector<256x128xf32>
    %18 = vector.shape_cast %17 : vector<256x128xf32> to vector<16x16x128xf32>
    %c1 = arith.constant 1 : index
    %c1_14 = arith.constant 1 : index
    %c0_15 = arith.constant 0 : index
    %19 = vector.load %arg16[%c1, %c1_14, %c0_15] : memref<18x18x128xf32, #tpu.memory_space<vmem>>, vector<16x16x128xf32>
    tpu.vector_store %arg16[%c1, %c1_14, %c0_15], %18 {strides = array<i32>} : memref<18x18x128xf32, #tpu.memory_space<vmem>>, vector<16x16x128xf32>,
    %c0_16 = arith.constant 0 : index
    %c0_17 = arith.constant 0 : index
    %c0_18 = arith.constant 0 : index
    %20 = vector.load %arg16[%c0_16, %c0_17, %c0_18] : memref<18x18x128xf32, #tpu.memory_space<vmem>>, vector<16x16x128xf32>
    %c0_19 = arith.constant 0 : index
    %c0_20 = arith.constant 0 : index
    %21 = vector.load %arg5[%c0_19, %c0_20] : memref<9x128xf32, #tpu.memory_space<vmem>>, vector<1x128xf32>
    %22 = vector.shape_cast %21 : vector<1x128xf32> to vector<128xf32>
    %23 = vector.shape_cast %22 : vector<128xf32> to vector<1x1x128xf32>
    %24 = vector.broadcast %23 : vector<1x1x128xf32> to vector<16x16x128xf32>
    %25 = arith.mulf %20, %24 : vector<16x16x128xf32>
    %c0_21 = arith.constant 0 : index
    %c0_22 = arith.constant 0 : index
    %c0_23 = arith.constant 0 : index
    %26 = vector.load %arg17[%c0_21, %c0_22, %c0_23] : memref<16x16x128xf32, #tpu.memory_space<vmem>>, vector<16x16x128xf32>
    tpu.vector_store %arg17[%c0_21, %c0_22, %c0_23], %25 {strides = array<i32>} : memref<16x16x128xf32, #tpu.memory_space<vmem>>, vector<16x16x128xf32>,
    %c0_24 = arith.constant 0 : index
    %c1_25 = arith.constant 1 : index
    %c0_26 = arith.constant 0 : index
    %27 = vector.load %arg16[%c0_24, %c1_25, %c0_26] : memref<18x18x128xf32, #tpu.memory_space<vmem>>, vector<16x16x128xf32>
    %c1_27 = arith.constant 1 : index
    %c0_28 = arith.constant 0 : index
    %28 = vector.load %arg5[%c1_27, %c0_28] : memref<9x128xf32, #tpu.memory_space<vmem>>, vector<1x128xf32>
    %29 = vector.shape_cast %28 : vector<1x128xf32> to vector<128xf32>
    %30 = vector.shape_cast %29 : vector<128xf32> to vector<1x1x128xf32>
    %31 = vector.broadcast %30 : vector<1x1x128xf32> to vector<16x16x128xf32>
    %32 = arith.mulf %27, %31 : vector<16x16x128xf32>
    %c0_29 = arith.constant 0 : index
    %c0_30 = arith.constant 0 : index
    %c0_31 = arith.constant 0 : index
    %33 = vector.load %arg17[%c0_29, %c0_30, %c0_31] : memref<16x16x128xf32, #tpu.memory_space<vmem>>, vector<16x16x128xf32>
    %34 = arith.addf %33, %32 : vector<16x16x128xf32>
    %c0_32 = arith.constant 0 : index
    %c0_33 = arith.constant 0 : index
    %c0_34 = arith.constant 0 : index
    %35 = vector.load %arg17[%c0_32, %c0_33, %c0_34] : memref<16x16x128xf32, #tpu.memory_space<vmem>>, vector<16x16x128xf32>
    tpu.vector_store %arg17[%c0_32, %c0_33, %c0_34], %34 {strides = array<i32>} : memref<16x16x128xf32, #tpu.memory_space<vmem>>, vector<16x16x128xf32>,
    %c0_35 = arith.constant 0 : index
    %c2 = arith.constant 2 : index
    %c0_36 = arith.constant 0 : index
    %36 = vector.load %arg16[%c0_35, %c2, %c0_36] : memref<18x18x128xf32, #tpu.memory_space<vmem>>, vector<16x16x128xf32>
    %c2_37 = arith.constant 2 : index
    %c0_38 = arith.constant 0 : index
    %37 = vector.load %arg5[%c2_37, %c0_38] : memref<9x128xf32, #tpu.memory_space<vmem>>, vector<1x128xf32>
    %38 = vector.shape_cast %37 : vector<1x128xf32> to vector<128xf32>
    %39 = vector.shape_cast %38 : vector<128xf32> to vector<1x1x128xf32>
    %40 = vector.broadcast %39 : vector<1x1x128xf32> to vector<16x16x128xf32>
    %41 = arith.mulf %36, %40 : vector<16x16x128xf32>
    %c0_39 = arith.constant 0 : index
    %c0_40 = arith.constant 0 : index
    %c0_41 = arith.constant 0 : index
    %42 = vector.load %arg17[%c0_39, %c0_40, %c0_41] : memref<16x16x128xf32, #tpu.memory_space<vmem>>, vector<16x16x128xf32>
    %43 = arith.addf %42, %41 : vector<16x16x128xf32>
    %c0_42 = arith.constant 0 : index
    %c0_43 = arith.constant 0 : index
    %c0_44 = arith.constant 0 : index
    %44 = vector.load %arg17[%c0_42, %c0_43, %c0_44] : memref<16x16x128xf32, #tpu.memory_space<vmem>>, vector<16x16x128xf32>
    tpu.vector_store %arg17[%c0_42, %c0_43, %c0_44], %43 {strides = array<i32>} : memref<16x16x128xf32, #tpu.memory_space<vmem>>, vector<16x16x128xf32>,
    %c1_45 = arith.constant 1 : index
    %c0_46 = arith.constant 0 : index
    %c0_47 = arith.constant 0 : index
    %45 = vector.load %arg16[%c1_45, %c0_46, %c0_47] : memref<18x18x128xf32, #tpu.memory_space<vmem>>, vector<16x16x128xf32>
    %c3 = arith.constant 3 : index
    %c0_48 = arith.constant 0 : index
    %46 = vector.load %arg5[%c3, %c0_48] : memref<9x128xf32, #tpu.memory_space<vmem>>, vector<1x128xf32>
    %47 = vector.shape_cast %46 : vector<1x128xf32> to vector<128xf32>
    %48 = vector.shape_cast %47 : vector<128xf32> to vector<1x1x128xf32>
    %49 = vector.broadcast %48 : vector<1x1x128xf32> to vector<16x16x128xf32>
    %50 = arith.mulf %45, %49 : vector<16x16x128xf32>
    %c0_49 = arith.constant 0 : index
    %c0_50 = arith.constant 0 : index
    %c0_51 = arith.constant 0 : index
    %51 = vector.load %arg17[%c0_49, %c0_50, %c0_51] : memref<16x16x128xf32, #tpu.memory_space<vmem>>, vector<16x16x128xf32>
    %52 = arith.addf %51, %50 : vector<16x16x128xf32>
    %c0_52 = arith.constant 0 : index
    %c0_53 = arith.constant 0 : index
    %c0_54 = arith.constant 0 : index
    %53 = vector.load %arg17[%c0_52, %c0_53, %c0_54] : memref<16x16x128xf32, #tpu.memory_space<vmem>>, vector<16x16x128xf32>
    tpu.vector_store %arg17[%c0_52, %c0_53, %c0_54], %52 {strides = array<i32>} : memref<16x16x128xf32, #tpu.memory_space<vmem>>, vector<16x16x128xf32>,
    %c1_55 = arith.constant 1 : index
    %c1_56 = arith.constant 1 : index
    %c0_57 = arith.constant 0 : index
    %54 = vector.load %arg16[%c1_55, %c1_56, %c0_57] : memref<18x18x128xf32, #tpu.memory_space<vmem>>, vector<16x16x128xf32>
    %c4 = arith.constant 4 : index
    %c0_58 = arith.constant 0 : index
    %55 = vector.load %arg5[%c4, %c0_58] : memref<9x128xf32, #tpu.memory_space<vmem>>, vector<1x128xf32>
    %56 = vector.shape_cast %55 : vector<1x128xf32> to vector<128xf32>
    %57 = vector.shape_cast %56 : vector<128xf32> to vector<1x1x128xf32>
    %58 = vector.broadcast %57 : vector<1x1x128xf32> to vector<16x16x128xf32>
    %59 = arith.mulf %54, %58 : vector<16x16x128xf32>
    %c0_59 = arith.constant 0 : index
    %c0_60 = arith.constant 0 : index
    %c0_61 = arith.constant 0 : index
    %60 = vector.load %arg17[%c0_59, %c0_60, %c0_61] : memref<16x16x128xf32, #tpu.memory_space<vmem>>, vector<16x16x128xf32>
    %61 = arith.addf %60, %59 : vector<16x16x128xf32>
    %c0_62 = arith.constant 0 : index
    %c0_63 = arith.constant 0 : index
    %c0_64 = arith.constant 0 : index
    %62 = vector.load %arg17[%c0_62, %c0_63, %c0_64] : memref<16x16x128xf32, #tpu.memory_space<vmem>>, vector<16x16x128xf32>
    tpu.vector_store %arg17[%c0_62, %c0_63, %c0_64], %61 {strides = array<i32>} : memref<16x16x128xf32, #tpu.memory_space<vmem>>, vector<16x16x128xf32>,
    %c1_65 = arith.constant 1 : index
    %c2_66 = arith.constant 2 : index
    %c0_67 = arith.constant 0 : index
    %63 = vector.load %arg16[%c1_65, %c2_66, %c0_67] : memref<18x18x128xf32, #tpu.memory_space<vmem>>, vector<16x16x128xf32>
    %c5 = arith.constant 5 : index
    %c0_68 = arith.constant 0 : index
    %64 = vector.load %arg5[%c5, %c0_68] : memref<9x128xf32, #tpu.memory_space<vmem>>, vector<1x128xf32>
    %65 = vector.shape_cast %64 : vector<1x128xf32> to vector<128xf32>
    %66 = vector.shape_cast %65 : vector<128xf32> to vector<1x1x128xf32>
    %67 = vector.broadcast %66 : vector<1x1x128xf32> to vector<16x16x128xf32>
    %68 = arith.mulf %63, %67 : vector<16x16x128xf32>
    %c0_69 = arith.constant 0 : index
    %c0_70 = arith.constant 0 : index
    %c0_71 = arith.constant 0 : index
    %69 = vector.load %arg17[%c0_69, %c0_70, %c0_71] : memref<16x16x128xf32, #tpu.memory_space<vmem>>, vector<16x16x128xf32>
    %70 = arith.addf %69, %68 : vector<16x16x128xf32>
    %c0_72 = arith.constant 0 : index
    %c0_73 = arith.constant 0 : index
    %c0_74 = arith.constant 0 : index
    %71 = vector.load %arg17[%c0_72, %c0_73, %c0_74] : memref<16x16x128xf32, #tpu.memory_space<vmem>>, vector<16x16x128xf32>
    tpu.vector_store %arg17[%c0_72, %c0_73, %c0_74], %70 {strides = array<i32>} : memref<16x16x128xf32, #tpu.memory_space<vmem>>, vector<16x16x128xf32>,
    %c2_75 = arith.constant 2 : index
    %c0_76 = arith.constant 0 : index
    %c0_77 = arith.constant 0 : index
    %72 = vector.load %arg16[%c2_75, %c0_76, %c0_77] : memref<18x18x128xf32, #tpu.memory_space<vmem>>, vector<16x16x128xf32>
    %c6 = arith.constant 6 : index
    %c0_78 = arith.constant 0 : index
    %73 = vector.load %arg5[%c6, %c0_78] : memref<9x128xf32, #tpu.memory_space<vmem>>, vector<1x128xf32>
    %74 = vector.shape_cast %73 : vector<1x128xf32> to vector<128xf32>
    %75 = vector.shape_cast %74 : vector<128xf32> to vector<1x1x128xf32>
    %76 = vector.broadcast %75 : vector<1x1x128xf32> to vector<16x16x128xf32>
    %77 = arith.mulf %72, %76 : vector<16x16x128xf32>
    %c0_79 = arith.constant 0 : index
    %c0_80 = arith.constant 0 : index
    %c0_81 = arith.constant 0 : index
    %78 = vector.load %arg17[%c0_79, %c0_80, %c0_81] : memref<16x16x128xf32, #tpu.memory_space<vmem>>, vector<16x16x128xf32>
    %79 = arith.addf %78, %77 : vector<16x16x128xf32>
    %c0_82 = arith.constant 0 : index
    %c0_83 = arith.constant 0 : index
    %c0_84 = arith.constant 0 : index
    %80 = vector.load %arg17[%c0_82, %c0_83, %c0_84] : memref<16x16x128xf32, #tpu.memory_space<vmem>>, vector<16x16x128xf32>
    tpu.vector_store %arg17[%c0_82, %c0_83, %c0_84], %79 {strides = array<i32>} : memref<16x16x128xf32, #tpu.memory_space<vmem>>, vector<16x16x128xf32>,
    %c2_85 = arith.constant 2 : index
    %c1_86 = arith.constant 1 : index
    %c0_87 = arith.constant 0 : index
    %81 = vector.load %arg16[%c2_85, %c1_86, %c0_87] : memref<18x18x128xf32, #tpu.memory_space<vmem>>, vector<16x16x128xf32>
    %c7 = arith.constant 7 : index
    %c0_88 = arith.constant 0 : index
    %82 = vector.load %arg5[%c7, %c0_88] : memref<9x128xf32, #tpu.memory_space<vmem>>, vector<1x128xf32>
    %83 = vector.shape_cast %82 : vector<1x128xf32> to vector<128xf32>
    %84 = vector.shape_cast %83 : vector<128xf32> to vector<1x1x128xf32>
    %85 = vector.broadcast %84 : vector<1x1x128xf32> to vector<16x16x128xf32>
    %86 = arith.mulf %81, %85 : vector<16x16x128xf32>
    %c0_89 = arith.constant 0 : index
    %c0_90 = arith.constant 0 : index
    %c0_91 = arith.constant 0 : index
    %87 = vector.load %arg17[%c0_89, %c0_90, %c0_91] : memref<16x16x128xf32, #tpu.memory_space<vmem>>, vector<16x16x128xf32>
    %88 = arith.addf %87, %86 : vector<16x16x128xf32>
    %c0_92 = arith.constant 0 : index
    %c0_93 = arith.constant 0 : index
    %c0_94 = arith.constant 0 : index
    %89 = vector.load %arg17[%c0_92, %c0_93, %c0_94] : memref<16x16x128xf32, #tpu.memory_space<vmem>>, vector<16x16x128xf32>
    tpu.vector_store %arg17[%c0_92, %c0_93, %c0_94], %88 {strides = array<i32>} : memref<16x16x128xf32, #tpu.memory_space<vmem>>, vector<16x16x128xf32>,
    %c2_95 = arith.constant 2 : index
    %c2_96 = arith.constant 2 : index
    %c0_97 = arith.constant 0 : index
    %90 = vector.load %arg16[%c2_95, %c2_96, %c0_97] : memref<18x18x128xf32, #tpu.memory_space<vmem>>, vector<16x16x128xf32>
    %c8 = arith.constant 8 : index
    %c0_98 = arith.constant 0 : index
    %91 = vector.load %arg5[%c8, %c0_98] : memref<9x128xf32, #tpu.memory_space<vmem>>, vector<1x128xf32>
    %92 = vector.shape_cast %91 : vector<1x128xf32> to vector<128xf32>
    %93 = vector.shape_cast %92 : vector<128xf32> to vector<1x1x128xf32>
    %94 = vector.broadcast %93 : vector<1x1x128xf32> to vector<16x16x128xf32>
    %95 = arith.mulf %90, %94 : vector<16x16x128xf32>
    %c0_99 = arith.constant 0 : index
    %c0_100 = arith.constant 0 : index
    %c0_101 = arith.constant 0 : index
    %96 = vector.load %arg17[%c0_99, %c0_100, %c0_101] : memref<16x16x128xf32, #tpu.memory_space<vmem>>, vector<16x16x128xf32>
    %97 = arith.addf %96, %95 : vector<16x16x128xf32>
    %c0_102 = arith.constant 0 : index
    %c0_103 = arith.constant 0 : index
    %c0_104 = arith.constant 0 : index
    %98 = vector.load %arg17[%c0_102, %c0_103, %c0_104] : memref<16x16x128xf32, #tpu.memory_space<vmem>>, vector<16x16x128xf32>
    tpu.vector_store %arg17[%c0_102, %c0_103, %c0_104], %97 {strides = array<i32>} : memref<16x16x128xf32, #tpu.memory_space<vmem>>, vector<16x16x128xf32>,
    %c0_105 = arith.constant 0 : index
    %c0_106 = arith.constant 0 : index
    %c0_107 = arith.constant 0 : index
    %99 = vector.load %arg17[%c0_105, %c0_106, %c0_107] : memref<16x16x128xf32, #tpu.memory_space<vmem>>, vector<16x16x128xf32>
    %100 = vector.shape_cast %99 : vector<16x16x128xf32> to vector<256x128xf32>
    %c0_108 = arith.constant 0 : index
    %c0_109 = arith.constant 0 : index
    %101 = vector.load %arg6[%c0_108, %c0_109] : memref<1x128xf32, #tpu.memory_space<vmem>>, vector<1x128xf32>
    %102 = vector.broadcast %101 : vector<1x128xf32> to vector<256x128xf32>
    %103 = arith.mulf %100, %102 : vector<256x128xf32>
    %c0_110 = arith.constant 0 : index
    %c0_111 = arith.constant 0 : index
    %104 = vector.load %arg7[%c0_110, %c0_111] : memref<1x128xf32, #tpu.memory_space<vmem>>, vector<1x128xf32>
    %105 = vector.broadcast %104 : vector<1x128xf32> to vector<256x128xf32>
    %106 = arith.addf %103, %105 : vector<256x128xf32>
    %107 = arith.negf %106 : vector<256x128xf32>
    %108 = math.exp %107 : vector<256x128xf32>
    %cst_112 = arith.constant 1.000000e+00 : f32
    %109 = vector.broadcast %cst_112 : f32 to vector<256x128xf32>
    %110 = arith.addf %109, %108 : vector<256x128xf32>
    %111 = arith.divf %109, %110 : vector<256x128xf32>
    %112 = arith.mulf %106, %111 : vector<256x128xf32>
    %113 = vector.shape_cast %112 : vector<256x128xf32> to vector<16x16x128xf32>
    %c0_113 = arith.constant 0 : index
    %c0_114 = arith.constant 0 : index
    %c0_115 = arith.constant 0 : index
    %114 = vector.load %arg17[%c0_113, %c0_114, %c0_115] : memref<16x16x128xf32, #tpu.memory_space<vmem>>, vector<16x16x128xf32>
    tpu.vector_store %arg17[%c0_113, %c0_114, %c0_115], %113 {strides = array<i32>} : memref<16x16x128xf32, #tpu.memory_space<vmem>>, vector<16x16x128xf32>,
    %c0_116 = arith.constant 0 : index
    %c0_117 = arith.constant 0 : index
    %c0_118 = arith.constant 0 : index
    %115 = vector.load %arg17[%c0_116, %c0_117, %c0_118] : memref<16x16x128xf32, #tpu.memory_space<vmem>>, vector<16x16x128xf32>
    %116 = vector.shape_cast %115 : vector<16x16x128xf32> to vector<256x128xf32>
    %cst_119 = arith.constant dense<0.000000e+00> : vector<128xf32>
    %117 = vector.multi_reduction <add>, %116, %cst_119 [0] : vector<256x128xf32> to vector<128xf32>
    %118 = vector.shape_cast %117 : vector<128xf32> to vector<1x128xf32>
    %cst_120 = arith.constant 3.906250e-03 : f32
    %119 = vector.broadcast %cst_120 : f32 to vector<1x128xf32>
    %120 = arith.mulf %118, %119 : vector<1x128xf32>
    %c0_121 = arith.constant 0 : index
    %c0_122 = arith.constant 0 : index
    %121 = vector.load %arg8[%c0_121, %c0_122] : memref<128x8xf32, #tpu.memory_space<vmem>>, vector<128x8xf32>
    %cst_123 = arith.constant dense<0.000000e+00> : vector<1x8xf32>
    %122 = tpu.matmul %120, %121, %cst_123 {dimension_numbers = #tpu.dot_dimension_numbers<[1], [0], [0], [1], [0, 0, 1, 1], [], []>} : vector<1x128xf32>, vector<128x8xf32>, vector<1x8xf32> -> vector<1x8xf32>
    %c0_124 = arith.constant 0 : index
    %c0_125 = arith.constant 0 : index
    %123 = vector.load %arg9[%c0_124, %c0_125] : memref<1x8xf32, #tpu.memory_space<vmem>>, vector<1x8xf32>
    %124 = arith.addf %122, %123 : vector<1x8xf32>
    %125 = arith.negf %124 : vector<1x8xf32>
    %126 = math.exp %125 : vector<1x8xf32>
    %cst_126 = arith.constant 1.000000e+00 : f32
    %127 = vector.broadcast %cst_126 : f32 to vector<1x8xf32>
    %128 = arith.addf %127, %126 : vector<1x8xf32>
    %129 = arith.divf %127, %128 : vector<1x8xf32>
    %130 = arith.mulf %124, %129 : vector<1x8xf32>
    %c0_127 = arith.constant 0 : index
    %c0_128 = arith.constant 0 : index
    %131 = vector.load %arg10[%c0_127, %c0_128] : memref<8x128xf32, #tpu.memory_space<vmem>>, vector<8x128xf32>
    %cst_129 = arith.constant dense<0.000000e+00> : vector<1x128xf32>
    %132 = tpu.matmul %130, %131, %cst_129 {dimension_numbers = #tpu.dot_dimension_numbers<[1], [0], [0], [1], [0, 0, 1, 1], [], []>} : vector<1x8xf32>, vector<8x128xf32>, vector<1x128xf32> -> vector<1x128xf32>
    %c0_130 = arith.constant 0 : index
    %c0_131 = arith.constant 0 : index
    %133 = vector.load %arg11[%c0_130, %c0_131] : memref<1x128xf32, #tpu.memory_space<vmem>>, vector<1x128xf32>
    %134 = arith.addf %132, %133 : vector<1x128xf32>
    %135 = arith.negf %134 : vector<1x128xf32>
    %136 = math.exp %135 : vector<1x128xf32>
    %cst_132 = arith.constant 1.000000e+00 : f32
    %137 = vector.broadcast %cst_132 : f32 to vector<1x128xf32>
    %138 = arith.addf %137, %136 : vector<1x128xf32>
    %139 = arith.divf %137, %138 : vector<1x128xf32>
    %c0_133 = arith.constant 0 : index
    %c0_134 = arith.constant 0 : index
    %c0_135 = arith.constant 0 : index
    %140 = vector.load %arg17[%c0_133, %c0_134, %c0_135] : memref<16x16x128xf32, #tpu.memory_space<vmem>>, vector<16x16x128xf32>
    %141 = vector.shape_cast %140 : vector<16x16x128xf32> to vector<256x128xf32>
    %142 = vector.broadcast %139 : vector<1x128xf32> to vector<256x128xf32>
    %143 = arith.mulf %141, %142 : vector<256x128xf32>
    %c0_136 = arith.constant 0 : index
    %c0_137 = arith.constant 0 : index
    %144 = vector.load %arg12[%c0_136, %c0_137] : memref<128x128xf32, #tpu.memory_space<vmem>>, vector<128x128xf32>
    %cst_138 = arith.constant dense<0.000000e+00> : vector<256x128xf32>
    %145 = tpu.matmul %143, %144, %cst_138 {dimension_numbers = #tpu.dot_dimension_numbers<[1], [0], [0], [1], [0, 0, 1, 1], [], []>} : vector<256x128xf32>, vector<128x128xf32>, vector<256x128xf32> -> vector<256x128xf32>
    %c0_139 = arith.constant 0 : index
    %c0_140 = arith.constant 0 : index
    %146 = vector.load %arg13[%c0_139, %c0_140] : memref<1x128xf32, #tpu.memory_space<vmem>>, vector<1x128xf32>
    %147 = vector.broadcast %146 : vector<1x128xf32> to vector<256x128xf32>
    %148 = arith.mulf %145, %147 : vector<256x128xf32>
    %c0_141 = arith.constant 0 : index
    %c0_142 = arith.constant 0 : index
    %149 = vector.load %arg14[%c0_141, %c0_142] : memref<1x128xf32, #tpu.memory_space<vmem>>, vector<1x128xf32>
    %150 = vector.broadcast %149 : vector<1x128xf32> to vector<256x128xf32>
    %151 = arith.addf %148, %150 : vector<256x128xf32>
    %c0_143 = arith.constant 0 : index
    %c0_144 = arith.constant 0 : index
    %c0_145 = arith.constant 0 : index
    %c0_146 = arith.constant 0 : index
    %152 = vector.load %arg1[%c0_143, %c0_144, %c0_145, %c0_146] : memref<1x16x16x128xf32, #tpu.memory_space<vmem>>, vector<1x16x16x128xf32>
    %153 = vector.shape_cast %152 : vector<1x16x16x128xf32> to vector<256x128xf32>
    %154 = arith.addf %151, %153 : vector<256x128xf32>
    %155 = vector.shape_cast %154 : vector<256x128xf32> to vector<1x16x16x128xf32>
    %c0_147 = arith.constant 0 : index
    %c0_148 = arith.constant 0 : index
    %c0_149 = arith.constant 0 : index
    %c0_150 = arith.constant 0 : index
    %156 = vector.load %arg15[%c0_147, %c0_148, %c0_149, %c0_150] : memref<1x16x16x128xf32, #tpu.memory_space<vmem>>, vector<1x16x16x128xf32>
    tpu.vector_store %arg15[%c0_147, %c0_148, %c0_149, %c0_150], %155 {strides = array<i32>} : memref<1x16x16x128xf32, #tpu.memory_space<vmem>>, vector<1x16x16x128xf32>,
    return
  }
  func.func @transform_0(%arg0: i32) -> (i32, i32, i32, i32) {
    %c0_i32 = arith.constant 0 : i32
    %c0_i32_0 = arith.constant 0 : i32
    %c0_i32_1 = arith.constant 0 : i32
    %c0_i32_2 = arith.constant 0 : i32
    return %arg0, %c0_i32, %c0_i32_0, %c0_i32_1 : i32, i32, i32, i32
  }
  func.func @transform_1(%arg0: i32) -> (i32, i32) {
    %c0_i32 = arith.constant 0 : i32
    %c0_i32_0 = arith.constant 0 : i32
    %c0_i32_1 = arith.constant 0 : i32
    return %c0_i32, %c0_i32_0 : i32, i32
  }
  func.func @transform_2(%arg0: i32) -> (i32, i32) {
    %c0_i32 = arith.constant 0 : i32
    %c0_i32_0 = arith.constant 0 : i32
    %c0_i32_1 = arith.constant 0 : i32
    return %c0_i32, %c0_i32_0 : i32, i32
  }
  func.func @transform_3(%arg0: i32) -> (i32, i32) {
    %c0_i32 = arith.constant 0 : i32
    %c0_i32_0 = arith.constant 0 : i32
    %c0_i32_1 = arith.constant 0 : i32
    return %c0_i32, %c0_i32_0 : i32, i32
  }
  func.func @transform_4(%arg0: i32) -> (i32, i32) {
    %c0_i32 = arith.constant 0 : i32
    %c0_i32_0 = arith.constant 0 : i32
    %c0_i32_1 = arith.constant 0 : i32
    return %c0_i32, %c0_i32_0 : i32, i32
  }
  func.func @transform_5(%arg0: i32) -> (i32, i32) {
    %c0_i32 = arith.constant 0 : i32
    %c0_i32_0 = arith.constant 0 : i32
    %c0_i32_1 = arith.constant 0 : i32
    return %c0_i32, %c0_i32_0 : i32, i32
  }
  func.func @transform_6(%arg0: i32) -> (i32, i32) {
    %c0_i32 = arith.constant 0 : i32
    %c0_i32_0 = arith.constant 0 : i32
    %c0_i32_1 = arith.constant 0 : i32
    return %c0_i32, %c0_i32_0 : i32, i32
  }
  func.func @transform_7(%arg0: i32) -> (i32, i32) {
    %c0_i32 = arith.constant 0 : i32
    %c0_i32_0 = arith.constant 0 : i32
    %c0_i32_1 = arith.constant 0 : i32
    return %c0_i32, %c0_i32_0 : i32, i32
  }
  func.func @transform_8(%arg0: i32) -> (i32, i32) {
    %c0_i32 = arith.constant 0 : i32
    %c0_i32_0 = arith.constant 0 : i32
    %c0_i32_1 = arith.constant 0 : i32
    return %c0_i32, %c0_i32_0 : i32, i32
  }
  func.func @transform_9(%arg0: i32) -> (i32, i32) {
    %c0_i32 = arith.constant 0 : i32
    %c0_i32_0 = arith.constant 0 : i32
    %c0_i32_1 = arith.constant 0 : i32
    return %c0_i32, %c0_i32_0 : i32, i32
  }
  func.func @transform_10(%arg0: i32) -> (i32, i32) {
    %c0_i32 = arith.constant 0 : i32
    %c0_i32_0 = arith.constant 0 : i32
    %c0_i32_1 = arith.constant 0 : i32
    return %c0_i32, %c0_i32_0 : i32, i32
  }
  func.func @transform_11(%arg0: i32) -> (i32, i32) {
    %c0_i32 = arith.constant 0 : i32
    %c0_i32_0 = arith.constant 0 : i32
    %c0_i32_1 = arith.constant 0 : i32
    return %c0_i32, %c0_i32_0 : i32, i32
  }
  func.func @transform_12(%arg0: i32) -> (i32, i32) {
    %c0_i32 = arith.constant 0 : i32
    %c0_i32_0 = arith.constant 0 : i32
    %c0_i32_1 = arith.constant 0 : i32
    return %c0_i32, %c0_i32_0 : i32, i32
  }
  func.func @transform_13(%arg0: i32) -> (i32, i32) {
    %c0_i32 = arith.constant 0 : i32
    %c0_i32_0 = arith.constant 0 : i32
    %c0_i32_1 = arith.constant 0 : i32
    return %c0_i32, %c0_i32_0 : i32, i32
  }
  func.func @transform_14(%arg0: i32) -> (i32, i32, i32, i32) {
    %c0_i32 = arith.constant 0 : i32
    %c0_i32_0 = arith.constant 0 : i32
    %c0_i32_1 = arith.constant 0 : i32
    %c0_i32_2 = arith.constant 0 : i32
    return %arg0, %c0_i32, %c0_i32_0, %c0_i32_1 : i32, i32, i32, i32
  }
}

</mosaic_0001>

<bundles_post_ra>
// kernel: mbconv_block.1
= control target key start
LH: loop header
LB: loop body
LE: loop exit
PB: predicated region body
PF: predicated region fallthrough
CT: control target
= control target key end

     0   :  { %s4461_s29 = smov 0   ;;  %s6208_s0 = inlined_call_operand.vmem [shape: f32[2,16,16,128], index: 0, kind: input, shape index: {}]   ;;  %s6209_s1 = inlined_call_operand.vmem [shape: f32[128,128], index: 1, kind: input, shape index: {}]   ;;  %s6210_s2 = inlined_call_operand.vmem [shape: f32[1,128], index: 2, kind: input, shape index: {}]   ;;  %s6211_s3 = inlined_call_operand.vmem [shape: f32[1,128], index: 3, kind: input, shape index: {}]   ;;  %s6212_s4 = inlined_call_operand.vmem [shape: f32[9,128], index: 4, kind: input, shape index: {}]   ;;  %s6213_s5 = inlined_call_operand.vmem [shape: f32[1,128], index: 5, kind: input, shape index: {}]   ;;  %s6214_s6 = inlined_call_operand.vmem [shape: f32[1,128], index: 6, kind: input, shape index: {}]   ;;  %s6215_s7 = inlined_call_operand.vmem [shape: f32[128,8], index: 7, kind: input, shape index: {}]   ;;  %s6216_s8 = inlined_call_operand.vmem [shape: f32[1,8], index: 8, kind: input, shape index: {}]   ;;  %s6217_s9 = inlined_call_operand.vmem [shape: f32[8,128], index: 9, kind: input, shape index: {}]   ;;  %s6218_s10 = inlined_call_operand.vmem [shape: f32[1,128], index: 10, kind: input, shape index: {}]   ;;  %s6219_s11 = inlined_call_operand.vmem [shape: f32[128,128], index: 11, kind: input, shape index: {}]   ;;  %s6220_s12 = inlined_call_operand.vmem [shape: f32[1,128], index: 12, kind: input, shape index: {}]   ;;  %s6221_s13 = inlined_call_operand.vmem [shape: f32[1,128], index: 13, kind: input, shape index: {}]   ;;  %s6222_s14 = inlined_call_operand.vmem [shape: f32[2,16,16,128], index: 14, kind: output, shape index: {}]  }
   0x1 LB: > { %s3670_s30 = sadd.s32 4294967295, %s4382_s29   ;;  %p3674_p0 = scmp.ge.s32.totalorder %s4382_s29, 1  ;;  %s4382_s29 = sphi %s4461_s29, %s24_s29  }
   0x2   : > { %p412_p1 = scmp.lt.s32.totalorder %s4382_s29, 3 }
   0x4   : > { %p413_p2 = pnand %p3674_p0, %p412_p1 }
   0x6   : > { %416 = sbr.rel (%p413_p2) target bundleno = 1285 (0x505), region = 76 }
   0xb   : > { %v569_v0 = vld [vmem:[%s6209_s1 + $0x78] sm:$0xff]  ;;  %v568_v1 = vld [vmem:[%s6209_s1 + $0x70] sm:$0xff]  ;;  %p4477_p3 = scmp.lt.s32.totalorder %s3670_s30, 1  ;;  %v4384_v2 = vmov 0.0   ;;  %v567_v3 = vld [vmem:[%s6209_s1 + $0x68] sm:$0xff]  ;;  %vm4385_vm0 = vmmov 0  }
   0xc   : > { %3880 = vmatprep.subr.mxu0 %v569_v0  ;;  %472 = vst [vmem:[#allocation2 + $0x20] sm:$0xff] %v4384_v2  ;;  %473 = vst [vmem:[#allocation2 + $0x28] sm:$0x3] %v4384_v2  ;;  %3995 = vmatprep.subr.mxu1 %v4384_v2  ;;  %v566_v4 = vld [vmem:[%s6209_s1 + $0x60] sm:$0xff]  ;;  %v565_v5 = vld [vmem:[%s6209_s1 + $0x58] sm:$0xff]  ;;  %vm3084_vm1 = vcmask 64512  }
   0xd   : > { %468 = vst [vmem:[#allocation2] sm:$0xff] %v4384_v2  ;;  %469 = vst [vmem:[#allocation2 + $0x8] sm:$0xff] %v4384_v2  ;;  %3881 = vmatpush3.msra.mxu0 %v569_v0  ;;  %s6294_s30 = smov (!%p4477_p3, %s3670_s30), 1  ;;  %v564_v7 = vld [vmem:[%s6209_s1 + $0x50] sm:$0xff]  ;;  %v563_v8 = vld [vmem:[%s6209_s1 + $0x48] sm:$0xff] }
   0xe   : > { %470 = vst [vmem:[#allocation2 + $0x10] sm:$0x3] %v4384_v2  ;;  %471 = vst [vmem:[#allocation2 + $0x18] sm:$0xff] %v4384_v2  ;;  %3882 = vmatprep.subr.mxu0 %v568_v1  ;;  %s3763_s24 = sshll.u32 %s6294_s30, 8  ;;  %v562_v9 = vld [vmem:[%s6209_s1 + $0x40] sm:$0xff]  ;;  %v561_v10 = vld [vmem:[%s6209_s1 + $0x38] sm:$0xff] }
   0xf   : > { %474 = vst [vmem:[#allocation2 + $0x30] sm:$0xff] %v4384_v2  ;;  %475 = vst [vmem:[#allocation2 + $0x38] sm:$0xff] %v4384_v2  ;;  %3883 = vmatpush3.msra.mxu0 %v568_v1  ;;  %s4554_s27 = scalar_lea.vmem %s6208_s0, %s3763_s24  ;;  %v560_v11 = vld [vmem:[%s6209_s1 + $0x30] sm:$0xff]  ;;  %v559_v12 = vld [vmem:[%s6209_s1 + $0x28] sm:$0xff]  ;;  %s6079_s28 = scalar_lea.vmem %s6222_s14, %s3763_s24 }
  0x10   : > { %476 = vst [vmem:[#allocation2 + $0x40] sm:$0x3] %v4384_v2  ;;  %477 = vst [vmem:[#allocation2 + $0x48] sm:$0xff] %v4384_v2  ;;  %3884 = vmatprep.subr.mxu0 %v567_v3  ;;  %v522_v6 = vld [vmem:[%s4554_s27] sm:$0xff]  ;;  %v557_v14 = vld [vmem:[%s6209_s1 + $0x18] sm:$0xff] }
  0x11   : > { %478 = vst [vmem:[#allocation2 + $0x50] sm:$0xff] %v4384_v2  ;;  %479 = vst [vmem:[#allocation2 + $0x58] sm:$0x3] %v4384_v2  ;;  %3885 = vmatpush3.msra.mxu0 %v567_v3  ;;  %3912 = vmatprep.mubr.f32.mxu0 %v522_v6  ;;  %v558_v13 = vld [vmem:[%s6209_s1 + $0x20] sm:$0xff]  ;;  %v556_v15 = vld [vmem:[%s6209_s1 + $0x10] sm:$0xff] }
  0x12   : > { %480 = vst [vmem:[#allocation2 + $0x60] sm:$0xff] %v4384_v2  ;;  %481 = vst [vmem:[#allocation2 + $0x68] sm:$0xff] %v4384_v2  ;;  %3886 = vmatprep.subr.mxu0 %v566_v4  ;;  %v555_v16 = vld [vmem:[%s6209_s1 + $0x8] sm:$0xff]  ;;  %v554_v17 = vld [vmem:[%s6209_s1] sm:$0xff] }
  0x13   : > { %482 = vst [vmem:[#allocation2 + $0x70] sm:$0x3] %v4384_v2  ;;  %483 = vst [vmem:[#allocation2 + $0x78] sm:$0xff] %v4384_v2  ;;  %3887 = vmatpush3.msra.mxu0 %v566_v4  ;;  %v523_v18 = vld [vmem:[%s4554_s27 + $0x8] sm:$0xff]  ;;  %v524_v19 = vld [vmem:[%s4554_s27 + $0x10] sm:$0xff] }
  0x14   : > { %484 = vst [vmem:[#allocation2 + $0x80] sm:$0xff] %v4384_v2  ;;  %485 = vst [vmem:[#allocation2 + $0x88] sm:$0x3] %v4384_v2  ;;  %3888 = vmatprep.subr.mxu0 %v565_v5  ;;  %v525_v20 = vld [vmem:[%s4554_s27 + $0x18] sm:$0xff]  ;;  %v526_v21 = vld [vmem:[%s4554_s27 + $0x20] sm:$0xff] }
  0x15   : > { %486 = vst [vmem:[#allocation2 + $0x90] sm:$0xff] %v4384_v2  ;;  %487 = vst [vmem:[#allocation2 + $0x98] sm:$0xff] %v4384_v2  ;;  %3889 = vmatpush3.msra.mxu0 %v565_v5  ;;  %v527_v22 = vld [vmem:[%s4554_s27 + $0x28] sm:$0xff]  ;;  %v528_v23 = vld [vmem:[%s4554_s27 + $0x30] sm:$0xff] }
  0x16   : > { %488 = vst [vmem:[#allocation2 + $0xa0] sm:$0x3] %v4384_v2  ;;  %489 = vst [vmem:[#allocation2 + $0xa8] sm:$0xff] %v4384_v2  ;;  %3890 = vmatprep.subr.mxu0 %v564_v7  ;;  %v529_v24 = vld [vmem:[%s4554_s27 + $0x38] sm:$0xff]  ;;  %v530_v25 = vld [vmem:[%s4554_s27 + $0x40] sm:$0xff] }
  0x17   : > { %490 = vst [vmem:[#allocation2 + $0xb0] sm:$0xff] %v4384_v2  ;;  %491 = vst [vmem:[#allocation2 + $0xb8] sm:$0x3] %v4384_v2  ;;  %3891 = vmatpush3.msra.mxu0 %v564_v7  ;;  %v531_v26 = vld [vmem:[%s4554_s27 + $0x48] sm:$0xff]  ;;  %v532_v27 = vld [vmem:[%s4554_s27 + $0x50] sm:$0xff] }
  0x18   : > { %492 = vst [vmem:[#allocation2 + $0xc0] sm:$0xff] %v4384_v2  ;;  %493 = vst [vmem:[#allocation2 + $0xc8] sm:$0xff] %v4384_v2  ;;  %3892 = vmatprep.subr.mxu0 %v563_v8  ;;  %v533_v28 = vld [vmem:[%s4554_s27 + $0x58] sm:$0xff]  ;;  %v534_v29 = vld [vmem:[%s4554_s27 + $0x60] sm:$0xff] }
  0x19   : > { %494 = vst [vmem:[#allocation2 + $0xd0] sm:$0x3] %v4384_v2  ;;  %495 = vst [vmem:[#allocation2 + $0xd8] sm:$0xff] %v4384_v2  ;;  %3893 = vmatpush3.msra.mxu0 %v563_v8  ;;  %v535_v30 = vld [vmem:[%s4554_s27 + $0x68] sm:$0xff]  ;;  %v536_v31 = vld [vmem:[%s4554_s27 + $0x70] sm:$0xff] }
  0x1a   : > { %496 = vst [vmem:[#allocation2 + $0xe0] sm:$0xff] %v4384_v2  ;;  %497 = vst [vmem:[#allocation2 + $0xe8] sm:$0x3] %v4384_v2  ;;  %3894 = vmatprep.subr.mxu0 %v562_v9  ;;  %v537_v32 = vld [vmem:[%s4554_s27 + $0x78] sm:$0xff]  ;;  %v538_v33 = vld [vmem:[%s4554_s27 + $0x80] sm:$0xff] }
  0x1b   : > { %498 = vst [vmem:[#allocation2 + $0xf0] sm:$0xff] %v4384_v2  ;;  %499 = vst [vmem:[#allocation2 + $0xf8] sm:$0xff] %v4384_v2  ;;  %3895 = vmatpush3.msra.mxu0 %v562_v9  ;;  %v539_v34 = vld [vmem:[%s4554_s27 + $0x88] sm:$0xff]  ;;  %v540_v35 = vld [vmem:[%s4554_s27 + $0x90] sm:$0xff] }
  0x1c   : > { %500 = vst [vmem:[#allocation2 + $0x100] sm:$0x3] %v4384_v2  ;;  %501 = vst [vmem:[#allocation2 + $0x108] sm:$0xff] %v4384_v2  ;;  %3896 = vmatprep.subr.mxu0 %v561_v10  ;;  %v541_v36 = vld [vmem:[%s4554_s27 + $0x98] sm:$0xff]  ;;  %v542_v37 = vld [vmem:[%s4554_s27 + $0xa0] sm:$0xff] }
  0x1d   : > { %502 = vst [vmem:[#allocation2 + $0x110] sm:$0xff] %v4384_v2  ;;  %503 = vst [vmem:[#allocation2 + $0x118] sm:$0x3] %v4384_v2  ;;  %3897 = vmatpush3.msra.mxu0 %v561_v10  ;;  %v543_v38 = vld [vmem:[%s4554_s27 + $0xa8] sm:$0xff]  ;;  %v544_v39 = vld [vmem:[%s4554_s27 + $0xb0] sm:$0xff] }
  0x1e   : > { %504 = vst [vmem:[#allocation2 + $0x120] sm:$0xff] %v4384_v2  ;;  %505 = vst [vmem:[#allocation2 + $0x128] sm:$0xff] %v4384_v2  ;;  %3898 = vmatprep.subr.mxu0 %v560_v11  ;;  %v545_v40 = vld [vmem:[%s4554_s27 + $0xb8] sm:$0xff]  ;;  %v546_v41 = vld [vmem:[%s4554_s27 + $0xc0] sm:$0xff] }
  0x1f   : > { %506 = vst [vmem:[#allocation2 + $0x130] sm:$0x3] %v4384_v2  ;;  %507 = vst [vmem:[#allocation2 + $0x138] sm:$0xff] %v4384_v2  ;;  %3899 = vmatpush3.msra.mxu0 %v560_v11  ;;  %v547_v42 = vld [vmem:[%s4554_s27 + $0xc8] sm:$0xff]  ;;  %v548_v43 = vld [vmem:[%s4554_s27 + $0xd0] sm:$0xff] }
  0x20   : > { %508 = vst [vmem:[#allocation2 + $0x140] sm:$0xff] %v4384_v2  ;;  %509 = vst [vmem:[#allocation2 + $0x148] sm:$0x3] %v4384_v2  ;;  %3900 = vmatprep.subr.mxu0 %v559_v12  ;;  %v549_v44 = vld [vmem:[%s4554_s27 + $0xd8] sm:$0xff]  ;;  %v550_v45 = vld [vmem:[%s4554_s27 + $0xe0] sm:$0xff] }
  0x21   : > { %510 = vst [vmem:[#allocation2 + $0x150] sm:$0xff] %v4384_v2  ;;  %511 = vst [vmem:[#allocation2 + $0x158] sm:$0xff] %v4384_v2  ;;  %3901 = vmatpush3.msra.mxu0 %v559_v12  ;;  %v551_v46 = vld [vmem:[%s4554_s27 + $0xe8] sm:$0xff]  ;;  %v552_v47 = vld [vmem:[%s4554_s27 + $0xf0] sm:$0xff] }
  0x22   : > { %512 = vst [vmem:[#allocation2 + $0x160] sm:$0x3] %v4384_v2  ;;  %513 = vst [vmem:[#allocation2 + $0x168] sm:$0xff] %v4384_v2  ;;  %3902 = vmatprep.subr.mxu0 %v558_v13  ;;  %v553_v48 = vld [vmem:[%s4554_s27 + $0xf8] sm:$0xff]  ;;  %v4628_v49 = vld [vmem:[%s6210_s2] ss:$0 sm:$0xff] }
  0x23   : > { %514 = vst [vmem:[#allocation2 + $0x170] sm:$0xff] %v4384_v2  ;;  %515 = vst [vmem:[#allocation2 + $0x178] sm:$0x3] %v4384_v2  ;;  %3903 = vmatpush3.msra.mxu0 %v558_v13  ;;  %v4633_v51 = vld [vmem:[%s6211_s3] ss:$0 sm:$0xff] }
  0x24   : > { %516 = vst [vmem:[#allocation2 + $0x180] sm:$0xff] %v4384_v2  ;;  %517 = vst [vmem:[#allocation2 + $0x188] sm:$0xff] %v4384_v2  ;;  %3904 = vmatprep.subr.mxu0 %v557_v14 }
  0x25   : > { %518 = vst [vmem:[#allocation2 + $0x190] sm:$0x3] %v4384_v2  ;;  %519 = vst [vmem:[#allocation2 + $0x198] sm:$0xff] %v4384_v2  ;;  %3905 = vmatpush3.msra.mxu0 %v557_v14 }
  0x26   : > { %520 = vst [vmem:[#allocation2 + $0x1a0] sm:$0xff] %v4384_v2  ;;  %521 = vst [vmem:[#allocation2 + $0x1a8] sm:$0x3] %v4384_v2  ;;  %3906 = vmatprep.subr.mxu0 %v556_v15 }
  0x27   : > { %3907 = vmatpush3.msra.mxu0 %v556_v15 }
  0x28   : > { %3908 = vmatprep.subr.mxu0 %v555_v16 }
  0x29   : > { %3909 = vmatpush3.msra.mxu0 %v555_v16 }
  0x2a   : > { %3910 = vmatprep.subr.mxu0 %v554_v17 }
  0x2b   : > { %3911 = vmatpush3.msra.mxu0 %v554_v17 }
  0x2c   : > { %3913 = vmatmul.mubr.f32.vlgmr.msra.gmra.mxu0 %v523_v18  ;;  %3960 = vmatprep.subr.mxu0 %v4384_v2 }
  0x2d   : > { %3915 = vmatprep.mubr.f32.mxu0 %v524_v19 }
  0x30   : > { %3916 = vmatmul.mubr.f32.gmra.mxu0 %v525_v20 }
  0x31   : > { %3918 = vmatprep.mubr.f32.mxu0 %v526_v21 }
  0x34   : > { %3919 = vmatmul.mubr.f32.gmra.mxu0 %v527_v22 }
  0x35   : > { %3921 = vmatprep.mubr.f32.mxu0 %v528_v23 }
  0x38   : > { %3922 = vmatmul.mubr.f32.gmra.mxu0 %v529_v24 }
  0x39   : > { %3924 = vmatprep.mubr.f32.mxu0 %v530_v25 }
  0x3c   : > { %3925 = vmatmul.mubr.f32.gmra.mxu0 %v531_v26 }
  0x3d   : > { %3927 = vmatprep.mubr.f32.mxu0 %v532_v27 }
  0x40   : > { %3928 = vmatmul.mubr.f32.gmra.mxu0 %v533_v28 }
  0x41   : > { %3930 = vmatprep.mubr.f32.mxu0 %v534_v29 }
  0x44   : > { %3931 = vmatmul.mubr.f32.gmra.mxu0 %v535_v30 }
  0x45   : > { %3933 = vmatprep.mubr.f32.mxu0 %v536_v31 }
  0x48   : > { %3934 = vmatmul.mubr.f32.gmra.mxu0 %v537_v32 }
  0x49   : > { %3936 = vmatprep.mubr.f32.mxu0 %v538_v33 }
  0x4c   : > { %3937 = vmatmul.mubr.f32.gmra.mxu0 %v539_v34 }
  0x4d   : > { %3939 = vmatprep.mubr.f32.mxu0 %v540_v35 }
  0x50   : > { %3940 = vmatmul.mubr.f32.gmra.mxu0 %v541_v36 }
  0x51   : > { %3942 = vmatprep.mubr.f32.mxu0 %v542_v37 }
  0x54   : > { %3943 = vmatmul.mubr.f32.gmra.mxu0 %v543_v38 }
  0x55   : > { %3945 = vmatprep.mubr.f32.mxu0 %v544_v39 }
  0x58   : > { %3946 = vmatmul.mubr.f32.gmra.mxu0 %v545_v40 }
  0x59   : > { %3948 = vmatprep.mubr.f32.mxu0 %v546_v41 }
  0x5c   : > { %3949 = vmatmul.mubr.f32.gmra.mxu0 %v547_v42 }
  0x5d   : > { %3951 = vmatprep.mubr.f32.mxu0 %v548_v43 }
  0x60   : > { %3952 = vmatmul.mubr.f32.gmra.mxu0 %v549_v44 }
  0x61   : > { %3954 = vmatprep.mubr.f32.mxu0 %v550_v45 }
  0x64   : > { %3955 = vmatmul.mubr.f32.gmra.mxu0 %v551_v46 }
  0x65   : > { %3957 = vmatprep.mubr.f32.mxu0 %v552_v47 }
  0x68   : > { %3958 = vmatmul.mubr.f32.gmra.mxu0 %v553_v48 }
  0xec   : > { %v3914_v50 = vpop.f32.mrf.mxu0 }
  0xed   : > { %v803_v52 = vmul.f32 %v3914_v50, %v4628_v49 }
  0xee   : > { %v636_v53 = vpop.f32.mrf.mxu0 }
  0xef   : > { %v4637_v54 = vadd.f32 %v4633_v51, %v803_v52  ;;  %v802_v55 = vmul.f32 %v4628_v49, %v636_v53  ;;  %v4702_v53 = vld [vmem:[%s6212_s4] ss:$0 sm:$0xff] }
  0xf0   : > { %v3917_v56 = vpop.f32.mrf.mxu0 }
  0xf1   : > { %v3682_v57 = vmul.f32 -1.442695, %v4637_v54  ;;  %v4642_v58 = vadd.f32 %v4633_v51, %v802_v55  ;;  %v805_v59 = vmul.f32 %v3917_v56, %v4628_v49 }
  0xf2   : > { %v646_v60 = vpop.f32.mrf.mxu0 }
  0xf3   : > { %4090 = vpow2.f32 %v3682_v57  ;;  %v3681_v61 = vmul.f32 -1.442695, %v4642_v58  ;;  %v4647_v62 = vadd.f32 %v4633_v51, %v805_v59  ;;  %v804_v63 = vmul.f32 %v4628_v49, %v646_v60  ;;  %v1231_v57 = vld [vmem:[#allocation2 + $0x1] sm:$0xff]  ;;  %v1232_v59 = vld [vmem:[#allocation2 + $0x9] sm:$0xff] }
  0xf4   : > { %v3920_v0 = vpop.f32.mrf.mxu0 }
  0xf5   : > { %4092 = vpow2.f32 %v3681_v61  ;;  %v3684_v1 = vmul.f32 -1.442695, %v4647_v62  ;;  %v4652_v2 = vadd.f32 %v4633_v51, %v804_v63  ;;  %v807_v3 = vmul.f32 %v3920_v0, %v4628_v49  ;;  %v4709_v61 = vld [vmem:[%s6212_s4 + $0x1] ss:$0 sm:$0xff] }
  0xf6   : > { %v656_v4 = vpop.f32.mrf.mxu0  ;;  %v1167_v63 = vmul.f32 0.0, %v4702_v53 }
  0xf7   : > { %4094 = vpow2.f32 %v3684_v1  ;;  %v3683_v5 = vmul.f32 -1.442695, %v4652_v2  ;;  %v4657_v6 = vadd.f32 %v4633_v51, %v807_v3  ;;  %v806_v7 = vmul.f32 %v4628_v49, %v656_v4 }
  0xf8   : > { %v3923_v8 = vpop.f32.mrf.mxu0  ;;  %v1268_v1 = vmul.f32 %v4709_v61, %v1231_v57  ;;  %v1269_v3 = vmul.f32 %v4709_v61, %v1232_v59 }
  0xf9   : > { %4096 = vpow2.f32 %v3683_v5  ;;  %v3686_v9 = vmul.f32 -1.442695, %v4657_v6  ;;  %v4662_v10 = vadd.f32 %v4633_v51, %v806_v7  ;;  %v809_v11 = vmul.f32 %v3923_v8, %v4628_v49  ;;  %v4721_v8 = vld [vmem:[%s6212_s4 + $0x2] ss:$0 sm:$0xff] }
  0xfa   : > { %v666_v12 = vpop.f32.mrf.mxu0 }
  0xfb   : > { %4098 = vpow2.f32 %v3686_v9  ;;  %v3685_v13 = vmul.f32 -1.442695, %v4662_v10  ;;  %v4667_v14 = vadd.f32 %v4633_v51, %v809_v11  ;;  %v808_v15 = vmul.f32 %v4628_v49, %v666_v12  ;;  %v1396_v9 = vld [vmem:[#allocation2 + $0x2] sm:$0xff]  ;;  %v1397_v12 = vld [vmem:[#allocation2 + $0xa] sm:$0xff] }
  0xfc   : > { %v3926_v16 = vpop.f32.mrf.mxu0 }
  0xfd   : > { %4100 = vpow2.f32 %v3685_v13  ;;  %v4671_v17 = vadd.f32 %v4633_v51, %v808_v15  ;;  %v811_v18 = vmul.f32 %v3926_v16, %v4628_v49  ;;  %v3688_v19 = vmul.f32 -1.442695, %v4667_v14 }
  0xfe   : > { %v676_v20 = vpop.f32.mrf.mxu0 }
  0xff   : > { %v4676_v21 = vadd.f32 %v4633_v51, %v811_v18  ;;  %v810_v22 = vmul.f32 %v4628_v49, %v676_v20  ;;  %v3687_v24 = vmul.f32 -1.442695, %v4671_v17  ;;  %4102 = vpow2.f32 %v3688_v19 }
 0x100   : > { %v4091_v23 = vpop.eup %4090  ;;  %v3929_v25 = vpop.f32.mrf.mxu0  ;;  %v1332_v19 = vadd.f32 %v1268_v1, %v1167_v63  ;;  %v1333_v20 = vadd.f32 %v1269_v3, %v1167_v63 }
 0x101   : > { %v970_v26 = vadd.f32 1.0, %v4091_v23  ;;  %v4681_v27 = vadd.f32 %v4633_v51, %v810_v22  ;;  %v3690_v29 = vmul.f32 -1.442695, %v4676_v21  ;;  %v813_v30 = vmul.f32 %v3929_v25, %v4628_v49 }
 0x102   : > { %v4093_v28 = vpop.eup %4092  ;;  %v686_v31 = vpop.f32.mrf.mxu0  ;;  %v1433_v22 = vmul.f32 %v4721_v8, %v1396_v9 }
 0x103   : > { %4104 = vrcp.f32 %v970_v26  ;;  %v969_v32 = vadd.f32 1.0, %v4093_v28  ;;  %v812_v33 = vmul.f32 %v4628_v49, %v686_v31  ;;  %v3689_v35 = vmul.f32 -1.442695, %v4681_v27 }
 0x104   : > { %v4095_v34 = vpop.eup %4094  ;;  %4106 = vpow2.f32 %v3687_v24  ;;  %v4688_v36 = vadd.f32 %v4633_v51, %v813_v30  ;;  %v3932_v37 = vpop.f32.mrf.mxu0  ;;  %v1434_v24 = vmul.f32 %v4721_v8, %v1397_v12 }
 0x105   : > { %4108 = vrcp.f32 %v969_v32  ;;  %v972_v38 = vadd.f32 1.0, %v4095_v34  ;;  %v815_v39 = vmul.f32 %v3932_v37, %v4628_v49  ;;  %v4693_v42 = vadd.f32 %v4633_v51, %v812_v33 }
 0x106   : > { %v4097_v40 = vpop.eup %4096  ;;  %4110 = vpow2.f32 %v3690_v29  ;;  %v3692_v41 = vmul.f32 -1.442695, %v4688_v36  ;;  %v696_v47 = vpop.f32.mrf.mxu0  ;;  %v1497_v37 = vadd.f32 %v1433_v22, %v1332_v19 }
 0x107   : > { %4112 = vrcp.f32 %v972_v38  ;;  %v971_v43 = vadd.f32 1.0, %v4097_v40  ;;  %v4696_v45 = vadd.f32 %v4633_v51, %v815_v39  ;;  %v3691_v50 = vmul.f32 -1.442695, %v4693_v42 }
 0x108   : > { %v4099_v44 = vpop.eup %4098  ;;  %4114 = vpow2.f32 %v3689_v35  ;;  %v814_v56 = vmul.f32 %v4628_v49, %v696_v47  ;;  %v3935_v13 = vpop.f32.mrf.mxu0  ;;  %v4735_v35 = vld [vmem:[%s6212_s4 + $0x4] ss:$0 sm:$0xff]  ;;  %v1498_v38 = vadd.f32 %v1434_v24, %v1333_v20 }
 0x109   : > { %4116 = vrcp.f32 %v971_v43  ;;  %v974_v46 = vadd.f32 1.0, %v4099_v44  ;;  %v3694_v55 = vmul.f32 -1.442695, %v4696_v45  ;;  %v817_v28 = vmul.f32 %v3935_v13, %v4628_v49  ;;  %v4748_v43 = vld [vmem:[%s6212_s4 + $0x3] ss:$0 sm:$0xff] }
 0x10a   : > { %v4101_v48 = vpop.eup %4100  ;;  %4118 = vpow2.f32 %v3692_v41  ;;  %v4715_v4 = vadd.f32 %v4633_v51, %v814_v56  ;;  %v706_v33 = vpop.f32.mrf.mxu0  ;;  %v4753_v44 = vld [vmem:[%s6212_s4 + $0x7] ss:$0 sm:$0xff]  ;;  %v4778_v13 = vld [vmem:[%s6212_s4 + $0x5] ss:$0 sm:$0xff] }
 0x10b   : > { %4120 = vrcp.f32 %v974_v46  ;;  %v973_v52 = vadd.f32 1.0, %v4101_v48  ;;  %v4756_v46 = vmul.f32 %v4628_v49, %v706_v33 }
 0x10c   : > { %v4103_v60 = vpop.eup %4102 }
 0x10d   : > { %4122 = vrcp.f32 %v973_v52  ;;  %v976_v26 = vadd.f32 1.0, %v4103_v60 }
 0x10e   : > { %4124 = vpow2.f32 %v3691_v50 }
 0x10f   : > { %4126 = vpow2.f32 %v3694_v55 }
 0x110   : > { %v4105_v0 = vpop.eup %4104 }
 0x111   : > { %v4107_v5 = vpop.eup %4106  ;;  %v1066_v7 = vmul.f32 %v4105_v0, %v4637_v54  ;;  %v3693_v54 = vmul.f32 -1.442695, %v4715_v4 }
 0x112   : > { %v4109_v11 = vpop.eup %4108  ;;  %v975_v30 = vadd.f32 1.0, %v4107_v5 }
 0x113   : > { %v4111_v15 = vpop.eup %4110  ;;  %1099 = vst [vmem:[#allocation2 + $0x21] sm:$0xff] %v1066_v7  ;;  %v1065_v16 = vmul.f32 %v4109_v11, %v4642_v58  ;;  %4128 = vpow2.f32 %v3693_v54  ;;  %v1271_v41 = vmul.f32 %v4709_v61, %v1066_v7  ;;  %v1764_v48 = vmul.f32 %v4735_v35, %v1066_v7 }
 0x114   : > { %v4113_v18 = vpop.eup %4112  ;;  %v978_v32 = vadd.f32 1.0, %v4111_v15  ;;  %4130 = vrcp.f32 %v976_v26 }
 0x115   : > { %v4115_v23 = vpop.eup %4114  ;;  %1098 = vst [vmem:[#allocation2 + $0x19] sm:$0xff] %v1065_v16  ;;  %v1068_v25 = vmul.f32 %v4113_v18, %v4647_v62  ;;  %4132 = vrcp.f32 %v975_v30  ;;  %v1270_v50 = vmul.f32 %v4709_v61, %v1065_v16  ;;  %v1763_v52 = vmul.f32 %v4735_v35, %v1065_v16 }
 0x116   : > { %v4117_v29 = vpop.eup %4116  ;;  %v977_v62 = vadd.f32 1.0, %v4115_v23  ;;  %4134 = vrcp.f32 %v978_v32 }
 0x117   : > { %v4119_v31 = vpop.eup %4118  ;;  %1101 = vst [vmem:[#allocation2 + $0x39] sm:$0xff] %v1068_v25  ;;  %v4730_v58 = vmul.f32 %v4117_v29, %v4652_v2  ;;  %v4742_v2 = vadd.f32 %v4633_v51, %v817_v28  ;;  %v1273_v59 = vmul.f32 %v4709_v61, %v1068_v25  ;;  %v1766_v60 = vmul.f32 %v4735_v35, %v1068_v25 }
 0x118   : > { %v4121_v34 = vpop.eup %4120  ;;  %4136 = vrcp.f32 %v977_v62  ;;  %v2260_v9 = vmul.f32 %v4753_v44, %v1068_v25 }
 0x119   : > { %1100 = vst [vmem:[#allocation2 + $0x31] sm:$0xff] %v4730_v58  ;;  %v4739_v39 = vmul.f32 %v4121_v34, %v4657_v6  ;;  %v980_v6 = vadd.f32 1.0, %v4119_v31  ;;  %v1272_v12 = vmul.f32 %v4709_v61, %v4730_v58  ;;  %v4788_v31 = vld [vmem:[%s6212_s4 + $0x6] ss:$0 sm:$0xff] }
 0x11a   : > { %v4123_v40 = vpop.eup %4122  ;;  %v1399_v1 = vld [vmem:[#allocation2 + $0x22] sm:$0xff] }
 0x11b   : > { %v4125_v47 = vpop.eup %4124  ;;  %1103 = vst [vmem:[#allocation2 + $0x51] sm:$0xff] %v4739_v39  ;;  %v4765_v63 = vmul.f32 %v4123_v40, %v4662_v10  ;;  %4138 = vrcp.f32 %v980_v6  ;;  %v1436_v20 = vmul.f32 %v4721_v8, %v1399_v1  ;;  %v1929_v32 = vmul.f32 %v4778_v13, %v1399_v1 }
 0x11c   : > { %v1132_v55 = vld [vmem:[#allocation2 + $0x18] sm:$0xff]  ;;  %v1133_v56 = vld [vmem:[#allocation2 + $0x20] sm:$0xff]  ;;  %v4127_v0 = vpop.eup %4126  ;;  %v979_v10 = vadd.f32 1.0, %v4125_v47  ;;  %v1765_v6 = vmul.f32 %v4735_v35, %v4730_v58 }
 0x11d   : > { %v1398_v57 = vld [vmem:[#allocation2 + $0x1a] sm:$0xff]  ;;  %v1169_v3 = vmul.f32 %v4702_v53, %v1132_v55  ;;  %v1170_v5 = vmul.f32 %v4702_v53, %v1133_v56  ;;  %v1598_v7 = vmul.f32 %v4748_v43, %v1132_v55  ;;  %v1599_v11 = vmul.f32 %v4748_v43, %v1133_v56  ;;  %1102 = vst [vmem:[#allocation2 + $0x49] sm:$0xff] %v4765_v63 }
 0x11e   : > { %v1435_v18 = vmul.f32 %v4721_v8, %v1398_v57  ;;  %v1928_v54 = vmul.f32 %v4778_v13, %v1398_v57  ;;  %v982_v25 = vadd.f32 1.0, %v4127_v0  ;;  %v1401_v47 = vld [vmem:[#allocation2 + $0x3a] sm:$0xff]  ;;  %4140 = vrcp.f32 %v979_v10 }
 0x11f   : > { %v1334_v15 = vadd.f32 %v1270_v50, %v1169_v3  ;;  %v1335_v16 = vadd.f32 %v1271_v41, %v1170_v5  ;;  %v1662_v19 = vadd.f32 %v1598_v7, %v1497_v37  ;;  %v1663_v22 = vadd.f32 %v1599_v11, %v1498_v38  ;;  %v4803_v5 = vld [vmem:[%s6212_s4 + $0x8] ss:$0 sm:$0xff] }
 0x120   : > { %v1134_v23 = vld [vmem:[#allocation2 + $0x30] sm:$0xff]  ;;  %v1135_v24 = vld [vmem:[#allocation2 + $0x38] sm:$0xff]  ;;  %v4796_v56 = vpop.eup %4128  ;;  %4142 = vrcp.f32 %v982_v25  ;;  %v4815_v25 = vld [vmem:[%s6213_s5] ss:$0 sm:$0xff] }
 0x121   : > { %v1499_v26 = vadd.f32 %v1435_v18, %v1334_v15  ;;  %v1827_v28 = vadd.f32 %v1763_v52, %v1662_v19  ;;  %v1171_v29 = vmul.f32 %v4702_v53, %v1134_v23  ;;  %v1172_v30 = vmul.f32 %v4702_v53, %v1135_v24  ;;  %v1400_v34 = vld [vmem:[#allocation2 + $0x32] sm:$0xff]  ;;  %v4131_v3 = vpop.eup %4130 }
 0x122   : > { %v1828_v33 = vadd.f32 %v1764_v48, %v1663_v22  ;;  %v1500_v37 = vadd.f32 %v1436_v20, %v1335_v16  ;;  %v1600_v62 = vmul.f32 %v4748_v43, %v1134_v23  ;;  %v1601_v41 = vmul.f32 %v4748_v43, %v1135_v24  ;;  %v4133_v15 = vpop.eup %4132 }
 0x123   : > { %v1992_v38 = vadd.f32 %v1928_v54, %v1827_v28  ;;  %v1336_v40 = vadd.f32 %v1272_v12, %v1171_v29  ;;  %v2094_v55 = vmul.f32 %v4788_v31, %v1134_v23  ;;  %v1337_v48 = vadd.f32 %v1273_v59, %v1172_v30  ;;  %v4135_v22 = vpop.eup %4134 }
 0x124   : > { %v1664_v50 = vadd.f32 %v1600_v62, %v1499_v26  ;;  %v1993_v52 = vadd.f32 %v1929_v32, %v1828_v33  ;;  %v1437_v57 = vmul.f32 %v4721_v8, %v1400_v34  ;;  %v1665_v0 = vadd.f32 %v1601_v41, %v1500_v37  ;;  %v1136_v10 = vld [vmem:[#allocation2 + $0x48] sm:$0xff]  ;;  %v1137_v20 = vld [vmem:[#allocation2 + $0x50] sm:$0xff] }
 0x125   : > { %v2095_v1 = vmul.f32 %v4788_v31, %v1135_v24  ;;  %v2158_v11 = vadd.f32 %v2094_v55, %v1992_v38  ;;  %v2259_v12 = vmul.f32 %v4753_v44, %v4730_v58  ;;  %v1438_v59 = vmul.f32 %v4721_v8, %v1401_v47  ;;  %v4137_v28 = vpop.eup %4136  ;;  %v3938_v55 = vpop.f32.mrf.mxu0 }
 0x126   : > { %v1829_v7 = vadd.f32 %v1765_v6, %v1664_v50  ;;  %v1501_v16 = vadd.f32 %v1437_v57, %v1336_v40  ;;  %v1830_v18 = vadd.f32 %v1766_v60, %v1665_v0  ;;  %v1931_v54 = vmul.f32 %v4778_v13, %v1401_v47  ;;  %v1402_v0 = vld [vmem:[#allocation2 + $0x4a] sm:$0xff] }
 0x127   : > { %v2159_v19 = vadd.f32 %v2095_v1, %v1993_v52  ;;  %v1930_v23 = vmul.f32 %v4778_v13, %v1400_v34  ;;  %v2323_v24 = vadd.f32 %v2259_v12, %v2158_v11  ;;  %v2424_v26 = vmul.f32 %v4803_v5, %v1400_v34 }
 0x128   : > { %v2425_v58 = vmul.f32 %v4803_v5, %v1401_v47  ;;  %v1502_v60 = vadd.f32 %v1438_v59, %v1337_v48  ;;  %v1602_v30 = vmul.f32 %v4748_v43, %v1136_v10  ;;  %v1768_v37 = vmul.f32 %v4735_v35, %v4739_v39  ;;  %v4139_v34 = vpop.eup %4138  ;;  %v4829_v48 = vld [vmem:[%s6214_s6] ss:$0 sm:$0xff]  ;;  %v1403_v59 = vld [vmem:[#allocation2 + $0x52] sm:$0xff] }
 0x129   : > { %v2324_v29 = vadd.f32 %v2260_v9, %v2159_v19  ;;  %v1994_v32 = vadd.f32 %v1930_v23, %v1829_v7  ;;  %v2488_v33 = vadd.f32 %v2424_v26, %v2323_v24  ;;  %v1603_v62 = vmul.f32 %v4748_v43, %v1137_v20 }
 0x12a   : > { %v1666_v40 = vadd.f32 %v1602_v30, %v1501_v16  ;;  %v1767_v9 = vmul.f32 %v4735_v35, %v4765_v63  ;;  %v1995_v41 = vadd.f32 %v1931_v54, %v1830_v18  ;;  %v2096_v50 = vmul.f32 %v4788_v31, %v1136_v10 }
 0x12b   : > { %v2489_v38 = vadd.f32 %v2425_v58, %v2324_v29  ;;  %v2591_v6 = vmul.f32 %v4815_v25, %v2488_v33  ;;  %v1667_v47 = vadd.f32 %v1603_v62, %v1502_v60  ;;  %v2097_v52 = vmul.f32 %v4788_v31, %v1137_v20  ;;  %v716_v29 = vpop.f32.mrf.mxu0  ;;  %v4141_v60 = vpop.eup %4140 }
 0x12c   : > { %v2262_v57 = vmul.f32 %v4753_v44, %v4739_v39  ;;  %v1831_v1 = vadd.f32 %v1767_v9, %v1666_v40  ;;  %v2261_v7 = vmul.f32 %v4753_v44, %v4765_v63  ;;  %v1072_v11 = vmul.f32 %v4131_v3, %v4667_v14 }
 0x12d   : > { %v2592_v12 = vmul.f32 %v4815_v25, %v2489_v38  ;;  %v1832_v16 = vadd.f32 %v1768_v37, %v1667_v47  ;;  %v2160_v18 = vadd.f32 %v2096_v50, %v1994_v32  ;;  %v2161_v19 = vadd.f32 %v2097_v52, %v1995_v41  ;;  %v4143_v40 = vpop.eup %4142 }
 0x12e   : > { %v1173_v54 = vmul.f32 %v4702_v53, %v1136_v10  ;;  %1105 = vst [vmem:[#allocation2 + $0x69] sm:$0xff] %v1072_v11  ;;  %v3696_v23 = vmul.f32 -1.442695, %v4742_v2  ;;  %v4841_v24 = vadd.f32 %v4633_v51, %v4756_v46  ;;  %v4844_v26 = vadd.f32 %v4829_v48, %v2591_v6 }
 0x12f   : > { %v2325_v58 = vadd.f32 %v2261_v7, %v2160_v18  ;;  %v2326_v14 = vadd.f32 %v2262_v57, %v2161_v19  ;;  %v2426_v3 = vmul.f32 %v4803_v5, %v1402_v0  ;;  %v2427_v30 = vmul.f32 %v4803_v5, %v1403_v59 }
 0x130   : > { %6247 = vst [vmem:[#allocation4_spill] sm:$0xff] %v4841_v24  ;;  %v1274_v10 = vmul.f32 %v4709_v61, %v4765_v63  ;;  %v1071_v32 = vmul.f32 %v4133_v15, %v4671_v17  ;;  %v819_v33 = vmul.f32 %v3938_v55, %v4628_v49  ;;  %v4853_v46 = vadd.f32 %v4829_v48, %v2592_v12 }
 0x131   : > { %v1174_v37 = vmul.f32 %v4702_v53, %v1137_v20  ;;  %v2490_v62 = vadd.f32 %v2426_v3, %v2325_v58  ;;  %v4857_v38 = vmul.f32 %v4135_v22, %v4676_v21  ;;  %v1275_v9 = vmul.f32 %v4709_v61, %v4739_v39 }
 0x132   : > { %1104 = vst [vmem:[#allocation2 + $0x61] sm:$0xff] %v1071_v32  ;;  %4144 = vpow2.f32 %v3696_v23  ;;  %v4862_v63 = vmul.f32 -1.442695, %v4841_v24  ;;  %v4865_v17 = vmul.f32 %v4628_v49, %v716_v29  ;;  %v3724_v15 = vmul.f32 -1.442695, %v4844_v26 }
 0x133   : > { %v1338_v41 = vadd.f32 %v1274_v10, %v1173_v54  ;;  %v1439_v20 = vmul.f32 %v4721_v8, %v1402_v0  ;;  %v2491_v6 = vadd.f32 %v2427_v30, %v2326_v14  ;;  %1107 = vst [vmem:[#allocation2 + $0x81] sm:$0xff] %v4857_v38  ;;  %v2593_v21 = vmul.f32 %v4815_v25, %v2490_v62 }
 0x134   : > { %v4872_v39 = vmul.f32 %v4137_v28, %v4681_v27  ;;  %v4875_v22 = vmul.f32 %v4139_v34, %v4688_v36  ;;  %v4878_v47 = vmul.f32 %v4141_v60, %v4693_v42  ;;  %v3725_v50 = vmul.f32 -1.442695, %v4853_v46 }
 0x135   : > { %v1339_v52 = vadd.f32 %v1275_v9, %v1174_v37  ;;  %v1932_v55 = vmul.f32 %v4778_v13, %v1402_v0  ;;  %v4883_v57 = vmul.f32 %v4143_v40, %v4696_v45  ;;  %v1440_v7 = vmul.f32 %v4721_v8, %v1403_v59  ;;  %v1405_v40 = vld [vmem:[#allocation2 + $0x6a] sm:$0xff] }
 0x136   : > { %v1933_v12 = vmul.f32 %v4778_v13, %v1403_v59  ;;  %1106 = vst [vmem:[#allocation2 + $0x79] sm:$0xff] %v4872_v39  ;;  %1109 = vst [vmem:[#allocation2 + $0x99] sm:$0xff] %v4875_v22  ;;  %v981_v27 = vadd.f32 1.0, %v4796_v56  ;;  %v4892_v36 = vadd.f32 %v4633_v51, %v819_v33  ;;  %v1503_v42 = vadd.f32 %v1439_v20, %v1338_v41 }
 0x137   : > { %1108 = vst [vmem:[#allocation2 + $0x91] sm:$0xff] %v4878_v47  ;;  %v1996_v28 = vadd.f32 %v1932_v55, %v1831_v1  ;;  %v1277_v45 = vmul.f32 %v4709_v61, %v1072_v11  ;;  %v1770_v34 = vmul.f32 %v4735_v35, %v1072_v11  ;;  %1111 = vst [vmem:[#allocation2 + $0xb1] sm:$0xff] %v4883_v57  ;;  %4146 = vpow2.f32 %v3724_v15 }
 0x138   : > { %v2594_v0 = vmul.f32 %v4815_v25, %v2491_v6  ;;  %v4899_v59 = vadd.f32 %v4829_v48, %v2593_v21  ;;  %v2264_v18 = vmul.f32 %v4753_v44, %v1072_v11  ;;  %4148 = vpow2.f32 %v3725_v50 }
 0x139   : > { %v1138_v56 = vld [vmem:[#allocation2 + $0x60] sm:$0xff]  ;;  %v1139_v19 = vld [vmem:[#allocation2 + $0x68] sm:$0xff]  ;;  %v1276_v54 = vmul.f32 %v4709_v61, %v1071_v32  ;;  %v1504_v1 = vadd.f32 %v1440_v7, %v1339_v52  ;;  %v1997_v23 = vadd.f32 %v1933_v12, %v1832_v16  ;;  %v1769_v3 = vmul.f32 %v4735_v35, %v1071_v32 }
 0x13a   : > { %v1175_v58 = vmul.f32 %v4702_v53, %v1138_v56  ;;  %v1176_v14 = vmul.f32 %v4702_v53, %v1139_v19  ;;  %v2263_v29 = vmul.f32 %v4753_v44, %v1071_v32  ;;  %v1404_v60 = vld [vmem:[#allocation2 + $0x62] sm:$0xff]  ;;  %v1604_v30 = vmul.f32 %v4748_v43, %v1138_v56 }
 0x13b   : > { %v1605_v11 = vmul.f32 %v4748_v43, %v1139_v19  ;;  %v2098_v10 = vmul.f32 %v4788_v31, %v1138_v56  ;;  %v1279_v33 = vmul.f32 %v4709_v61, %v4857_v38  ;;  %v4913_v16 = vadd.f32 %v4829_v48, %v2594_v0 }
 0x13c   : > { %v3726_v37 = vmul.f32 -1.442695, %v4899_v59  ;;  %v2099_v62 = vmul.f32 %v4788_v31, %v1139_v19  ;;  %v1772_v32 = vmul.f32 %v4735_v35, %v4857_v38  ;;  %v1340_v9 = vadd.f32 %v1276_v54, %v1175_v58 }
 0x13d   : > { %v1668_v15 = vadd.f32 %v1604_v30, %v1503_v42  ;;  %v1669_v41 = vadd.f32 %v1605_v11, %v1504_v1  ;;  %v2162_v20 = vadd.f32 %v2098_v10, %v1996_v28  ;;  %v1341_v6 = vadd.f32 %v1277_v45, %v1176_v14  ;;  %v1140_v56 = vld [vmem:[#allocation2 + $0x78] sm:$0xff]  ;;  %v1141_v19 = vld [vmem:[#allocation2 + $0x80] sm:$0xff] }
 0x13e   : > { %v1441_v21 = vmul.f32 %v4721_v8, %v1404_v60  ;;  %v2163_v50 = vadd.f32 %v2099_v62, %v1997_v23  ;;  %4150 = vrcp.f32 %v981_v27  ;;  %v2428_v0 = vmul.f32 %v4803_v5, %v1404_v60 }
 0x13f   : > { %v4920_v52 = vpop.eup %4144  ;;  %v1833_v55 = vadd.f32 %v1769_v3, %v1668_v15  ;;  %v1834_v7 = vadd.f32 %v1770_v34, %v1669_v41  ;;  %v2327_v12 = vadd.f32 %v2263_v29, %v2162_v20  ;;  %v1442_v24 = vmul.f32 %v4721_v8, %v1405_v40  ;;  %v1407_v20 = vld [vmem:[#allocation2 + $0x82] sm:$0xff] }
 0x140   : > { %v1935_v42 = vmul.f32 %v4778_v13, %v1405_v40  ;;  %v2429_v28 = vmul.f32 %v4803_v5, %v1405_v40  ;;  %v2328_v45 = vadd.f32 %v2264_v18, %v2163_v50  ;;  %4152 = vpow2.f32 %v3726_v37 }
 0x141   : > { %v1505_v54 = vadd.f32 %v1441_v21, %v1340_v9  ;;  %v2492_v1 = vadd.f32 %v2428_v0, %v2327_v12  ;;  %v1278_v27 = vmul.f32 %v4709_v61, %v4872_v39  ;;  %v1934_v34 = vmul.f32 %v4778_v13, %v1404_v60  ;;  %v1406_v21 = vld [vmem:[#allocation2 + $0x7a] sm:$0xff] }
 0x142   : > { %v2493_v23 = vadd.f32 %v2429_v28, %v2328_v45  ;;  %v1177_v58 = vmul.f32 %v4702_v53, %v1140_v56  ;;  %v1178_v14 = vmul.f32 %v4702_v53, %v1141_v19  ;;  %v1506_v29 = vadd.f32 %v1442_v24, %v1341_v6 }
 0x143   : > { %v2595_v3 = vmul.f32 %v4815_v25, %v2492_v1  ;;  %v1606_v30 = vmul.f32 %v4748_v43, %v1140_v56  ;;  %v1607_v18 = vmul.f32 %v4748_v43, %v1141_v19  ;;  %v3727_v11 = vmul.f32 -1.442695, %v4913_v16 }
 0x144   : > { %v1998_v10 = vadd.f32 %v1934_v34, %v1833_v55  ;;  %v2596_v37 = vmul.f32 %v4815_v25, %v2493_v23  ;;  %v1999_v62 = vadd.f32 %v1935_v42, %v1834_v7  ;;  %v4147_v40 = vpop.eup %4146  ;;  %v1771_v41 = vmul.f32 %v4735_v35, %v4872_v39  ;;  %v1143_v23 = vld [vmem:[#allocation2 + $0x98] sm:$0xff] }
 0x145   : > { %v4937_v60 = vadd.f32 %v4829_v48, %v2595_v3  ;;  %v1670_v9 = vadd.f32 %v1606_v30, %v1505_v54  ;;  %v1671_v15 = vadd.f32 %v1607_v18, %v1506_v29  ;;  %v4149_v24 = vpop.eup %4148  ;;  %v2266_v6 = vmul.f32 %v4753_v44, %v4857_v38 }
 0x146   : > { %v2100_v50 = vmul.f32 %v4788_v31, %v1140_v56  ;;  %v2101_v55 = vmul.f32 %v4788_v31, %v1141_v19  ;;  %v2265_v7 = vmul.f32 %v4753_v44, %v4872_v39  ;;  %v1342_v12 = vadd.f32 %v1278_v27, %v1177_v58  ;;  %v1142_v27 = vld [vmem:[#allocation2 + $0x90] sm:$0xff] }
 0x147   : > { %v1343_v0 = vadd.f32 %v1279_v33, %v1178_v14  ;;  %v1835_v42 = vadd.f32 %v1771_v41, %v1670_v9  ;;  %v1836_v28 = vadd.f32 %v1772_v32, %v1671_v15  ;;  %4154 = vpow2.f32 %v3727_v11 }
 0x148   : > { %v4948_v45 = vadd.f32 %v4829_v48, %v2596_v37  ;;  %v2164_v54 = vadd.f32 %v2100_v50, %v1998_v10  ;;  %v2165_v1 = vadd.f32 %v2101_v55, %v1999_v62  ;;  %v3728_v38 = vmul.f32 -1.442695, %v4937_v60 }
 0x149   : > { %v1444_v34 = vmul.f32 %v4721_v8, %v1407_v20  ;;  %v1443_v56 = vmul.f32 %v4721_v8, %v1406_v21  ;;  %v4955_v19 = vadd.f32 %v4633_v51, %v4865_v17  ;;  %v1936_v39 = vmul.f32 %v4778_v13, %v1406_v21 }
 0x14a   : > { %v2329_v33 = vadd.f32 %v2265_v7, %v2164_v54  ;;  %v2330_v32 = vadd.f32 %v2266_v6, %v2165_v1  ;;  %4156 = vpow2.f32 %v4862_v63  ;;  %v2430_v3 = vmul.f32 %v4803_v5, %v1406_v21 }
 0x14b   : > { %v4151_v58 = vpop.eup %4150  ;;  %v1507_v14 = vadd.f32 %v1443_v56, %v1342_v12  ;;  %v1508_v29 = vadd.f32 %v1444_v34, %v1343_v0  ;;  %v3698_v30 = vmul.f32 -1.442695, %v4892_v36  ;;  %v3729_v18 = vmul.f32 -1.442695, %v4948_v45  ;;  %v3941_v12 = vpop.f32.mrf.mxu0 }
 0x14c   : > { %v1937_v17 = vmul.f32 %v4778_v13, %v1407_v20  ;;  %v2431_v11 = vmul.f32 %v4803_v5, %v1407_v20  ;;  %v2000_v10 = vadd.f32 %v1936_v39, %v1835_v42  ;;  %4158 = vpow2.f32 %v3728_v38  ;;  %v1408_v38 = vld [vmem:[#allocation2 + $0x92] sm:$0xff] }
 0x14d   : > { %v2494_v37 = vadd.f32 %v2430_v3, %v2329_v33  ;;  %v1608_v62 = vmul.f32 %v4748_v43, %v1142_v27  ;;  %v1609_v63 = vmul.f32 %v4748_v43, %v1143_v23  ;;  %v4153_v9 = vpop.eup %4152  ;;  %v1774_v15 = vmul.f32 %v4735_v35, %v4875_v22 }
 0x14e   : > { %v1773_v41 = vmul.f32 %v4735_v35, %v4878_v47  ;;  %v2001_v6 = vadd.f32 %v1937_v17, %v1836_v28  ;;  %v2267_v21 = vmul.f32 %v4753_v44, %v4878_v47  ;;  %v2495_v50 = vadd.f32 %v2431_v11, %v2330_v32 }
 0x14f   : > { %v1672_v20 = vadd.f32 %v1608_v62, %v1507_v14  ;;  %v1673_v55 = vadd.f32 %v1609_v63, %v1508_v29  ;;  %v2102_v7 = vmul.f32 %v4788_v31, %v1142_v27  ;;  %v2758_v0 = vadd.f32 1.0, %v4147_v40 }
 0x150   : > { %v2759_v42 = vadd.f32 1.0, %v4149_v24  ;;  %4160 = vpow2.f32 %v3729_v18  ;;  %v2103_v54 = vmul.f32 %v4788_v31, %v1143_v23  ;;  %v2597_v1 = vmul.f32 %v4815_v25, %v2494_v37  ;;  %v1409_v24 = vld [vmem:[#allocation2 + $0x9a] sm:$0xff] }
 0x151   : > { %v1837_v34 = vadd.f32 %v1773_v41, %v1672_v20  ;;  %v1838_v56 = vadd.f32 %v1774_v15, %v1673_v55  ;;  %v2166_v28 = vadd.f32 %v2102_v7, %v2000_v10  ;;  %v2268_v39 = vmul.f32 %v4753_v44, %v4875_v22  ;;  %v726_v10 = vpop.f32.mrf.mxu0 }
 0x152   : > { %v2167_v33 = vadd.f32 %v2103_v54, %v2001_v6  ;;  %v3697_v32 = vmul.f32 -1.442695, %v4955_v19  ;;  %v821_v14 = vmul.f32 %v3941_v12, %v4628_v49  ;;  %v2760_v3 = vadd.f32 1.0, %v4153_v9 }
 0x153   : > { %v2598_v40 = vmul.f32 %v4815_v25, %v2495_v50  ;;  %v2331_v29 = vadd.f32 %v2267_v21, %v2166_v28  ;;  %4162 = vpow2.f32 %v3698_v30  ;;  %v1179_v18 = vmul.f32 %v4702_v53, %v1142_v27  ;;  %v5004_v55 = vpop.f32.mrf.mxu0 }
 0x154   : > { %4164 = vrcp.f32 %v2758_v0  ;;  %v2332_v17 = vadd.f32 %v2268_v39, %v2167_v33  ;;  %v2432_v11 = vmul.f32 %v4803_v5, %v1408_v38  ;;  %v4155_v37 = vpop.eup %4154  ;;  %v4983_v62 = vadd.f32 %v4829_v48, %v2597_v1 }
 0x155   : > { %4166 = vrcp.f32 %v2759_v42  ;;  %v1280_v63 = vmul.f32 %v4709_v61, %v4878_v47  ;;  %v4988_v9 = vmul.f32 %v4151_v58, %v4715_v4  ;;  %v2433_v30 = vmul.f32 %v4803_v5, %v1409_v24 }
 0x156   : > { %v1180_v15 = vmul.f32 %v4702_v53, %v1143_v23  ;;  %v2496_v27 = vadd.f32 %v2432_v11, %v2331_v29  ;;  %v984_v41 = vadd.f32 1.0, %v4920_v52  ;;  %4168 = vrcp.f32 %v2760_v3  ;;  %v736_v29 = vpop.f32.mrf.mxu0 }
 0x157   : > { %v4157_v6 = vpop.eup %4156  ;;  %v4994_v21 = vadd.f32 %v4829_v48, %v2598_v40  ;;  %v1281_v50 = vmul.f32 %v4709_v61, %v4875_v22  ;;  %1110 = vst [vmem:[#allocation2 + $0xa9] sm:$0xff] %v4988_v9  ;;  %v820_v4 = vmul.f32 %v4628_v49, %v726_v10  ;;  %v2761_v47 = vadd.f32 1.0, %v4155_v37 }
 0x158   : > { %v1344_v58 = vadd.f32 %v1280_v63, %v1179_v18  ;;  %v2497_v20 = vadd.f32 %v2433_v30, %v2332_v17  ;;  %4170 = vrcp.f32 %v984_v41  ;;  %v3730_v23 = vmul.f32 -1.442695, %v4983_v62 }
 0x159   : > { %v5002_v52 = vadd.f32 %v4633_v51, %v821_v14  ;;  %v4159_v7 = vpop.eup %4158  ;;  %v1345_v12 = vadd.f32 %v1281_v50, %v1180_v15  ;;  %v1445_v0 = vmul.f32 %v4721_v8, %v1408_v38  ;;  %v2599_v22 = vmul.f32 %v4815_v25, %v2496_v27 }
 0x15a   : > { %4172 = vpow2.f32 %v3697_v32  ;;  %v3731_v49 = vmul.f32 -1.442695, %v4994_v21  ;;  %v1446_v42 = vmul.f32 %v4721_v8, %v1409_v24  ;;  %v1938_v54 = vmul.f32 %v4778_v13, %v1408_v38 }
 0x15b   : > { %v5012_v1 = vadd.f32 %v4633_v51, %v820_v4  ;;  %4174 = vrcp.f32 %v2761_v47  ;;  %v1939_v28 = vmul.f32 %v4778_v13, %v1409_v24  ;;  %v1509_v39 = vadd.f32 %v1445_v0, %v1344_v58 }
 0x15c   : > { %v2600_v33 = vmul.f32 %v4815_v25, %v2497_v20  ;;  %v2762_v3 = vadd.f32 1.0, %v4159_v7  ;;  %4176 = vpow2.f32 %v3730_v23  ;;  %v2002_v40 = vadd.f32 %v1938_v54, %v1837_v34 }
 0x15d   : > { %v4161_v14 = vpop.eup %4160  ;;  %v1776_v32 = vmul.f32 %v4735_v35, %v4883_v57  ;;  %v5019_v18 = vadd.f32 %v4829_v48, %v2599_v22  ;;  %v2270_v51 = vmul.f32 %v4753_v44, %v4883_v57  ;;  %v1510_v24 = vadd.f32 %v1446_v42, %v1345_v12 }
 0x15e   : > { %v1144_v38 = vld [vmem:[#allocation2 + $0xa8] sm:$0xff]  ;;  %v5023_v17 = vld [vmem:[#allocation2 + $0xb0] sm:$0xff]  ;;  %v2003_v11 = vadd.f32 %v1939_v28, %v1838_v56  ;;  %4178 = vpow2.f32 %v3731_v49  ;;  %v1775_v34 = vmul.f32 %v4735_v35, %v4988_v9  ;;  %v983_v37 = vadd.f32 1.0, %v4157_v6  ;;  %v3947_v6 = vpop.f32.mrf.mxu0 }
 0x15f   : > { %v1610_v10 = vmul.f32 %v4748_v43, %v1144_v38  ;;  %v5029_v30 = vadd.f32 %v4829_v48, %v2600_v33  ;;  %v1611_v15 = vmul.f32 %v4748_v43, %v5023_v17  ;;  %v2104_v27 = vmul.f32 %v4788_v31, %v1144_v38 }
 0x160   : > { %v4163_v63 = vpop.eup %4162  ;;  %v2105_v41 = vmul.f32 %v4788_v31, %v5023_v17  ;;  %v2763_v50 = vadd.f32 1.0, %v4161_v14  ;;  %4180 = vrcp.f32 %v2762_v3  ;;  %v2269_v47 = vmul.f32 %v4753_v44, %v4988_v9 }
 0x161   : > { %v4165_v56 = vpop.eup %4164  ;;  %v1674_v4 = vadd.f32 %v1610_v10, %v1509_v39  ;;  %v3732_v20 = vmul.f32 -1.442695, %v5019_v18  ;;  %v1675_v23 = vadd.f32 %v1611_v15, %v1510_v24  ;;  %v2168_v7 = vadd.f32 %v2104_v27, %v2002_v40  ;;  %v746_v24 = vpop.f32.mrf.mxu0  ;;  %v1411_v15 = vld [vmem:[#allocation2 + $0xb2] sm:$0xff]  ;;  %v1410_v27 = vld [vmem:[#allocation2 + $0xaa] sm:$0xff] }
 0x162   : > { %v4167_v58 = vpop.eup %4166  ;;  %v2169_v12 = vadd.f32 %v2105_v41, %v2003_v11  ;;  %4182 = vrcp.f32 %v983_v37  ;;  %v986_v22 = vadd.f32 1.0, %v4163_v63  ;;  %v3733_v42 = vmul.f32 -1.442695, %v5029_v30 }
 0x163   : > { %v5039_v0 = vadd.f32 %v1775_v34, %v1674_v4  ;;  %v4169_v49 = vpop.eup %4168  ;;  %v5042_v54 = vadd.f32 %v1776_v32, %v1675_v23  ;;  %v2333_v28 = vadd.f32 %v2269_v47, %v2168_v7  ;;  %4184 = vrcp.f32 %v2763_v50 }
 0x164   : > { %v2334_v39 = vadd.f32 %v2270_v51, %v2169_v12  ;;  %v3700_v14 = vmul.f32 -1.442695, %v5002_v52  ;;  %v3699_v3 = vmul.f32 -1.442695, %v5012_v1  ;;  %v5047_v40 = vmul.f32 %v4165_v56, %v4844_v26  ;;  %v5062_v26 = vld [vmem:[%s6210_s2] ss:$0 sm:$0xff] }
 0x165   : > { %v4171_v33 = vpop.eup %4170  ;;  %v5050_v11 = vmul.f32 %v4167_v58, %v4853_v46  ;;  %4186 = vpow2.f32 %v3732_v20  ;;  %v5056_v51 = vmul.f32 %v4169_v49, %v4899_v59  ;;  %v823_v46 = vmul.f32 %v5062_v26, %v5004_v55  ;;  %v5074_v55 = vld [vmem:[%s6211_s3] ss:$0 sm:$0xff] }
 0x166   : > { %6248 = vst [vmem:[#allocation5_spill] sm:$0xff] %v5047_v40  ;;  %v5053_v10 = vmul.f32 %v4171_v33, %v4742_v2  ;;  %4188 = vrcp.f32 %v986_v22  ;;  %v3950_v2 = vpop.f32.mrf.mxu0  ;;  %v822_v41 = vmul.f32 %v5062_v26, %v736_v29  ;;  %v1181_v4 = vmul.f32 %v4702_v53, %v1144_v38 }
 0x167   : > { %6249 = vst [vmem:[#allocation6_spill] sm:$0xff] %v5050_v11  ;;  %v4173_v32 = vpop.eup %4172  ;;  %6250 = vst [vmem:[#allocation7_spill] sm:$0xff] %v5056_v51  ;;  %4190 = vpow2.f32 %v3733_v42  ;;  %v2950_v59 = vadd.f32 %v5050_v11, %v5047_v40  ;;  %v5077_v47 = vadd.f32 %v5074_v55, %v823_v46  ;;  %v1283_v58 = vmul.f32 %v4709_v61, %v4883_v57  ;;  %v3003_v57 = vld [vmem:[%s6215_s7 + $0x78] sm:$0xff]  ;;  %v5108_v46 = vld [vmem:[#allocation2] sm:$0xff] }
 0x168   : > { %1113 = vst [vmem:[#allocation2 + $0xc9] sm:$0xff] %v5053_v10  ;;  %v4175_v34 = vpop.eup %4174  ;;  %v985_v37 = vadd.f32 1.0, %v4173_v32  ;;  %4192 = vpow2.f32 %v3700_v14  ;;  %v1448_v20 = vmul.f32 %v4721_v8, %v1411_v15  ;;  %v1182_v29 = vmul.f32 %v4702_v53, %v5023_v17  ;;  %v756_v7 = vpop.f32.mrf.mxu0  ;;  %v3002_v53 = vld [vmem:[%s6215_s7 + $0x70] sm:$0xff]  ;;  %3961 = vmatpush3.msra.mxu0 %v3003_v57  ;;  %3992 = vmatprep.mubr.msk.f32.mxu0 %vm4385_vm0, %v5108_v46 }
 0x169   : > { %v4177_v63 = vpop.eup %4176  ;;  %4194 = vpow2.f32 %v3699_v3  ;;  %v2951_v50 = vadd.f32 %v2950_v59, %v5056_v51  ;;  %v2434_v23 = vmul.f32 %v4803_v5, %v1410_v27  ;;  %v5086_v12 = vmul.f32 %v4175_v34, %v4913_v16  ;;  %3962 = vmatprep.subr.mxu0 %v5108_v46  ;;  %3997 = vmatprep.mubr.msk.f32.mxu1 %vm4385_vm0, %v5108_v46  ;;  %v5261_v51 = vld [vmem:[%s6212_s4 + $0x2] ss:$0 sm:$0xff] }
 0x16a   : > { %4196 = vrcp.f32 %v985_v37  ;;  %v1941_v22 = vmul.f32 %v4778_v13, %v1411_v15  ;;  %v1282_v49 = vmul.f32 %v4709_v61, %v4988_v9  ;;  %v825_v42 = vmul.f32 %v5062_v26, %v3947_v6  ;;  %3963 = vmatpush3.msra.mxu0 %v3002_v53  ;;  %v2999_v53 = vld [vmem:[%s6215_s7 + $0x58] sm:$0xff] }
 0x16b   : > { %v4179_v56 = vpop.eup %4178  ;;  %6251 = vst [vmem:[#allocation8_spill] sm:$0xff] %v5086_v12  ;;  %v2764_v17 = vadd.f32 1.0, %v4177_v63  ;;  %v2435_v33 = vmul.f32 %v4803_v5, %v1411_v15  ;;  %v2498_v16 = vadd.f32 %v2434_v23, %v2333_v28  ;;  %v5100_v14 = vadd.f32 %v5074_v55, %v822_v41  ;;  %v3001_v28 = vld [vmem:[%s6215_s7 + $0x68] sm:$0xff]  ;;  %v6252_v63 = vld [vmem:[#allocation4_spill] sm:$0xff]  ;;  %v3953_v41 = vpop.f32.mrf.mxu0  ;;  %3964 = vmatprep.subr.mxu0 %v5108_v46 }
 0x16c   : > { %v5103_v61 = vadd.f32 %v2951_v50, %v5086_v12  ;;  %v2765_v9 = vadd.f32 1.0, %v4179_v56  ;;  %v1346_v6 = vadd.f32 %v1282_v49, %v1181_v4  ;;  %v5106_v32 = vmul.f32 -1.442695, %v5077_v47  ;;  %3965 = vmatpush3.msra.mxu0 %v3001_v28  ;;  %v2994_v12 = vld [vmem:[%s6215_s7 + $0x30] sm:$0xff] }
 0x16d   : > { %v4181_v38 = vpop.eup %4180  ;;  %v1347_v34 = vadd.f32 %v1283_v58, %v1182_v29  ;;  %v2499_v37 = vadd.f32 %v2435_v33, %v2334_v39  ;;  %v824_v15 = vmul.f32 %v5062_v26, %v746_v24  ;;  %v1447_v50 = vmul.f32 %v4721_v8, %v1410_v27  ;;  %v3000_v39 = vld [vmem:[%s6215_s7 + $0x60] sm:$0xff]  ;;  %3966 = vmatprep.subr.mxu0 %v5108_v46 }
 0x16e   : > { %v1940_v4 = vmul.f32 %v4778_v13, %v1410_v27  ;;  %v5121_v23 = vadd.f32 %v5074_v55, %v825_v42  ;;  %v827_v49 = vmul.f32 %v5062_v26, %v3950_v2  ;;  %4198 = vrcp.f32 %v2764_v17  ;;  %3967 = vmatpush3.msra.mxu0 %v3000_v39 }
 0x16f   : > { %v4183_v3 = vpop.eup %4182  ;;  %v2601_v24 = vmul.f32 %v4815_v25, %v2498_v16  ;;  %v5131_v8 = vmul.f32 -1.442695, %v5100_v14  ;;  %v826_v27 = vmul.f32 %v5062_v26, %v756_v7  ;;  %4200 = vrcp.f32 %v2765_v9  ;;  %3968 = vmatprep.subr.mxu0 %v5108_v46 }
 0x170   : > { %v5115_v59 = vmul.f32 %v4183_v3, %v6252_v63  ;;  %v4185_v56 = vpop.eup %4184  ;;  %v5134_v2 = vadd.f32 %v1447_v50, %v1346_v6  ;;  %v5137_v42 = vadd.f32 %v1940_v4, %v5039_v0  ;;  %v5140_v57 = vmul.f32 %v5062_v26, %v3953_v41  ;;  %3969 = vmatpush3.msra.mxu0 %v2999_v53  ;;  %v2997_v4 = vld [vmem:[%s6215_s7 + $0x48] sm:$0xff] }
 0x171   : > { %v5147_v7 = vmul.f32 %v4181_v38, %v4937_v60  ;;  %v2602_v33 = vmul.f32 %v4815_v25, %v2499_v37  ;;  %v5150_v16 = vadd.f32 %v1448_v20, %v1347_v34  ;;  %v5156_v9 = vadd.f32 %v1941_v22, %v5042_v54  ;;  %v2998_v60 = vld [vmem:[%s6215_s7 + $0x50] sm:$0xff]  ;;  %v5182_v37 = vld [vmem:[%s6212_s4 + $0x1] ss:$0 sm:$0xff]  ;;  %3970 = vmatprep.subr.mxu0 %v5108_v46 }
 0x172   : > { %v4187_v58 = vpop.eup %4186  ;;  %1112 = vst [vmem:[#allocation2 + $0xc1] sm:$0xff] %v5115_v59  ;;  %v5159_v6 = vmul.f32 -1.442695, %v5121_v23  ;;  %v5162_v28 = vadd.f32 %v5074_v55, %v824_v15  ;;  %v5173_v38 = vadd.f32 %v5074_v55, %v827_v49  ;;  %v5176_v22 = vadd.f32 %v5074_v55, %v826_v27  ;;  %3971 = vmatpush3.msra.mxu0 %v2998_v60  ;;  %v2995_v60 = vld [vmem:[%s6215_s7 + $0x38] sm:$0xff] }
 0x173   : > { %v4189_v29 = vpop.eup %4188  ;;  %6253 = vst [vmem:[#allocation4_spill] sm:$0xff] %v5147_v7  ;;  %v1285_v63 = vmul.f32 %v5182_v37, %v5053_v10  ;;  %v1778_v15 = vmul.f32 %v4735_v35, %v5053_v10  ;;  %v5190_v41 = vmul.f32 %v4753_v44, %v5053_v10  ;;  %v2953_v49 = vadd.f32 %v5103_v61, %v5147_v7 }
 0x174   : > { %v4191_v17 = vpop.eup %4190  ;;  %v5153_v0 = vmul.f32 %v4189_v29, %v4892_v36  ;;  %v5169_v36 = vadd.f32 %v4829_v48, %v2601_v24  ;;  %v5200_v39 = vadd.f32 %v4829_v48, %v2602_v33  ;;  %4202 = vpow2.f32 %v5106_v32  ;;  %3972 = vmatprep.subr.mxu0 %v5108_v46 }
 0x175   : > { %v4193_v3 = vpop.eup %4192  ;;  %v5207_v44 = vmul.f32 %v4185_v56, %v4948_v45  ;;  %v5209_v10 = vadd.f32 1.0, %v4187_v58  ;;  %v3703_v29 = vmul.f32 -1.442695, %v5162_v28  ;;  %v5216_v61 = vadd.f32 1.0, %v4191_v17  ;;  %v5224_v45 = vld [vmem:[%s6212_s4] ss:$0 sm:$0xff]  ;;  %3973 = vmatpush3.msra.mxu0 %v2997_v4 }
 0x176   : > { %v4195_v20 = vpop.eup %4194  ;;  %1115 = vst [vmem:[#allocation2 + $0xe1] sm:$0xff] %v5153_v0  ;;  %v988_v54 = vadd.f32 1.0, %v4193_v3  ;;  %v5219_v32 = vmul.f32 -1.442695, %v5169_v36  ;;  %v1284_v53 = vmul.f32 %v5182_v37, %v5115_v59  ;;  %3974 = vmatprep.subr.mxu0 %v5108_v46 }
 0x177   : > { %v4197_v34 = vpop.eup %4196  ;;  %v987_v50 = vadd.f32 1.0, %v4195_v20  ;;  %6254 = vst [vmem:[#allocation9_spill] sm:$0xff] %v5207_v44  ;;  %v5238_v20 = vadd.f32 %v2953_v49, %v5207_v44 }
 0x178   : > { %v5203_v35 = vmul.f32 %v4197_v34, %v4955_v19  ;;  %4204 = vrcp.f32 %v988_v54  ;;  %v2996_v19 = vld [vmem:[%s6215_s7 + $0x40] sm:$0xff]  ;;  %v5241_v54 = vmul.f32 -1.442695, %v5200_v39 }
 0x179   : > { %v1146_v24 = vld [vmem:[#allocation2 + $0xc0] sm:$0xff]  ;;  %v1147_v27 = vld [vmem:[#allocation2 + $0xc8] sm:$0xff]  ;;  %4206 = vrcp.f32 %v987_v50  ;;  %3975 = vmatpush3.msra.mxu0 %v2996_v19 }
 0x17a   : > { %v1183_v56 = vmul.f32 %v5224_v45, %v1146_v24  ;;  %1114 = vst [vmem:[#allocation2 + $0xd9] sm:$0xff] %v5203_v35  ;;  %v1184_v58 = vmul.f32 %v5224_v45, %v1147_v27  ;;  %v1412_v17 = vld [vmem:[#allocation2 + $0xc2] sm:$0xff]  ;;  %v1612_v33 = vmul.f32 %v4748_v43, %v1146_v24  ;;  %v1613_v3 = vmul.f32 %v4748_v43, %v1147_v27  ;;  %v1413_v50 = vld [vmem:[#allocation2 + $0xca] sm:$0xff] }
 0x17b   : > { %v5246_v34 = vld [vmem:[%s6212_s4 + $0x4] ss:$0 sm:$0xff]  ;;  %4208 = vpow2.f32 %v5131_v8  ;;  %v2106_v44 = vmul.f32 %v4788_v31, %v1146_v24  ;;  %3976 = vmatprep.subr.mxu0 %v5108_v46  ;;  %v1449_v8 = vmul.f32 %v5261_v51, %v1412_v17  ;;  %v2107_v19 = vmul.f32 %v4788_v31, %v1147_v27  ;;  %v5273_v24 = vpop.eup %4198  ;;  %v2993_v31 = vld [vmem:[%s6215_s7 + $0x28] sm:$0xff] }
 0x17c   : > { %v1777_v43 = vmul.f32 %v5246_v34, %v5115_v59  ;;  %v1348_v4 = vadd.f32 %v1284_v53, %v1183_v56  ;;  %v1676_v7 = vadd.f32 %v1612_v33, %v5134_v2  ;;  %v1677_v49 = vadd.f32 %v1613_v3, %v5150_v16  ;;  %v5268_v2 = vld [vmem:[%s6212_s4 + $0x7] ss:$0 sm:$0xff]  ;;  %3977 = vmatpush3.msra.mxu0 %v2995_v60  ;;  %v5280_v27 = vpop.eup %4200 }
 0x17d   : > { %v2271_v16 = vmul.f32 %v5268_v2, %v5115_v59  ;;  %4210 = vpow2.f32 %v5159_v6  ;;  %v1349_v56 = vadd.f32 %v1285_v63, %v1184_v58  ;;  %v2170_v3 = vadd.f32 %v2106_v44, %v5137_v42  ;;  %3978 = vmatprep.subr.mxu0 %v5108_v46 }
 0x17e   : > { %v1841_v53 = vadd.f32 %v1777_v43, %v1676_v7  ;;  %v1842_v33 = vadd.f32 %v1778_v15, %v1677_v49  ;;  %v1450_v59 = vmul.f32 %v5261_v51, %v1413_v50  ;;  %v2171_v6 = vadd.f32 %v2107_v19, %v5156_v9  ;;  %3979 = vmatpush3.msra.mxu0 %v2994_v12  ;;  %v2992_v9 = vld [vmem:[%s6215_s7 + $0x20] sm:$0xff] }
 0x17f   : > { %v3706_v60 = vmul.f32 -1.442695, %v5173_v38  ;;  %v3705_v63 = vmul.f32 -1.442695, %v5176_v22  ;;  %v1943_v7 = vmul.f32 %v4778_v13, %v1413_v50  ;;  %v1513_v42 = vadd.f32 %v1449_v8, %v1348_v4  ;;  %3980 = vmatprep.subr.mxu0 %v5108_v46  ;;  %v5298_v12 = vld [vmem:[%s6212_s4 + $0x5] ss:$0 sm:$0xff] }
 0x180   : > { %v2335_v15 = vadd.f32 %v2271_v16, %v2170_v3  ;;  %v2436_v44 = vmul.f32 %v4803_v5, %v1412_v17  ;;  %v2437_v49 = vmul.f32 %v4803_v5, %v1413_v50  ;;  %v1942_v13 = vmul.f32 %v5298_v12, %v1412_v17  ;;  %3981 = vmatpush3.msra.mxu0 %v2993_v31  ;;  %v5305_v16 = vld [vmem:[%s6212_s4 + $0x3] ss:$0 sm:$0xff]  ;;  %v766_v3 = vpop.f32.mrf.mxu0 }
 0x181   : > { %v1148_v58 = vld [vmem:[#allocation2 + $0xd8] sm:$0xff]  ;;  %v5288_v43 = vld [vmem:[#allocation2 + $0xe0] sm:$0xff]  ;;  %v2336_v4 = vadd.f32 %v5190_v41, %v2171_v6  ;;  %4212 = vpow2.f32 %v3703_v29  ;;  %v1514_v19 = vadd.f32 %v1450_v59, %v1349_v56  ;;  %3982 = vmatprep.subr.mxu0 %v5108_v46  ;;  %v1780_v56 = vmul.f32 %v5246_v34, %v5153_v0  ;;  %v4203_v31 = vpop.eup %4202 }
 0x182   : > { %v2500_v8 = vadd.f32 %v2436_v44, %v2335_v15  ;;  %v1614_v5 = vmul.f32 %v5305_v16, %v1148_v58  ;;  %v1615_v50 = vmul.f32 %v5305_v16, %v5288_v43  ;;  %v2991_v41 = vld [vmem:[%s6215_s7 + $0x18] sm:$0xff]  ;;  %v2006_v29 = vadd.f32 %v1942_v13, %v1841_v53  ;;  %3983 = vmatpush3.msra.mxu0 %v2992_v9  ;;  %v2990_v53 = vld [vmem:[%s6215_s7 + $0x10] sm:$0xff] }
 0x183   : > { %v2501_v17 = vadd.f32 %v2437_v49, %v2336_v4  ;;  %4214 = vpow2.f32 %v3706_v60  ;;  %v1779_v44 = vmul.f32 %v5246_v34, %v5203_v35  ;;  %3984 = vmatprep.subr.mxu0 %v5108_v46  ;;  %v2007_v13 = vadd.f32 %v1943_v7, %v1842_v33  ;;  %v5326_v60 = vld [vmem:[%s6212_s4 + $0x6] ss:$0 sm:$0xff]  ;;  %v3956_v7 = vpop.f32.mrf.mxu0 }
 0x184   : > { %v2603_v59 = vmul.f32 %v4815_v25, %v2500_v8  ;;  %v1678_v6 = vadd.f32 %v1614_v5, %v1513_v42  ;;  %v1679_v15 = vadd.f32 %v1615_v50, %v1514_v19  ;;  %v2108_v9 = vmul.f32 %v5326_v60, %v1148_v58  ;;  %3985 = vmatpush3.msra.mxu0 %v2991_v41 }
 0x185   : > { %v4205_v49 = vpop.eup %4204  ;;  %4216 = vpow2.f32 %v3705_v63  ;;  %v5331_v42 = vadd.f32 %v5074_v55, %v5140_v57  ;;  %v2109_v33 = vmul.f32 %v5326_v60, %v5288_v43  ;;  %3986 = vmatprep.subr.mxu0 %v5108_v46  ;;  %v2989_v63 = vld [vmem:[%s6215_s7 + $0x8] sm:$0xff]  ;;  %v2604_v57 = vmul.f32 %v4815_v25, %v2501_v17  ;;  %v2988_v25 = vld [vmem:[%s6215_s7] sm:$0xff] }
 0x186   : > { %v4207_v4 = vpop.eup %4206  ;;  %4218 = vrcp.f32 %v5209_v10  ;;  %v5334_v8 = vadd.f32 %v1779_v44, %v1678_v6  ;;  %v5336_v19 = vadd.f32 %v1780_v56, %v1679_v15  ;;  %v5346_v5 = vadd.f32 %v4829_v48, %v2603_v59  ;;  %3987 = vmatpush3.msra.mxu0 %v2990_v53 }
 0x187   : > { %v2172_v10 = vadd.f32 %v2108_v9, %v2006_v29  ;;  %v2273_v50 = vmul.f32 %v5268_v2, %v5203_v35  ;;  %v2274_v56 = vmul.f32 %v5268_v2, %v5153_v0  ;;  %v2173_v6 = vadd.f32 %v2109_v33, %v2007_v13  ;;  %3988 = vmatprep.subr.mxu0 %v5108_v46  ;;  %v776_v9 = vpop.f32.mrf.mxu0 }
 0x188   : > { %v4209_v41 = vpop.eup %4208  ;;  %v5353_v15 = vmul.f32 %v4205_v49, %v5002_v52  ;;  %v828_v44 = vmul.f32 %v5062_v26, %v766_v3  ;;  %v1185_v29 = vmul.f32 %v5224_v45, %v1148_v58  ;;  %v5362_v59 = vmul.f32 %v4207_v4, %v5012_v1  ;;  %3989 = vmatpush3.msra.mxu0 %v2989_v63  ;;  %v1415_v4 = vld [vmem:[#allocation2 + $0xe2] sm:$0xff] }
 0x189   : > { %v2337_v17 = vadd.f32 %v2273_v50, %v2172_v10  ;;  %v3708_v53 = vmul.f32 -1.442695, %v5331_v42  ;;  %4220 = vrcp.f32 %v5216_v61  ;;  %v1186_v52 = vmul.f32 %v5224_v45, %v5288_v43  ;;  %3990 = vmatprep.subr.mxu0 %v5108_v46  ;;  %v5402_v10 = vld [vmem:[%s6212_s4 + $0x8] ss:$0 sm:$0xff] }
 0x18a   : > { %v4211_v13 = vpop.eup %4210  ;;  %v2338_v3 = vadd.f32 %v2274_v56, %v2173_v6  ;;  %1117 = vst [vmem:[#allocation2 + $0xf9] sm:$0xff] %v5353_v15  ;;  %v990_v49 = vadd.f32 1.0, %v4203_v31  ;;  %4222 = vpow2.f32 %v5219_v32  ;;  %v5372_v1 = vadd.f32 %v4829_v48, %v2604_v57  ;;  %1116 = vst [vmem:[#allocation2 + $0xf1] sm:$0xff] %v5362_v59  ;;  %3991 = vmatpush3.msra.mxu0 %v2988_v25  ;;  %v1414_v31 = vld [vmem:[#allocation2 + $0xda] sm:$0xff] }
 0x18b   : > { %v3736_v58 = vmul.f32 -1.442695, %v5346_v5  ;;  %v1286_v61 = vmul.f32 %v5182_v37, %v5203_v35  ;;  %v5380_v43 = vmul.f32 %v5273_v24, %v4983_v62  ;;  %4224 = vpow2.f32 %v5241_v54 }
 0x18c   : > { %v1287_v32 = vmul.f32 %v5182_v37, %v5153_v0  ;;  %v5386_v48 = vmul.f32 %v5062_v26, %v3956_v7  ;;  %4226 = vpow2.f32 %v3708_v53  ;;  %v5389_v35 = vadd.f32 %v5074_v55, %v828_v44 }
 0x18d   : > { %6255 = vst [vmem:[#allocation10_spill] sm:$0xff] %v5380_v43  ;;  %v1350_v33 = vadd.f32 %v1286_v61, %v1185_v29  ;;  %v5392_v63 = vmul.f32 %v5062_v26, %v776_v9  ;;  %4228 = vrcp.f32 %v990_v49  ;;  %v989_v54 = vadd.f32 1.0, %v4209_v41 }
 0x18e   : > { %v4213_v62 = vpop.eup %4212  ;;  %v1351_v24 = vadd.f32 %v1287_v32, %v1186_v52  ;;  %v992_v57 = vadd.f32 1.0, %v4211_v13  ;;  %v5396_v0 = vmul.f32 %v5280_v27, %v4994_v21  ;;  %4230 = vpow2.f32 %v3736_v58 }
 0x18f   : > { %v3737_v7 = vmul.f32 -1.442695, %v5372_v1  ;;  %v2438_v50 = vmul.f32 %v5402_v10, %v1414_v31  ;;  %v2955_v6 = vadd.f32 %v5238_v20, %v5380_v43  ;;  %v1452_v41 = vmul.f32 %v5261_v51, %v1415_v4 }
 0x190   : > { %6256 = vst [vmem:[#allocation11_spill] sm:$0xff] %v5396_v0  ;;  %v4215_v56 = vpop.eup %4214  ;;  %v1451_v44 = vmul.f32 %v5261_v51, %v1414_v31  ;;  %4232 = vrcp.f32 %v989_v54  ;;  %v1945_v21 = vmul.f32 %v5298_v12, %v1415_v4  ;;  %v1944_v27 = vmul.f32 %v5298_v12, %v1414_v31 }
 0x191   : > { %v2502_v25 = vadd.f32 %v2438_v50, %v2337_v17  ;;  %4234 = vrcp.f32 %v992_v57  ;;  %v2439_v53 = vmul.f32 %v5402_v10, %v1415_v4  ;;  %v1150_v52 = vld [vmem:[#allocation2 + $0xf0] sm:$0xff]  ;;  %v1151_v49 = vld [vmem:[#allocation2 + $0xf8] sm:$0xff]  ;;  %v1516_v9 = vadd.f32 %v1452_v41, %v1351_v24 }
 0x192   : > { %v4217_v29 = vpop.eup %4216  ;;  %v1515_v13 = vadd.f32 %v1451_v44, %v1350_v33  ;;  %v991_v58 = vadd.f32 1.0, %v4213_v62  ;;  %4236 = vpow2.f32 %v3737_v7  ;;  %v2008_v61 = vadd.f32 %v1944_v27, %v5334_v8  ;;  %v3959_v33 = vpop.f32.mrf.mxu0  ;;  %v5421_v62 = vld [vmem:[%s6213_s5] ss:$0 sm:$0xff] }
 0x193   : > { %v4219_v20 = vpop.eup %4218  ;;  %v1782_v32 = vmul.f32 %v5246_v34, %v5353_v15  ;;  %v2009_v54 = vadd.f32 %v1945_v21, %v5336_v19  ;;  %v2503_v31 = vadd.f32 %v2439_v53, %v2338_v3  ;;  %v1616_v17 = vmul.f32 %v5305_v16, %v1150_v52  ;;  %v5430_v21 = vld [vmem:[#allocation2 + $0xf2] sm:$0xff] }
 0x194   : > { %v1617_v57 = vmul.f32 %v5305_v16, %v1151_v49  ;;  %v994_v4 = vadd.f32 1.0, %v4215_v56  ;;  %v2605_v24 = vmul.f32 %v5421_v62, %v2502_v25  ;;  %v2110_v8 = vmul.f32 %v5326_v60, %v1150_v52 }
 0x195   : > { %v2111_v7 = vmul.f32 %v5326_v60, %v1151_v49  ;;  %v993_v50 = vadd.f32 1.0, %v4217_v29  ;;  %v1680_v19 = vadd.f32 %v1616_v17, %v1515_v13  ;;  %v1781_v41 = vmul.f32 %v5246_v34, %v5362_v59 }
 0x196   : > { %v1681_v3 = vadd.f32 %v1617_v57, %v1516_v9  ;;  %4238 = vrcp.f32 %v991_v58  ;;  %v4221_v56 = vpop.eup %4220  ;;  %v2276_v44 = vmul.f32 %v5268_v2, %v5353_v15  ;;  %v2174_v27 = vadd.f32 %v2110_v8, %v2008_v61  ;;  %v786_v58 = vpop.f32.mrf.mxu0  ;;  %v5442_v57 = vld [vmem:[%s6214_s6] ss:$0 sm:$0xff] }
 0x197   : > { %v2175_v53 = vadd.f32 %v2111_v7, %v2009_v54  ;;  %v2275_v25 = vmul.f32 %v5268_v2, %v5362_v59  ;;  %v4223_v43 = vpop.eup %4222  ;;  %v2606_v29 = vmul.f32 %v5421_v62, %v2503_v31  ;;  %v5435_v13 = vadd.f32 %v1781_v41, %v1680_v19 }
 0x198   : > { %v5437_v9 = vadd.f32 %v1782_v32, %v1681_v3  ;;  %4240 = vrcp.f32 %v994_v4  ;;  %v4225_v17 = vpop.eup %4224  ;;  %v5445_v61 = vadd.f32 %v5442_v57, %v2605_v24  ;;  %v2440_v32 = vmul.f32 %v5402_v10, %v5430_v21 }
 0x199   : > { %v2339_v54 = vadd.f32 %v2275_v25, %v2174_v27  ;;  %v5447_v8 = vadd.f32 %v2276_v44, %v2175_v53  ;;  %4242 = vrcp.f32 %v993_v50  ;;  %v4227_v31 = vpop.eup %4226  ;;  %v5453_v4 = vadd.f32 %v5074_v55, %v5386_v48 }
 0x19a   : > { %v833_v7 = vmul.f32 %v5062_v26, %v3959_v33  ;;  %v4229_v19 = vpop.eup %4228  ;;  %v5457_v3 = vmul.f32 %v4219_v20, %v5019_v18  ;;  %v2956_v24 = vadd.f32 %v2955_v6, %v5396_v0  ;;  %v5461_v41 = vmul.f32 %v5062_v26, %v786_v58 }
 0x19b   : > { %v4231_v50 = vpop.eup %4230  ;;  %v2768_v44 = vadd.f32 1.0, %v4223_v43  ;;  %v5464_v27 = vadd.f32 %v5442_v57, %v2606_v29  ;;  %v2504_v53 = vadd.f32 %v2440_v32, %v2339_v54  ;;  %v5467_v48 = vmul.f32 %v4229_v19, %v5077_v47 }
 0x19c   : > { %6257 = vst [vmem:[#allocation12_spill] sm:$0xff] %v5457_v3  ;;  %v3738_v33 = vmul.f32 -1.442695, %v5445_v61  ;;  %v1187_v18 = vmul.f32 %v5224_v45, %v1150_v52  ;;  %v3707_v20 = vmul.f32 -1.442695, %v5389_v35  ;;  %v5474_v26 = vadd.f32 %v5074_v55, %v5392_v63 }
 0x19d   : > { %6258 = vst [vmem:[#allocation13_spill] sm:$0xff] %v5464_v27  ;;  %v4233_v25 = vpop.eup %4232  ;;  %v1188_v43 = vmul.f32 %v5224_v45, %v1151_v49  ;;  %1119 = vst [vmem:[#allocation2 + $0x111] sm:$0xff] %v5467_v48  ;;  %v5482_v47 = vmul.f32 -1.442695, %v5453_v4  ;;  %v5485_v58 = vadd.f32 %v5074_v55, %v833_v7  ;;  %v2957_v52 = vadd.f32 %v2956_v24, %v5457_v3 }
 0x19e   : > { %6259 = vst [vmem:[#allocation14_spill] sm:$0xff] %v5474_v26  ;;  %v4235_v6 = vpop.eup %4234  ;;  %v5479_v29 = vmul.f32 %v4233_v25, %v5100_v14  ;;  %v2769_v54 = vadd.f32 1.0, %v4225_v17  ;;  %v1288_v63 = vmul.f32 %v5182_v37, %v5362_v59  ;;  %4244 = vrcp.f32 %v2768_v44  ;;  %v1417_v25 = vld [vmem:[#allocation2 + $0xfa] sm:$0xff] }
 0x19f   : > { %6260 = vst [vmem:[#allocation15_spill] sm:$0xff] %v5485_v58  ;;  %v5491_v32 = vmul.f32 %v4235_v6, %v5121_v23  ;;  %v4237_v49 = vpop.eup %4236  ;;  %v3739_v14 = vmul.f32 -1.442695, %v5464_v27  ;;  %v1289_v19 = vmul.f32 %v5182_v37, %v5353_v15  ;;  %v2607_v7 = vmul.f32 %v5421_v62, %v2504_v53 }
 0x1a0   : > { %1118 = vst [vmem:[#allocation2 + $0x109] sm:$0xff] %v5479_v29  ;;  %v5499_v17 = vmul.f32 %v4221_v56, %v5029_v30  ;;  %v2770_v24 = vadd.f32 1.0, %v4231_v50  ;;  %4246 = vpow2.f32 %v3738_v33  ;;  %v1352_v59 = vadd.f32 %v1288_v63, %v1187_v18 }
 0x1a1   : > { %1121 = vst [vmem:[#allocation2 + $0x129] sm:$0xff] %v5491_v32  ;;  %v1353_v23 = vadd.f32 %v1289_v19, %v1188_v43  ;;  %v996_v44 = vadd.f32 1.0, %v4227_v31  ;;  %v5503_v6 = vmul.f32 -1.442695, %v5474_v26  ;;  %v5506_v15 = vmul.f32 -1.442695, %v5485_v58 }
 0x1a2   : > { %6261 = vst [vmem:[#allocation16_spill] sm:$0xff] %v5499_v17  ;;  %4248 = vrcp.f32 %v2769_v54  ;;  %v5509_v53 = vadd.f32 %v2957_v52, %v5499_v17  ;;  %v1454_v30 = vmul.f32 %v5261_v51, %v1417_v25  ;;  %v1453_v56 = vmul.f32 %v5261_v51, %v5430_v21 }
 0x1a3   : > { %v4239_v3 = vpop.eup %4238  ;;  %4250 = vpow2.f32 %v3739_v14  ;;  %v1946_v31 = vmul.f32 %v5298_v12, %v5430_v21  ;;  %v5517_v50 = vadd.f32 %v5442_v57, %v2607_v7  ;;  %v1947_v43 = vmul.f32 %v5298_v12, %v1417_v25 }
 0x1a4   : > { %v5520_v33 = vmul.f32 %v4239_v3, %v5162_v28  ;;  %4252 = vrcp.f32 %v2770_v24  ;;  %v2441_v52 = vmul.f32 %v5402_v10, %v1417_v25  ;;  %v1517_v54 = vadd.f32 %v1453_v56, %v1352_v59 }
 0x1a5   : > { %6262 = vst [vmem:[#allocation17_spill] sm:$0xff] %v5517_v50  ;;  %v4241_v18 = vpop.eup %4240  ;;  %v5524_v19 = vadd.f32 1.0, %v4237_v49  ;;  %v2010_v14 = vadd.f32 %v1946_v31, %v5435_v13  ;;  %v1518_v17 = vadd.f32 %v1454_v30, %v1353_v23  ;;  %4254 = vrcp.f32 %v996_v44  ;;  %v5548_v44 = vld [vmem:[#allocation2 + $0x112] sm:$0xff] }
 0x1a6   : > { %v4243_v63 = vpop.eup %4242  ;;  %1120 = vst [vmem:[#allocation2 + $0x121] sm:$0xff] %v5520_v33  ;;  %v2011_v28 = vadd.f32 %v1947_v43, %v5437_v9  ;;  %v5530_v3 = vmul.f32 %v4241_v18, %v5173_v38  ;;  %4256 = vpow2.f32 %v3707_v20  ;;  %v3740_v49 = vmul.f32 -1.442695, %v5517_v50 }
 0x1a7   : > { %v1152_v21 = vld [vmem:[#allocation2 + $0x108] sm:$0xff]  ;;  %v1153_v7 = vld [vmem:[#allocation2 + $0x110] sm:$0xff]  ;;  %v5533_v24 = vmul.f32 %v4243_v63, %v5176_v22  ;;  %v1290_v59 = vmul.f32 %v5182_v37, %v5479_v29  ;;  %v1291_v23 = vmul.f32 %v5182_v37, %v5467_v48  ;;  %v1784_v38 = vmul.f32 %v5246_v34, %v5467_v48 }
 0x1a8   : > { %v1189_v25 = vmul.f32 %v5224_v45, %v1152_v21  ;;  %v1190_v13 = vmul.f32 %v5224_v45, %v1153_v7  ;;  %v1418_v9 = vld [vmem:[#allocation2 + $0x10a] sm:$0xff]  ;;  %v1618_v22 = vmul.f32 %v5305_v16, %v1152_v21  ;;  %v1619_v20 = vmul.f32 %v5305_v16, %v1153_v7  ;;  %1123 = vst [vmem:[#allocation2 + $0x141] sm:$0xff] %v5530_v3 }
 0x1a9   : > { %1122 = vst [vmem:[#allocation2 + $0x139] sm:$0xff] %v5533_v24  ;;  %v2278_v30 = vmul.f32 %v5268_v2, %v5467_v48  ;;  %v1783_v31 = vmul.f32 %v5246_v34, %v5479_v29  ;;  %v2112_v18 = vmul.f32 %v5326_v60, %v1152_v21  ;;  %v2113_v0 = vmul.f32 %v5326_v60, %v1153_v7 }
 0x1aa   : > { %v1354_v56 = vadd.f32 %v1290_v59, %v1189_v25  ;;  %v1682_v43 = vadd.f32 %v1618_v22, %v1517_v54  ;;  %v1683_v63 = vadd.f32 %v1619_v20, %v1518_v17  ;;  %v2277_v11 = vmul.f32 %v5268_v2, %v5479_v29 }
 0x1ab   : > { %4258 = vpow2.f32 %v3740_v49  ;;  %v1355_v40 = vadd.f32 %v1291_v23, %v1190_v13  ;;  %v1455_v58 = vmul.f32 %v5261_v51, %v1418_v9  ;;  %v2176_v50 = vadd.f32 %v2112_v18, %v2010_v14  ;;  %v4245_v26 = vpop.eup %4244 }
 0x1ac   : > { %v1456_v48 = vmul.f32 %v5261_v51, %v5548_v44  ;;  %v1848_v25 = vadd.f32 %v1784_v38, %v1683_v63  ;;  %v2177_v59 = vadd.f32 %v2113_v0, %v2011_v28  ;;  %4260 = vpow2.f32 %v5482_v47 }
 0x1ad   : > { %v5561_v27 = vld [vmem:[#allocation2 + $0x120] sm:$0xff]  ;;  %v4247_v17 = vpop.eup %4246  ;;  %v1519_v54 = vadd.f32 %v1455_v58, %v1354_v56  ;;  %v1847_v21 = vadd.f32 %v1783_v31, %v1682_v43  ;;  %v2341_v7 = vadd.f32 %v2277_v11, %v2176_v50  ;;  %v2442_v29 = vmul.f32 %v5402_v10, %v1418_v9  ;;  %v5565_v49 = vld [vmem:[#allocation2 + $0x128] sm:$0xff] }
 0x1ae   : > { %v2505_v14 = vadd.f32 %v2441_v52, %v5447_v8  ;;  %v1949_v13 = vmul.f32 %v5298_v12, %v5548_v44  ;;  %v5570_v23 = vadd.f32 %v2278_v30, %v2177_v59  ;;  %4262 = vpow2.f32 %v5503_v6 }
 0x1af   : > { %v4249_v0 = vpop.eup %4248  ;;  %v1948_v47 = vmul.f32 %v5298_v12, %v1418_v9  ;;  %v2506_v28 = vadd.f32 %v2442_v29, %v2341_v7  ;;  %v1520_v58 = vadd.f32 %v1456_v48, %v1355_v40  ;;  %v1620_v11 = vmul.f32 %v5305_v16, %v5561_v27  ;;  %v5610_v29 = vld [vmem:[#allocation2 + $0x12a] sm:$0xff] }
 0x1b0   : > { %v4251_v50 = vpop.eup %4250  ;;  %v5577_v38 = vmul.f32 %v4245_v26, %v5169_v36  ;;  %v2772_v8 = vadd.f32 1.0, %v4247_v17  ;;  %v1621_v52 = vmul.f32 %v5305_v16, %v5565_v49  ;;  %4264 = vpow2.f32 %v5506_v15 }
 0x1b1   : > { %v4253_v22 = vpop.eup %4252  ;;  %v2012_v6 = vadd.f32 %v1948_v47, %v1847_v21  ;;  %v2609_v20 = vmul.f32 %v5421_v62, %v2506_v28  ;;  %v1684_v9 = vadd.f32 %v1620_v11, %v1519_v54  ;;  %v2013_v30 = vadd.f32 %v1949_v13, %v1848_v25 }
 0x1b2   : > { %6263 = vst [vmem:[#allocation18_spill] sm:$0xff] %v5577_v38  ;;  %v4255_v40 = vpop.eup %4254  ;;  %4266 = vrcp.f32 %v5524_v19  ;;  %v2608_v56 = vmul.f32 %v5421_v62, %v2505_v14  ;;  %v1785_v36 = vmul.f32 %v5246_v34, %v5520_v33  ;;  %v5589_v26 = vadd.f32 %v5074_v55, %v5461_v41  ;;  %v5604_v41 = vld [vmem:[#allocation2 + $0x122] sm:$0xff] }
 0x1b3   : > { %v4257_v31 = vpop.eup %4256  ;;  %v5592_v15 = vadd.f32 %v5442_v57, %v2609_v20  ;;  %v1685_v18 = vadd.f32 %v1621_v52, %v1520_v58  ;;  %v2114_v43 = vmul.f32 %v5326_v60, %v5561_v27  ;;  %v2115_v19 = vmul.f32 %v5326_v60, %v5565_v49  ;;  %v5627_v20 = vld [vmem:[#allocation2 + $0x140] sm:$0xff] }
 0x1b4   : > { %v2959_v63 = vadd.f32 %v5509_v53, %v5577_v38  ;;  %4268 = vrcp.f32 %v2772_v8  ;;  %v1786_v48 = vmul.f32 %v5246_v34, %v5491_v32  ;;  %v2280_v55 = vmul.f32 %v5268_v2, %v5491_v32 }
 0x1b5   : > { %v3742_v25 = vmul.f32 -1.442695, %v5592_v15  ;;  %v1849_v59 = vadd.f32 %v1785_v36, %v1684_v9  ;;  %v2178_v17 = vadd.f32 %v2114_v43, %v2012_v6  ;;  %v2179_v54 = vadd.f32 %v2115_v19, %v2013_v30 }
 0x1b6   : > { %v5608_v21 = vmul.f32 %v4249_v0, %v5200_v39  ;;  %v2773_v7 = vadd.f32 1.0, %v4251_v50  ;;  %v2279_v53 = vmul.f32 %v5268_v2, %v5520_v33  ;;  %v5615_v14 = vadd.f32 %v5442_v57, %v2608_v56  ;;  %v5623_v0 = vld [vmem:[#allocation2 + $0x138] sm:$0xff] }
 0x1b7   : > { %4270 = vpow2.f32 %v3742_v25  ;;  %v1850_v13 = vadd.f32 %v1786_v48, %v1685_v18  ;;  %v1950_v47 = vmul.f32 %v5298_v12, %v5604_v41  ;;  %v2344_v28 = vadd.f32 %v2280_v55, %v2179_v54 }
 0x1b8   : > { %6264 = vst [vmem:[#allocation19_spill] sm:$0xff] %v5608_v21  ;;  %v4259_v58 = vpop.eup %4258  ;;  %v5620_v11 = vmul.f32 %v4253_v22, %v5346_v5  ;;  %v2960_v39 = vadd.f32 %v2959_v63, %v5608_v21  ;;  %v1951_v8 = vmul.f32 %v5298_v12, %v5610_v29  ;;  %v2343_v6 = vadd.f32 %v2279_v53, %v2178_v17  ;;  %v5652_v53 = vld [vmem:[#allocation2 + $0x13a] sm:$0xff] }
 0x1b9   : > { %v4261_v50 = vpop.eup %4260  ;;  %v2014_v52 = vadd.f32 %v1950_v47, %v1849_v59  ;;  %v3711_v9 = vmul.f32 -1.442695, %v5589_v26  ;;  %4272 = vrcp.f32 %v2773_v7  ;;  %v2443_v30 = vmul.f32 %v5402_v10, %v5548_v44  ;;  %v4369_v21 = vld [vmem:[%s6212_s4] ss:$0 sm:$0xff] }
 0x1ba   : > { %6265 = vst [vmem:[#allocation20_spill] sm:$0xff] %v5620_v11  ;;  %v1293_v5 = vmul.f32 %v5182_v37, %v5491_v32  ;;  %v3741_v22 = vmul.f32 -1.442695, %v5615_v14  ;;  %v2774_v36 = vadd.f32 1.0, %v4259_v58  ;;  %v2444_v18 = vmul.f32 %v5402_v10, %v5604_v41 }
 0x1bb   : > { %v4263_v56 = vpop.eup %4262  ;;  %v2015_v43 = vadd.f32 %v1951_v8, %v1850_v13  ;;  %v2116_v19 = vmul.f32 %v5326_v60, %v5623_v0  ;;  %v2961_v63 = vadd.f32 %v2960_v39, %v5620_v11  ;;  %v1191_v48 = vmul.f32 %v5224_v45, %v5561_v27 }
 0x1bc   : > { %v1292_v44 = vmul.f32 %v5182_v37, %v5520_v33  ;;  %v2117_v32 = vmul.f32 %v5326_v60, %v5627_v20  ;;  %v2508_v25 = vadd.f32 %v2444_v18, %v2343_v6  ;;  %v2281_v17 = vmul.f32 %v5268_v2, %v5533_v24 }
 0x1bd   : > { %v4265_v55 = vpop.eup %4264  ;;  %v2180_v59 = vadd.f32 %v2116_v19, %v2014_v52  ;;  %v5649_v54 = vmul.f32 %v4255_v40, %v5331_v42  ;;  %v2507_v7 = vadd.f32 %v2443_v30, %v5570_v23  ;;  %v995_v13 = vadd.f32 1.0, %v4257_v31  ;;  %v1423_v23 = vld [vmem:[#allocation2 + $0x142] sm:$0xff] }
 0x1be   : > { %v2181_v27 = vadd.f32 %v2117_v32, %v2015_v43  ;;  %v998_v47 = vadd.f32 1.0, %v4261_v50  ;;  %4274 = vrcp.f32 %v2774_v36  ;;  %v2445_v58 = vmul.f32 %v5402_v10, %v5610_v29 }
 0x1bf   : > { %v4267_v33 = vpop.eup %4266  ;;  %v2282_v39 = vmul.f32 %v5268_v2, %v5530_v3  ;;  %v2345_v8 = vadd.f32 %v2281_v17, %v2180_v59  ;;  %1125 = vst [vmem:[#allocation2 + $0x159] sm:$0xff] %v5649_v54  ;;  %v1192_v42 = vmul.f32 %v5224_v45, %v5565_v49  ;;  %4276 = vrcp.f32 %v995_v13 }
 0x1c0   : > { %v997_v40 = vadd.f32 1.0, %v4263_v56  ;;  %v1000_v52 = vadd.f32 1.0, %v4265_v55  ;;  %v2611_v50 = vmul.f32 %v5421_v62, %v2508_v25  ;;  %v2446_v6 = vmul.f32 %v5402_v10, %v5652_v53 }
 0x1c1   : > { %v4269_v31 = vpop.eup %4268  ;;  %4278 = vrcp.f32 %v998_v47  ;;  %v2346_v30 = vadd.f32 %v2282_v39, %v2181_v27  ;;  %v1356_v36 = vadd.f32 %v1292_v44, %v1191_v48  ;;  %v2509_v18 = vadd.f32 %v2445_v58, %v2344_v28 }
 0x1c2   : > { %4280 = vrcp.f32 %v997_v40  ;;  %v2610_v43 = vmul.f32 %v5421_v62, %v2507_v7  ;;  %v5666_v19 = vmul.f32 %v4267_v33, %v5372_v1  ;;  %v2447_v49 = vmul.f32 %v5402_v10, %v1423_v23  ;;  %v2252_v7 = vld [vmem:[#allocation2 + $0x199] sm:$0xff] }
 0x1c3   : > { %v2510_v56 = vadd.f32 %v2446_v6, %v2345_v8  ;;  %4282 = vrcp.f32 %v1000_v52  ;;  %v1357_v55 = vadd.f32 %v1293_v5, %v1192_v42  ;;  %v1457_v25 = vmul.f32 %v5261_v51, %v5604_v41 }
 0x1c4   : > { %6266 = vst [vmem:[#allocation21_spill] sm:$0xff] %v5666_v19  ;;  %v4271_v32 = vpop.eup %4270  ;;  %4284 = vpow2.f32 %v3711_v9  ;;  %v5672_v59 = vadd.f32 %v5442_v57, %v2610_v43  ;;  %v5675_v28 = vmul.f32 %v4269_v31, %v5445_v61  ;;  %v2962_v48 = vadd.f32 %v2961_v63, %v5666_v19 }
 0x1c5   : > { %v2511_v1 = vadd.f32 %v2447_v49, %v2346_v30  ;;  %v5679_v44 = vadd.f32 %v5442_v57, %v2611_v50  ;;  %v1458_v17 = vmul.f32 %v5261_v51, %v5610_v29  ;;  %v1521_v5 = vadd.f32 %v1457_v25, %v1356_v36 }
 0x1c6   : > { %6267 = vst [vmem:[#allocation22_spill] sm:$0xff] %v5675_v28  ;;  %v2612_v41 = vmul.f32 %v5421_v62, %v2509_v18  ;;  %v4273_v9 = vpop.eup %4272  ;;  %v2776_v27 = vadd.f32 1.0, %v4271_v32  ;;  %v1622_v13 = vmul.f32 %v5305_v16, %v5623_v0  ;;  %v2613_v61 = vmul.f32 %v5421_v62, %v2510_v56 }
 0x1c7   : > { %4286 = vpow2.f32 %v3741_v22  ;;  %v1522_v63 = vadd.f32 %v1458_v17, %v1357_v55  ;;  %v1623_v47 = vmul.f32 %v5305_v16, %v5627_v20  ;;  %v5691_v33 = vmul.f32 %v5326_v60, %v5108_v46 }
 0x1c8   : > { %v3743_v29 = vmul.f32 -1.442695, %v5672_v59  ;;  %v2963_v58 = vadd.f32 %v2962_v48, %v5675_v28  ;;  %v5696_v39 = vmul.f32 %v5268_v2, %v2252_v7  ;;  %v2614_v8 = vmul.f32 %v5421_v62, %v2511_v1  ;;  %v6269_v7 = vld [vmem:[#allocation13_spill] sm:$0xff] }
 0x1c9   : > { %v3744_v42 = vmul.f32 -1.442695, %v5679_v44  ;;  %v1295_v22 = vmul.f32 %v5182_v37, %v5530_v3  ;;  %v1193_v40 = vmul.f32 %v5224_v45, %v5623_v0  ;;  %v1194_v46 = vmul.f32 %v5224_v45, %v5627_v20 }
 0x1ca   : > { %v5707_v52 = vadd.f32 %v5442_v57, %v2612_v41  ;;  %4288 = vrcp.f32 %v2776_v27  ;;  %v1460_v31 = vmul.f32 %v5261_v51, %v1423_v23  ;;  %v1686_v50 = vadd.f32 %v1622_v13, %v1521_v5 }
 0x1cb   : > { %v5711_v6 = vadd.f32 %v5442_v57, %v2613_v61  ;;  %v4275_v30 = vpop.eup %4274  ;;  %v1788_v36 = vmul.f32 %v5246_v34, %v5530_v3  ;;  %v1294_v0 = vmul.f32 %v5182_v37, %v5533_v24  ;;  %v1687_v18 = vadd.f32 %v1623_v47, %v1522_v63 }
 0x1cc   : > { %4290 = vpow2.f32 %v3743_v29  ;;  %v4277_v20 = vpop.eup %4276  ;;  %v1953_v43 = vmul.f32 %v5298_v12, %v1423_v23  ;;  %v1787_v49 = vmul.f32 %v5246_v34, %v5533_v24  ;;  %v5721_v56 = vadd.f32 %v5442_v57, %v2614_v8  ;;  %v6272_v29 = vld [vmem:[#allocation17_spill] sm:$0xff] }
 0x1cd   : > { %4292 = vpow2.f32 %v3744_v42  ;;  %v1358_v55 = vadd.f32 %v1294_v0, %v1193_v40  ;;  %v1359_v25 = vadd.f32 %v1295_v22, %v1194_v46  ;;  %v1091_v3 = vmul.f32 %v4277_v20, %v5389_v35  ;;  %v6271_v35 = vld [vmem:[#allocation14_spill] sm:$0xff]  ;;  %v6274_v42 = vld [vmem:[#allocation15_spill] sm:$0xff] }
 0x1ce   : > { %6268 = vst [vmem:[#allocation23_spill] sm:$0xff] %v5721_v56  ;;  %v4279_v32 = vpop.eup %4278  ;;  %v3745_v48 = vmul.f32 -1.442695, %v5707_v52  ;;  %v1851_v17 = vadd.f32 %v1787_v49, %v1686_v50  ;;  %v3746_v23 = vmul.f32 -1.442695, %v5711_v6  ;;  %v5728_v41 = vmul.f32 %v4273_v9, %v6269_v7 }
 0x1cf   : > { %v4281_v1 = vpop.eup %4280  ;;  %v1094_v5 = vmul.f32 %v4279_v32, %v5453_v4  ;;  %v1459_v27 = vmul.f32 %v5261_v51, %v5652_v53  ;;  %v1852_v13 = vadd.f32 %v1788_v36, %v1687_v18  ;;  %v1952_v61 = vmul.f32 %v5298_v12, %v5652_v53  ;;  %1124 = vst [vmem:[#allocation2 + $0x151] sm:$0xff] %v1091_v3  ;;  %v1425_v4 = vld [vmem:[#allocation2 + $0x15a] sm:$0xff] }
 0x1d0   : > { %6270 = vst [vmem:[#allocation13_spill] sm:$0xff] %v5728_v41  ;;  %v4283_v24 = vpop.eup %4282  ;;  %v1093_v63 = vmul.f32 %v4281_v1, %v6271_v35  ;;  %v5736_v8 = vmul.f32 %v4275_v30, %v6272_v29  ;;  %v3747_v22 = vmul.f32 -1.442695, %v5721_v56  ;;  %v2964_v40 = vadd.f32 %v2963_v58, %v5728_v41  ;;  %v4368_v7 = vld [vmem:[%s6212_s4 + $0x1] ss:$0 sm:$0xff] }
 0x1d1   : > { %v4285_v47 = vpop.eup %4284  ;;  %1127 = vst [vmem:[#allocation2 + $0x171] sm:$0xff] %v1094_v5  ;;  %v1096_v9 = vmul.f32 %v4283_v24, %v6274_v42  ;;  %v1523_v46 = vadd.f32 %v1459_v27, %v1358_v55  ;;  %v1524_v50 = vadd.f32 %v1460_v31, %v1359_v25  ;;  %4294 = vpow2.f32 %v3745_v48 }
 0x1d2   : > { %6273 = vst [vmem:[#allocation14_spill] sm:$0xff] %v5736_v8  ;;  %1126 = vst [vmem:[#allocation2 + $0x169] sm:$0xff] %v1093_v63  ;;  %v999_v36 = vadd.f32 1.0, %v4285_v47  ;;  %v2016_v53 = vadd.f32 %v1952_v61, %v1851_v17  ;;  %v1297_v0 = vmul.f32 %v5182_v37, %v5649_v54  ;;  %v1790_v30 = vmul.f32 %v5246_v34, %v5649_v54 }
 0x1d3   : > { %1129 = vst [vmem:[#allocation2 + $0x189] sm:$0xff] %v1096_v9  ;;  %4296 = vpow2.f32 %v3746_v23  ;;  %v1462_v20 = vmul.f32 %v5261_v51, %v1425_v4  ;;  %v5748_v58 = vmul.f32 %v5268_v2, %v5649_v54  ;;  %v5750_v31 = vadd.f32 %v1953_v43, %v1852_v13 }
 0x1d4   : > { %v4287_v18 = vpop.eup %4286  ;;  %4298 = vrcp.f32 %v999_v36  ;;  %v5753_v49 = vmul.f32 %v5298_v12, %v1425_v4  ;;  %v5756_v32 = vmul.f32 %v5402_v10, %v1425_v4  ;;  %v5759_v55 = vadd.f32 %v2964_v40, %v5736_v8 }
 0x1d5   : > { %4300 = vpow2.f32 %v3747_v22  ;;  %v1296_v25 = vmul.f32 %v5182_v37, %v1091_v3  ;;  %v1789_v48 = vmul.f32 %v5246_v34, %v1091_v3  ;;  %v2283_v54 = vmul.f32 %v5268_v2, %v1091_v3 }
 0x1d6   : > { %v1299_v1 = vmul.f32 %v5182_v37, %v1094_v5  ;;  %v1158_v43 = vld [vmem:[#allocation2 + $0x150] sm:$0xff]  ;;  %v1159_v17 = vld [vmem:[#allocation2 + $0x158] sm:$0xff]  ;;  %v1298_v24 = vmul.f32 %v4368_v7, %v1093_v63  ;;  %v5769_v27 = vmul.f32 %v5246_v34, %v1094_v5  ;;  %v5772_v13 = vmul.f32 %v5268_v2, %v1094_v5 }
 0x1d7   : > { %v1424_v23 = vld [vmem:[#allocation2 + $0x152] sm:$0xff]  ;;  %v2775_v61 = vadd.f32 1.0, %v4287_v18  ;;  %v4289_v35 = vpop.eup %4288  ;;  %v1195_v3 = vmul.f32 %v5224_v45, %v1158_v43  ;;  %v1196_v37 = vmul.f32 %v5224_v45, %v1159_v17  ;;  %v1624_v47 = vmul.f32 %v5305_v16, %v1158_v43 }
 0x1d8   : > { %v1791_v29 = vmul.f32 %v5246_v34, %v1093_v63  ;;  %v1625_v42 = vmul.f32 %v5305_v16, %v1159_v17  ;;  %v5780_v36 = vmul.f32 %v5246_v34, %v1096_v9  ;;  %v2285_v5 = vmul.f32 %v5268_v2, %v1093_v63 }
 0x1d9   : > { %v4291_v4 = vpop.eup %4290  ;;  %v1160_v22 = vld [vmem:[#allocation2 + $0x168] sm:$0xff]  ;;  %v1161_v40 = vld [vmem:[#allocation2 + $0x170] sm:$0xff]  ;;  %v5784_v18 = vmul.f32 %v5268_v2, %v1096_v9  ;;  %v1360_v8 = vadd.f32 %v1296_v25, %v1195_v3  ;;  %v1361_v45 = vadd.f32 %v1297_v0, %v1196_v37  ;;  %v1461_v41 = vmul.f32 %v5261_v51, %v1424_v23 }
 0x1da   : > { %v4293_v7 = vpop.eup %4292  ;;  %v1688_v28 = vadd.f32 %v1624_v47, %v1523_v46  ;;  %v1689_v19 = vadd.f32 %v1625_v42, %v1524_v50  ;;  %v2118_v11 = vmul.f32 %v5326_v60, %v1158_v43  ;;  %v1197_v34 = vmul.f32 %v4369_v21, %v1160_v22  ;;  %v1426_v2 = vld [vmem:[#allocation2 + $0x16a] sm:$0xff] }
 0x1db   : > { %4302 = vrcp.f32 %v2775_v61  ;;  %v1525_v38 = vadd.f32 %v1461_v41, %v1360_v8  ;;  %v1198_v56 = vmul.f32 %v4369_v21, %v1161_v40  ;;  %v1626_v9 = vmul.f32 %v5305_v16, %v1160_v22 }
 0x1dc   : > { %v1853_v63 = vadd.f32 %v1789_v48, %v1688_v28  ;;  %v2182_v25 = vadd.f32 %v2118_v11, %v2016_v53  ;;  %v2777_v0 = vadd.f32 1.0, %v4291_v4  ;;  %v2778_v3 = vadd.f32 1.0, %v4293_v7  ;;  %v1427_v28 = vld [vmem:[#allocation2 + $0x172] sm:$0xff] }
 0x1dd   : > { %v5793_v46 = vmul.f32 %v4289_v35, %v5592_v15  ;;  %v1954_v50 = vmul.f32 %v5298_v12, %v1424_v23  ;;  %v1627_v43 = vmul.f32 %v5305_v16, %v1161_v40  ;;  %v1526_v37 = vadd.f32 %v1462_v20, %v1361_v45 }
 0x1de   : > { %v1854_v47 = vadd.f32 %v1790_v30, %v1689_v19  ;;  %v4295_v42 = vpop.eup %4294  ;;  %v2119_v41 = vmul.f32 %v5326_v60, %v1159_v17  ;;  %v2448_v21 = vmul.f32 %v5402_v10, %v1424_v23  ;;  %v1463_v8 = vmul.f32 %v5261_v51, %v1426_v2  ;;  %v4370_v51 = vld [vmem:[%s6212_s4 + $0x2] ss:$0 sm:$0xff] }
 0x1df   : > { %v1362_v11 = vadd.f32 %v1298_v24, %v1197_v34  ;;  %v2120_v48 = vmul.f32 %v5326_v60, %v1160_v22  ;;  %v1363_v15 = vadd.f32 %v1299_v1, %v1198_v56  ;;  %v1690_v61 = vadd.f32 %v1626_v9, %v1525_v38  ;;  %v5810_v22 = vld [vmem:[#allocation2 + $0x18a] sm:$0xff] }
 0x1e0   : > { %v4297_v53 = vpop.eup %4296  ;;  %v2018_v35 = vadd.f32 %v1954_v50, %v1853_v63  ;;  %v2019_v16 = vadd.f32 %v5753_v49, %v1854_v47  ;;  %v2121_v19 = vmul.f32 %v5326_v60, %v1161_v40  ;;  %v2183_v30 = vadd.f32 %v2119_v41, %v5750_v31 }
 0x1e1   : > { %v4299_v4 = vpop.eup %4298  ;;  %v2347_v20 = vadd.f32 %v2283_v54, %v2182_v25  ;;  %v1464_v24 = vmul.f32 %v4370_v51, %v1427_v28  ;;  %v1691_v56 = vadd.f32 %v1627_v43, %v1526_v37  ;;  %v1527_v1 = vadd.f32 %v1463_v8, %v1362_v11  ;;  %v4373_v11 = vld [vmem:[%s6212_s4 + $0x7] ss:$0 sm:$0xff] }
 0x1e2   : > { %v5804_v17 = vpop.eup %4300  ;;  %v1095_v23 = vmul.f32 %v4299_v4, %v5589_v26  ;;  %v2184_v38 = vadd.f32 %v2120_v48, %v2018_v35  ;;  %v1956_v49 = vmul.f32 %v5298_v12, %v1426_v2  ;;  %v2185_v60 = vadd.f32 %v2121_v19, %v2019_v16  ;;  %v4374_v19 = vld [vmem:[%s6212_s4 + $0x3] ss:$0 sm:$0xff] }
 0x1e3   : > { %v2348_v31 = vadd.f32 %v5748_v58, %v2183_v30  ;;  %v1855_v54 = vadd.f32 %v1791_v29, %v1690_v61  ;;  %v1957_v40 = vmul.f32 %v5298_v12, %v1427_v28  ;;  %v2450_v7 = vmul.f32 %v5402_v10, %v1426_v2  ;;  %v4371_v58 = vld [vmem:[%s6212_s4 + $0x5] ss:$0 sm:$0xff] }
 0x1e4   : > { %1128 = vst [vmem:[#allocation2 + $0x181] sm:$0xff] %v1095_v23  ;;  %v2349_v26 = vadd.f32 %v2285_v5, %v2184_v38  ;;  %v2350_v45 = vadd.f32 %v5772_v13, %v2185_v60  ;;  %v2451_v34 = vmul.f32 %v5402_v10, %v1427_v28  ;;  %v2512_v63 = vadd.f32 %v2448_v21, %v2347_v20 }
 0x1e5   : > { %v2513_v9 = vadd.f32 %v5756_v32, %v2348_v31  ;;  %v1856_v25 = vadd.f32 %v5769_v27, %v1691_v56  ;;  %v1959_v29 = vmul.f32 %v4371_v58, %v5810_v22  ;;  %v2779_v12 = vadd.f32 1.0, %v4295_v42  ;;  %v4372_v42 = vld [vmem:[%s6212_s4 + $0x4] ss:$0 sm:$0xff] }
 0x1e6   : > { %v2514_v50 = vadd.f32 %v2450_v7, %v2349_v26  ;;  %v2515_v5 = vadd.f32 %v2451_v34, %v2350_v45  ;;  %v2615_v2 = vmul.f32 %v5421_v62, %v2512_v63  ;;  %4304 = vrcp.f32 %v2777_v0 }
 0x1e7   : > { %v2616_v13 = vmul.f32 %v5421_v62, %v2513_v9  ;;  %v1528_v37 = vadd.f32 %v1464_v24, %v1363_v15  ;;  %v2020_v47 = vadd.f32 %v1956_v49, %v1855_v54  ;;  %v2780_v27 = vadd.f32 1.0, %v4297_v53  ;;  %v2417_v9 = vld [vmem:[#allocation2 + $0x19a] sm:$0xff] }
 0x1e8   : > { %v4303_v43 = vpop.eup %4302  ;;  %v2617_v32 = vmul.f32 %v5421_v62, %v2514_v50  ;;  %v2618_v41 = vmul.f32 %v5421_v62, %v2515_v5  ;;  %v5829_v21 = vadd.f32 %v5442_v57, %v2615_v2  ;;  %4306 = vrcp.f32 %v2778_v3 }
 0x1e9   : > { %v5832_v28 = vadd.f32 %v5442_v57, %v2616_v13  ;;  %v1793_v0 = vmul.f32 %v4372_v42, %v1095_v23  ;;  %v2021_v8 = vadd.f32 %v1957_v40, %v1856_v25  ;;  %v2287_v53 = vmul.f32 %v4373_v11, %v1095_v23  ;;  %v4375_v23 = vld [vmem:[%s6212_s4 + $0x6] ss:$0 sm:$0xff] }
 0x1ea   : > { %v5841_v48 = vadd.f32 %v5442_v57, %v2617_v32  ;;  %v5844_v4 = vadd.f32 %v5442_v57, %v2618_v41  ;;  %v3748_v3 = vmul.f32 -1.442695, %v5829_v21  ;;  %4308 = vrcp.f32 %v2779_v12  ;;  %v2253_v40 = vld [vmem:[#allocation2 + $0x1a1] sm:$0xff] }
 0x1eb   : > { %v1591_v15 = vld [vmem:[#allocation2 + $0x180] sm:$0xff]  ;;  %v1592_v61 = vld [vmem:[#allocation2 + $0x188] sm:$0xff]  ;;  %v5848_v16 = vmul.f32 %v4303_v43, %v5615_v14  ;;  %4310 = vrcp.f32 %v2780_v27  ;;  %v3749_v38 = vmul.f32 -1.442695, %v5832_v28  ;;  %v2290_v2 = vmul.f32 %v4373_v11, %v2253_v40 }
 0x1ec   : > { %v1921_v35 = vld [vmem:[#allocation2 + $0x182] sm:$0xff]  ;;  %v1628_v30 = vmul.f32 %v4374_v19, %v1591_v15  ;;  %v1629_v20 = vmul.f32 %v4374_v19, %v1592_v61  ;;  %v2122_v51 = vmul.f32 %v4375_v23, %v1591_v15  ;;  %v2123_v56 = vmul.f32 %v4375_v23, %v1592_v61 }
 0x1ed   : > { %v1958_v24 = vmul.f32 %v4371_v58, %v1921_v35  ;;  %4312 = vpow2.f32 %v3748_v3  ;;  %v3750_v31 = vmul.f32 -1.442695, %v5841_v48  ;;  %v2452_v26 = vmul.f32 %v5402_v10, %v1921_v35 }
 0x1ee   : > { %v1692_v49 = vadd.f32 %v1628_v30, %v1527_v1  ;;  %v1693_v14 = vadd.f32 %v1629_v20, %v1528_v37  ;;  %v2186_v60 = vadd.f32 %v2122_v51, %v2020_v47  ;;  %v2187_v54 = vadd.f32 %v2123_v56, %v2021_v8  ;;  %v2418_v1 = vld [vmem:[#allocation2 + $0x1a2] sm:$0xff] }
 0x1ef   : > { %4314 = vpow2.f32 %v3749_v38  ;;  %v3751_v7 = vmul.f32 -1.442695, %v5844_v4  ;;  %v2453_v58 = vmul.f32 %v5402_v10, %v5810_v22  ;;  %v2966_v50 = vadd.f32 %v5759_v55, %v5848_v16 }
 0x1f0   : > { %v1857_v45 = vadd.f32 %v1793_v0, %v1692_v49  ;;  %v1858_v34 = vadd.f32 %v5780_v36, %v1693_v14  ;;  %v2351_v63 = vadd.f32 %v2287_v53, %v2186_v60  ;;  %4316 = vpow2.f32 %v3750_v31 }
 0x1f1   : > { %v2352_v25 = vadd.f32 %v5784_v18, %v2187_v54  ;;  %4318 = vpow2.f32 %v3751_v7  ;;  %v2454_v43 = vmul.f32 %v5402_v10, %v2417_v9  ;;  %v2781_v37 = vadd.f32 1.0, %v5804_v17 }
 0x1f2   : > { %v2022_v12 = vadd.f32 %v1958_v24, %v1857_v45  ;;  %v2023_v5 = vadd.f32 %v1959_v29, %v1858_v34  ;;  %v2516_v13 = vadd.f32 %v2452_v26, %v2351_v63  ;;  %v2455_v22 = vmul.f32 %v5402_v10, %v2418_v1  ;;  %v6275_v34 = vld [vmem:[#allocation23_spill] sm:$0xff] }
 0x1f3   : > { %v2517_v36 = vadd.f32 %v2453_v58, %v2352_v25  ;;  %v4305_v47 = vpop.eup %4304  ;;  %v2967_v29 = vadd.f32 %v2966_v50, %v5793_v46  ;;  %4320 = vrcp.f32 %v2781_v37 }
 0x1f4   : > { %v2188_v18 = vadd.f32 %v5691_v33, %v2022_v12  ;;  %v2189_v32 = vadd.f32 %v5691_v33, %v2023_v5  ;;  %v2619_v27 = vmul.f32 %v5421_v62, %v2516_v13  ;;  %v5882_v33 = vmul.f32 %v4305_v47, %v5672_v59 }
 0x1f5   : > { %v2620_v55 = vmul.f32 %v5421_v62, %v2517_v36  ;;  %v4307_v41 = vpop.eup %4306 }
 0x1f6   : > { %v2353_v42 = vadd.f32 %v5696_v39, %v2188_v18  ;;  %v2354_v0 = vadd.f32 %v2290_v2, %v2189_v32  ;;  %v5876_v8 = vadd.f32 %v5442_v57, %v2619_v27  ;;  %v5887_v39 = vmul.f32 %v4307_v41, %v5679_v44 }
 0x1f7   : > { %v5879_v17 = vadd.f32 %v5442_v57, %v2620_v55  ;;  %v4309_v10 = vpop.eup %4308  ;;  %v2968_v3 = vadd.f32 %v2967_v29, %v5882_v33 }
 0x1f8   : > { %v2518_v11 = vadd.f32 %v2454_v43, %v2353_v42  ;;  %v2519_v53 = vadd.f32 %v2455_v22, %v2354_v0  ;;  %v3752_v15 = vmul.f32 -1.442695, %v5876_v8  ;;  %v4311_v61 = vpop.eup %4310 }
 0x1f9   : > { %v3753_v35 = vmul.f32 -1.442695, %v5879_v17  ;;  %v2969_v44 = vadd.f32 %v2968_v3, %v5887_v39  ;;  %v5899_v40 = vmul.f32 %v4311_v61, %v5711_v6 }
 0x1fa   : > { %v4313_v19 = vpop.eup %4312  ;;  %v2621_v30 = vmul.f32 %v5421_v62, %v2518_v11  ;;  %v2622_v20 = vmul.f32 %v5421_v62, %v2519_v53  ;;  %4322 = vpow2.f32 %v3752_v15  ;;  %v5896_v62 = vmul.f32 %v4309_v10, %v5707_v52 }
 0x1fb   : > { %4324 = vpow2.f32 %v3753_v35  ;;  %v2782_v59 = vadd.f32 1.0, %v4313_v19 }
 0x1fc   : > { %v4315_v23 = vpop.eup %4314  ;;  %v2660_v51 = vadd.f32 %v5442_v57, %v2621_v30  ;;  %v2661_v24 = vadd.f32 %v5442_v57, %v2622_v20  ;;  %v2970_v57 = vadd.f32 %v2969_v44, %v5896_v62  ;;  %v3082_v20 = vld [vmem:[%s6217_s9] sm:$0xff] }
 0x1fd   : > { %v4317_v56 = vpop.eup %4316  ;;  %v2783_v38 = vadd.f32 1.0, %v4315_v23  ;;  %4326 = vrcp.f32 %v2782_v59  ;;  %3996 = vmatpush3.msra.mxu1 %v3082_v20  ;;  %v3004_v59 = vld [vmem:[%s6216_s8] sm:$0x1] }
 0x1fe   : > { %v4319_v49 = vpop.eup %4318  ;;  %v3754_v14 = vmul.f32 -1.442695, %v2660_v51  ;;  %v3755_v60 = vmul.f32 -1.442695, %v2661_v24  ;;  %v2784_v31 = vadd.f32 1.0, %v4317_v56  ;;  %v2971_v7 = vadd.f32 %v2970_v57, %v5899_v40  ;;  %v3212_v57 = vld [vmem:[%s6219_s11 + $0x60] sm:$0xff] }
 0x1ff   : > { %4328 = vrcp.f32 %v2783_v38  ;;  %v2785_v54 = vadd.f32 1.0, %v4319_v49 }
 0x200   : > { %4330 = vpow2.f32 %v3754_v14  ;;  %v4321_v26 = vpop.eup %4320 }
 0x201   : > { %4332 = vpow2.f32 %v3755_v60  ;;  %v5904_v63 = vmul.f32 %v4321_v26, %v6275_v34  ;;  %v3215_v60 = vld [vmem:[%s6219_s11 + $0x78] sm:$0xff]  ;;  %v3208_v34 = vld [vmem:[%s6219_s11 + $0x40] sm:$0xff] }
 0x202   : > { %4334 = vrcp.f32 %v2784_v31  ;;  %4000 = vmatprep.subr.mxu1 %v3215_v60  ;;  %v3214_v31 = vld [vmem:[%s6219_s11 + $0x70] sm:$0xff]  ;;  %v3211_v26 = vld [vmem:[%s6219_s11 + $0x58] sm:$0xff] }
 0x203   : > { %4336 = vrcp.f32 %v2785_v54  ;;  %v2972_v1 = vadd.f32 %v2971_v7, %v5904_v63  ;;  %v3213_v54 = vld [vmem:[%s6219_s11 + $0x68] sm:$0xff]  ;;  %v3210_v7 = vld [vmem:[%s6219_s11 + $0x50] sm:$0xff] }
 0x207   : > { %v4323_v45 = vpop.eup %4322 }
 0x208   : > { %v4325_v9 = vpop.eup %4324  ;;  %v2786_v52 = vadd.f32 1.0, %v4323_v45  ;;  %v3209_v45 = vld [vmem:[%s6219_s11 + $0x48] sm:$0xff] }
 0x209   : > { %v2787_v25 = vadd.f32 1.0, %v4325_v9  ;;  %v3207_v9 = vld [vmem:[%s6219_s11 + $0x38] sm:$0xff] }
 0x20a   : > { %v4327_v58 = vpop.eup %4326  ;;  %4338 = vrcp.f32 %v2786_v52  ;;  %v3206_v52 = vld [vmem:[%s6219_s11 + $0x30] sm:$0xff] }
 0x20b   : > { %4340 = vrcp.f32 %v2787_v25  ;;  %v5908_v6 = vmul.f32 %v4327_v58, %v5829_v21  ;;  %v3205_v25 = vld [vmem:[%s6219_s11 + $0x28] sm:$0xff]  ;;  %v3203_v58 = vld [vmem:[%s6219_s11 + $0x18] sm:$0xff] }
 0x20c   : > { %v4329_v50 = vpop.eup %4328 }
 0x20d   : > { %v4331_v12 = vpop.eup %4330  ;;  %v5911_v5 = vmul.f32 %v4329_v50, %v5832_v28  ;;  %v2973_v2 = vadd.f32 %v2972_v1, %v5908_v6  ;;  %v3204_v1 = vld [vmem:[%s6219_s11 + $0x20] sm:$0xff]  ;;  %v3202_v50 = vld [vmem:[%s6219_s11 + $0x10] sm:$0xff] }
 0x20e   : > { %v4333_v13 = vpop.eup %4332  ;;  %v2788_v43 = vadd.f32 1.0, %v4331_v12  ;;  %v3201_v12 = vld [vmem:[%s6219_s11 + $0x8] sm:$0xff] }
 0x20f   : > { %v4335_v36 = vpop.eup %4334  ;;  %v2789_v37 = vadd.f32 1.0, %v4333_v13  ;;  %v2974_v47 = vadd.f32 %v2973_v2, %v5911_v5  ;;  %v3200_v2 = vld [vmem:[%s6219_s11] sm:$0xff] }
 0x210   : > { %4342 = vrcp.f32 %v2788_v43  ;;  %v5916_v18 = vmul.f32 %v4335_v36, %v5841_v48  ;;  %v4337_v32 = vpop.eup %4336  ;;  %v3083_v13 = vld [vmem:[%s6218_s10] sm:$0x1] }
 0x211   : > { %4344 = vrcp.f32 %v2789_v37  ;;  %v5920_v22 = vmul.f32 %v4337_v32, %v5844_v4 }
 0x212   : > { %v2975_v21 = vadd.f32 %v2974_v47, %v5916_v18 }
 0x214   : > { %v2976_v28 = vadd.f32 %v2975_v21, %v5920_v22 }
 0x217   : > { %v4339_v27 = vpop.eup %4338 }
 0x218   : > { %v4341_v55 = vpop.eup %4340  ;;  %v5924_v29 = vmul.f32 %v4339_v27, %v5876_v8 }
 0x219   : > { %v5927_v41 = vmul.f32 %v4341_v55, %v5879_v17 }
 0x21a   : > { %v2977_v48 = vadd.f32 %v2976_v28, %v5924_v29  ;;  %v3164_v28 = vlaneseq }
 0x21c   : > { %v2978_v42 = vadd.f32 %v2977_v48, %v5927_v41  ;;  %v3165_v27 = vshrl.u32 %v3164_v28, 7 }
 0x21d   : > { %v4343_v0 = vpop.eup %4342 }
 0x21e   : > { %v4345_v10 = vpop.eup %4344  ;;  %v5931_v11 = vmul.f32 %v4343_v0, %v2660_v51  ;;  %v3166_v55 = vsub.s32 0, %v3165_v27  ;;  %v6276_v0 = vld [vmem:[#allocation5_spill] sm:$0xff] }
 0x21f   : > { %v5933_v4 = vmul.f32 %v4345_v10, %v2661_v24 }
 0x220   : > { %v2979_v53 = vadd.f32 %v2978_v42, %v5931_v11 }
 0x222   : > { %v2980_v15 = vadd.f32 %v2979_v53, %v5933_v4  ;;  %v6277_v53 = vld [vmem:[#allocation6_spill] sm:$0xff] }
 0x224   : > { %v2981_v61 = vrot.slane %v2980_v15, 4 }
 0x226   : > { %v2982_v8 = vadd.f32 %v2981_v61, %v2980_v15  ;;  %v6278_v61 = vld [vmem:[#allocation7_spill] sm:$0xff] }
 0x228   : > { %v2983_v35 = vrot.slane %v2982_v8, 2 }
 0x22a   : > { %v2984_v3 = vadd.f32 %v2983_v35, %v2982_v8  ;;  %v6279_v35 = vld [vmem:[#allocation8_spill] sm:$0xff] }
 0x22c   : > { %v2985_v17 = vrot.slane %v2984_v3, 1 }
 0x22e   : > { %v2986_v19 = vadd.f32 %v2985_v17, %v2984_v3  ;;  %v6280_v17 = vld [vmem:[#allocation4_spill] sm:$0xff] }
 0x230   : > { %v2987_v30 = vmul.f32 0.00390625, %v2986_v19 }
 0x232   : > { %3993 = vmatmul.mubr.f32.vlgmr.msra.gmra.mxu0 %v2987_v30  ;;  %v6281_v30 = vld [vmem:[#allocation9_spill] sm:$0xff] }
 0x2f2   : > { %v3071_v23 = vpop.f32.mrf.mxu0 }
 0x2f3   : > { %v3072_v51 = vadd.f32 %v3071_v23, %v3004_v59  ;;  %v6282_v59 = vld [vmem:[#allocation10_spill] sm:$0xff] }
 0x2f4   : > { %v3994_v24 = vpop.f32.mrf.mxu0 }
 0x2f5   : > { %v3756_v56 = vmul.f32 -1.442695, %v3072_v51 }
 0x2f7   : > { %4346 = vpow2.f32 %v3756_v56  ;;  %v6284_v56 = vld [vmem:[#allocation12_spill] sm:$0xff] }
 0x304   : > { %v4347_v38 = vpop.eup %4346 }
 0x305   : > { %v3078_v44 = vadd.f32 1.0, %v4347_v38 }
 0x307   : > { %4348 = vrcp.f32 %v3078_v44  ;;  %v6285_v44 = vld [vmem:[#allocation16_spill] sm:$0xff] }
 0x314   : > { %v4349_v49 = vpop.eup %4348 }
 0x315   : > { %v3081_v14 = vmul.f32 %v4349_v49, %v3072_v51  ;;  %v6283_v51 = vld [vmem:[#allocation11_spill] sm:$0xff] }
 0x317   : > { %3998 = vmatmul.mubr.msk.f32.vlgmr.msra.gmra.mxu1 %vm3084_vm1, %v3081_v14  ;;  %v6286_v14 = vld [vmem:[#allocation18_spill] sm:$0xff] }
 0x318   : > { %4001 = vmatpush3.msra.mxu1 %v3215_v60 }
 0x319   : > { %4002 = vmatprep.subr.mxu1 %v3214_v31 }
 0x31a   : > { %4003 = vmatpush3.msra.mxu1 %v3214_v31  ;;  %v6287_v31 = vld [vmem:[#allocation19_spill] sm:$0xff] }
 0x31b   : > { %4004 = vmatprep.subr.mxu1 %v3213_v54 }
 0x31c   : > { %4005 = vmatpush3.msra.mxu1 %v3213_v54 }
 0x31d   : > { %4006 = vmatprep.subr.mxu1 %v3212_v57 }
 0x31e   : > { %4007 = vmatpush3.msra.mxu1 %v3212_v57  ;;  %v6288_v57 = vld [vmem:[#allocation20_spill] sm:$0xff] }
 0x31f   : > { %4008 = vmatprep.subr.mxu1 %v3211_v26 }
 0x320   : > { %4009 = vmatpush3.msra.mxu1 %v3211_v26 }
 0x321   : > { %4010 = vmatprep.subr.mxu1 %v3210_v7 }
 0x322   : > { %4011 = vmatpush3.msra.mxu1 %v3210_v7  ;;  %v6289_v7 = vld [vmem:[#allocation21_spill] sm:$0xff] }
 0x323   : > { %4012 = vmatprep.subr.mxu1 %v3209_v45 }
 0x324   : > { %4013 = vmatpush3.msra.mxu1 %v3209_v45 }
 0x325   : > { %4014 = vmatprep.subr.mxu1 %v3208_v34 }
 0x326   : > { %4015 = vmatpush3.msra.mxu1 %v3208_v34  ;;  %v6290_v34 = vld [vmem:[#allocation22_spill] sm:$0xff] }
 0x327   : > { %4016 = vmatprep.subr.mxu1 %v3207_v9 }
 0x328   : > { %4017 = vmatpush3.msra.mxu1 %v3207_v9 }
 0x329   : > { %4018 = vmatprep.subr.mxu1 %v3206_v52 }
 0x32a   : > { %4019 = vmatpush3.msra.mxu1 %v3206_v52  ;;  %v6291_v52 = vld [vmem:[#allocation13_spill] sm:$0xff] }
 0x32b   : > { %4020 = vmatprep.subr.mxu1 %v3205_v25 }
 0x32c   : > { %4021 = vmatpush3.msra.mxu1 %v3205_v25 }
 0x32d   : > { %4022 = vmatprep.subr.mxu1 %v3204_v1 }
 0x32e   : > { %4023 = vmatpush3.msra.mxu1 %v3204_v1  ;;  %v6292_v1 = vld [vmem:[#allocation14_spill] sm:$0xff] }
 0x32f   : > { %4024 = vmatprep.subr.mxu1 %v3203_v58 }
 0x330   : > { %4025 = vmatpush3.msra.mxu1 %v3203_v58 }
 0x331   : > { %4026 = vmatprep.subr.mxu1 %v3202_v50 }
 0x332   : > { %4027 = vmatpush3.msra.mxu1 %v3202_v50 }
 0x333   : > { %4028 = vmatprep.subr.mxu1 %v3201_v12 }
 0x334   : > { %4029 = vmatpush3.msra.mxu1 %v3201_v12 }
 0x335   : > { %4030 = vmatprep.subr.mxu1 %v3200_v2 }
 0x336   : > { %4031 = vmatpush3.msra.mxu1 %v3200_v2 }
 0x3d7   : > { %v3154_v43 = vpop.f32.mrf.mxu1 }
 0x3d8   : > { %v3155_v36 = vadd.f32 %v3154_v43, %v3083_v13 }
 0x3d9   : > { %v3999_v37 = vpop.f32.mrf.mxu1 }
 0x3da   : > { %v3758_v47 = vmul.f32 -1.442695, %v3155_v36 }
 0x3dc   : > { %4350 = vpow2.f32 %v3758_v47 }
 0x3e9   : > { %v4351_v32 = vpop.eup %4350 }
 0x3ea   : > { %v3161_v21 = vadd.f32 1.0, %v4351_v32  ;;  %v3519_v32 = vld [vmem:[%s4554_s27] sm:$0xff] }
 0x3ec   : > { %4352 = vrcp.f32 %v3161_v21 }
 0x3f9   : > { %v4353_v48 = vpop.eup %4352 }
 0x3fa   : > { %v5994_v42 = vrot.slane %v4353_v48, %v3166_v55  ;;  %v3522_v48 = vld [vmem:[%s4554_s27 + $0x18] sm:$0xff] }
 0x3fc   : > { %v3168_v10 = vmul.f32 %v5994_v42, %v6276_v0  ;;  %v3169_v15 = vmul.f32 %v5994_v42, %v6277_v53  ;;  %v3170_v8 = vmul.f32 %v5994_v42, %v6278_v61  ;;  %v3171_v3 = vmul.f32 %v5994_v42, %v6279_v35 }
 0x3fd   : > { %v3172_v19 = vmul.f32 %v5994_v42, %v6280_v17  ;;  %v3173_v20 = vmul.f32 %v5994_v42, %v6281_v30  ;;  %v3174_v23 = vmul.f32 %v5994_v42, %v6282_v59  ;;  %v3175_v24 = vmul.f32 %v5994_v42, %v6283_v51  ;;  %v3524_v17 = vld [vmem:[%s4554_s27 + $0x28] sm:$0xff] }
 0x3fe   : > { %4032 = vmatprep.mubr.f32.mxu1 %v3168_v10  ;;  %v3176_v38 = vmul.f32 %v5994_v42, %v6284_v56  ;;  %v3177_v49 = vmul.f32 %v5994_v42, %v6285_v44  ;;  %v3178_v60 = vmul.f32 %v5994_v42, %v6286_v14  ;;  %v3179_v54 = vmul.f32 %v5994_v42, %v6287_v31  ;;  %v3526_v44 = vld [vmem:[%s4554_s27 + $0x38] sm:$0xff] }
 0x3ff   : > { %4033 = vmatmul.mubr.f32.vlgmr.msra.gmra.mxu1 %v3169_v15  ;;  %v3180_v26 = vmul.f32 %v5994_v42, %v6288_v57  ;;  %v3181_v45 = vmul.f32 %v5994_v42, %v6289_v7  ;;  %v3182_v9 = vmul.f32 %v5994_v42, %v6290_v34  ;;  %v3183_v25 = vmul.f32 %v5994_v42, %v6291_v52  ;;  %v3521_v15 = vld [vmem:[%s4554_s27 + $0x10] sm:$0xff]  ;;  %v3528_v34 = vld [vmem:[%s4554_s27 + $0x48] sm:$0xff] }
 0x400   : > { %4035 = vmatprep.mubr.f32.mxu1 %v3170_v8  ;;  %v3184_v58 = vmul.f32 %v5994_v42, %v6292_v1  ;;  %v3185_v50 = vmul.f32 %v5994_v42, %v5848_v16  ;;  %v3186_v12 = vmul.f32 %v5994_v42, %v5793_v46  ;;  %v3187_v2 = vmul.f32 %v5994_v42, %v5882_v33 }
 0x401   : > { %v3188_v13 = vmul.f32 %v5994_v42, %v5887_v39  ;;  %v3189_v43 = vmul.f32 %v5994_v42, %v5896_v62  ;;  %v3190_v36 = vmul.f32 %v5994_v42, %v5899_v40  ;;  %v3191_v46 = vmul.f32 %v5994_v42, %v5904_v63 }
 0x402   : > { %v3192_v16 = vmul.f32 %v5994_v42, %v5908_v6  ;;  %v3193_v33 = vmul.f32 %v5994_v42, %v5911_v5  ;;  %v3194_v39 = vmul.f32 %v5994_v42, %v5916_v18  ;;  %v3195_v62 = vmul.f32 %v5994_v42, %v5920_v22  ;;  %v6063_v18 = vld [vmem:[%s6220_s12] ss:$0 sm:$0xff] }
 0x403   : > { %4036 = vmatmul.mubr.f32.gmra.mxu1 %v3171_v3  ;;  %v3196_v40 = vmul.f32 %v5994_v42, %v5924_v29  ;;  %v3197_v63 = vmul.f32 %v5994_v42, %v5927_v41  ;;  %v3198_v6 = vmul.f32 %v5994_v42, %v5931_v11  ;;  %v3199_v5 = vmul.f32 %v5994_v42, %v5933_v4  ;;  %v6068_v29 = vld [vmem:[%s6221_s13] ss:$0 sm:$0xff]  ;;  %v3520_v11 = vld [vmem:[%s4554_s27 + $0x8] sm:$0xff] }
 0x404   : > { %4038 = vmatprep.mubr.f32.mxu1 %v3172_v19 }
 0x407   : > { %4039 = vmatmul.mubr.f32.gmra.mxu1 %v3173_v20 }
 0x408   : > { %4041 = vmatprep.mubr.f32.mxu1 %v3174_v23  ;;  %v3523_v23 = vld [vmem:[%s4554_s27 + $0x20] sm:$0xff] }
 0x40b   : > { %4042 = vmatmul.mubr.f32.gmra.mxu1 %v3175_v24 }
 0x40c   : > { %4044 = vmatprep.mubr.f32.mxu1 %v3176_v38 }
 0x40f   : > { %4045 = vmatmul.mubr.f32.gmra.mxu1 %v3177_v49 }
 0x410   : > { %4047 = vmatprep.mubr.f32.mxu1 %v3178_v60 }
 0x413   : > { %4048 = vmatmul.mubr.f32.gmra.mxu1 %v3179_v54  ;;  %v3525_v54 = vld [vmem:[%s4554_s27 + $0x30] sm:$0xff] }
 0x414   : > { %4050 = vmatprep.mubr.f32.mxu1 %v3180_v26 }
 0x417   : > { %4051 = vmatmul.mubr.f32.gmra.mxu1 %v3181_v45 }
 0x418   : > { %4053 = vmatprep.mubr.f32.mxu1 %v3182_v9 }
 0x41b   : > { %4054 = vmatmul.mubr.f32.gmra.mxu1 %v3183_v25 }
 0x41c   : > { %4056 = vmatprep.mubr.f32.mxu1 %v3184_v58  ;;  %v3527_v58 = vld [vmem:[%s4554_s27 + $0x40] sm:$0xff] }
 0x41f   : > { %4057 = vmatmul.mubr.f32.gmra.mxu1 %v3185_v50 }
 0x420   : > { %4059 = vmatprep.mubr.f32.mxu1 %v3186_v12 }
 0x423   : > { %4060 = vmatmul.mubr.f32.gmra.mxu1 %v3187_v2 }
 0x424   : > { %4062 = vmatprep.mubr.f32.mxu1 %v3188_v13 }
 0x427   : > { %4063 = vmatmul.mubr.f32.gmra.mxu1 %v3189_v43  ;;  %v3530_v43 = vld [vmem:[%s4554_s27 + $0x58] sm:$0xff] }
 0x428   : > { %4065 = vmatprep.mubr.f32.mxu1 %v3190_v36 }
 0x42b   : > { %4066 = vmatmul.mubr.f32.gmra.mxu1 %v3191_v46 }
 0x42c   : > { %4068 = vmatprep.mubr.f32.mxu1 %v3192_v16 }
 0x42f   : > { %4069 = vmatmul.mubr.f32.gmra.mxu1 %v3193_v33 }
 0x430   : > { %4071 = vmatprep.mubr.f32.mxu1 %v3194_v39  ;;  %v3529_v39 = vld [vmem:[%s4554_s27 + $0x50] sm:$0xff] }
 0x433   : > { %4072 = vmatmul.mubr.f32.gmra.mxu1 %v3195_v62 }
 0x434   : > { %4074 = vmatprep.mubr.f32.mxu1 %v3196_v40 }
 0x437   : > { %4075 = vmatmul.mubr.f32.gmra.mxu1 %v3197_v63 }
 0x438   : > { %4077 = vmatprep.mubr.f32.mxu1 %v3198_v6 }
 0x43b   : > { %4078 = vmatmul.mubr.f32.gmra.mxu1 %v3199_v5  ;;  %v3532_v5 = vld [vmem:[%s4554_s27 + $0x68] sm:$0xff] }
 0x4bf   : > { %v4034_v22 = vpop.f32.mrf.mxu1 }
 0x4c0   : > { %v3449_v41 = vmul.f32 %v4034_v22, %v6063_v18 }
 0x4c1   : > { %v3282_v37 = vpop.f32.mrf.mxu1 }
 0x4c2   : > { %v3488_v4 = vadd.f32 %v6068_v29, %v3449_v41  ;;  %v3448_v47 = vmul.f32 %v6063_v18, %v3282_v37 }
 0x4c3   : > { %v4037_v21 = vpop.f32.mrf.mxu1 }
 0x4c4   : > { %v3552_v28 = vadd.f32 %v3520_v11, %v3488_v4  ;;  %v3487_v27 = vadd.f32 %v6068_v29, %v3448_v47  ;;  %v3451_v55 = vmul.f32 %v4037_v21, %v6063_v18  ;;  %v3531_v4 = vld [vmem:[%s4554_s27 + $0x60] sm:$0xff] }
 0x4c5   : > { %v3292_v42 = vpop.f32.mrf.mxu1 }
 0x4c6   : > { %3584 = vst [vmem:[%s6079_s28 + $0x8] sm:$0xff] %v3552_v28  ;;  %v3551_v0 = vadd.f32 %v3519_v32, %v3487_v27  ;;  %v3490_v10 = vadd.f32 %v6068_v29, %v3451_v55  ;;  %v3450_v53 = vmul.f32 %v6063_v18, %v3292_v42  ;;  %v3534_v27 = vld [vmem:[%s4554_s27 + $0x78] sm:$0xff] }
 0x4c7   : > { %v4040_v61 = vpop.f32.mrf.mxu1 }
 0x4c8   : > { %3583 = vst [vmem:[%s6079_s28] sm:$0xff] %v3551_v0  ;;  %v3554_v8 = vadd.f32 %v3522_v48, %v3490_v10  ;;  %v3489_v35 = vadd.f32 %v6068_v29, %v3450_v53  ;;  %v3453_v3 = vmul.f32 %v4040_v61, %v6063_v18  ;;  %v3533_v10 = vld [vmem:[%s4554_s27 + $0x70] sm:$0xff] }
 0x4c9   : > { %v3302_v19 = vpop.f32.mrf.mxu1 }
 0x4ca   : > { %3586 = vst [vmem:[%s6079_s28 + $0x18] sm:$0xff] %v3554_v8  ;;  %v3553_v30 = vadd.f32 %v3521_v15, %v3489_v35  ;;  %v3492_v20 = vadd.f32 %v6068_v29, %v3453_v3  ;;  %v3452_v59 = vmul.f32 %v6063_v18, %v3302_v19  ;;  %v3536_v35 = vld [vmem:[%s4554_s27 + $0x88] sm:$0xff] }
 0x4cb   : > { %v4043_v51 = vpop.f32.mrf.mxu1 }
 0x4cc   : > { %3585 = vst [vmem:[%s6079_s28 + $0x10] sm:$0xff] %v3553_v30  ;;  %v3556_v24 = vadd.f32 %v3524_v17, %v3492_v20  ;;  %v3491_v56 = vadd.f32 %v6068_v29, %v3452_v59  ;;  %v3455_v38 = vmul.f32 %v4043_v51, %v6063_v18  ;;  %v3535_v20 = vld [vmem:[%s4554_s27 + $0x80] sm:$0xff] }
 0x4cd   : > { %v3312_v49 = vpop.f32.mrf.mxu1 }
 0x4ce   : > { %3588 = vst [vmem:[%s6079_s28 + $0x28] sm:$0xff] %v3556_v24  ;;  %v3555_v14 = vadd.f32 %v3523_v23, %v3491_v56  ;;  %v3494_v60 = vadd.f32 %v6068_v29, %v3455_v38  ;;  %v3454_v31 = vmul.f32 %v6063_v18, %v3312_v49  ;;  %v3538_v56 = vld [vmem:[%s4554_s27 + $0x98] sm:$0xff] }
 0x4cf   : > { %v4046_v57 = vpop.f32.mrf.mxu1 }
 0x4d0   : > { %3587 = vst [vmem:[%s6079_s28 + $0x20] sm:$0xff] %v3555_v14  ;;  %v3558_v26 = vadd.f32 %v3526_v44, %v3494_v60  ;;  %v3493_v7 = vadd.f32 %v6068_v29, %v3454_v31  ;;  %v3457_v45 = vmul.f32 %v4046_v57, %v6063_v18  ;;  %v3537_v60 = vld [vmem:[%s4554_s27 + $0x90] sm:$0xff] }
 0x4d1   : > { %v3322_v9 = vpop.f32.mrf.mxu1 }
 0x4d2   : > { %3590 = vst [vmem:[%s6079_s28 + $0x38] sm:$0xff] %v3558_v26  ;;  %v3557_v52 = vadd.f32 %v3525_v54, %v3493_v7  ;;  %v3496_v25 = vadd.f32 %v6068_v29, %v3457_v45  ;;  %v3456_v1 = vmul.f32 %v6063_v18, %v3322_v9  ;;  %v3540_v7 = vld [vmem:[%s4554_s27 + $0xa8] sm:$0xff] }
 0x4d3   : > { %v4049_v50 = vpop.f32.mrf.mxu1 }
 0x4d4   : > { %3589 = vst [vmem:[%s6079_s28 + $0x30] sm:$0xff] %v3557_v52  ;;  %v3560_v12 = vadd.f32 %v3528_v34, %v3496_v25  ;;  %v3495_v2 = vadd.f32 %v6068_v29, %v3456_v1  ;;  %v3459_v13 = vmul.f32 %v4049_v50, %v6063_v18  ;;  %v3539_v25 = vld [vmem:[%s4554_s27 + $0xa0] sm:$0xff] }
 0x4d5   : > { %v3332_v36 = vpop.f32.mrf.mxu1 }
 0x4d6   : > { %3592 = vst [vmem:[%s6079_s28 + $0x48] sm:$0xff] %v3560_v12  ;;  %v3559_v46 = vadd.f32 %v3527_v58, %v3495_v2  ;;  %v3498_v16 = vadd.f32 %v6068_v29, %v3459_v13  ;;  %v3458_v33 = vmul.f32 %v6063_v18, %v3332_v36  ;;  %v3542_v2 = vld [vmem:[%s4554_s27 + $0xb8] sm:$0xff] }
 0x4d7   : > { %v4052_v62 = vpop.f32.mrf.mxu1 }
 0x4d8   : > { %3591 = vst [vmem:[%s6079_s28 + $0x40] sm:$0xff] %v3559_v46  ;;  %v3562_v40 = vadd.f32 %v3530_v43, %v3498_v16  ;;  %v3497_v63 = vadd.f32 %v6068_v29, %v3458_v33  ;;  %v3461_v6 = vmul.f32 %v4052_v62, %v6063_v18  ;;  %v3541_v16 = vld [vmem:[%s4554_s27 + $0xb0] sm:$0xff] }
 0x4d9   : > { %v3342_v22 = vpop.f32.mrf.mxu1 }
 0x4da   : > { %3594 = vst [vmem:[%s6079_s28 + $0x58] sm:$0xff] %v3562_v40  ;;  %v3561_v41 = vadd.f32 %v3529_v39, %v3497_v63  ;;  %v3500_v11 = vadd.f32 %v6068_v29, %v3461_v6  ;;  %v3460_v37 = vmul.f32 %v6063_v18, %v3342_v22  ;;  %v3544_v63 = vld [vmem:[%s4554_s27 + $0xc8] sm:$0xff] }
 0x4db   : > { %v4055_v47 = vpop.f32.mrf.mxu1 }
 0x4dc   : > { %3593 = vst [vmem:[%s6079_s28 + $0x50] sm:$0xff] %v3561_v41  ;;  %v3564_v32 = vadd.f32 %v3532_v5, %v3500_v11  ;;  %v3499_v21 = vadd.f32 %v6068_v29, %v3460_v37  ;;  %v3463_v28 = vmul.f32 %v4055_v47, %v6063_v18  ;;  %v3543_v11 = vld [vmem:[%s4554_s27 + $0xc0] sm:$0xff] }
 0x4dd   : > { %v3352_v55 = vpop.f32.mrf.mxu1 }
 0x4de   : > { %3596 = vst [vmem:[%s6079_s28 + $0x68] sm:$0xff] %v3564_v32  ;;  %v3563_v48 = vadd.f32 %v3531_v4, %v3499_v21  ;;  %v3502_v42 = vadd.f32 %v6068_v29, %v3463_v28  ;;  %v3462_v0 = vmul.f32 %v6063_v18, %v3352_v55  ;;  %v3546_v21 = vld [vmem:[%s4554_s27 + $0xd8] sm:$0xff] }
 0x4df   : > { %v4058_v53 = vpop.f32.mrf.mxu1 }
 0x4e0   : > { %3595 = vst [vmem:[%s6079_s28 + $0x60] sm:$0xff] %v3563_v48  ;;  %v3566_v15 = vadd.f32 %v3534_v27, %v3502_v42  ;;  %v3501_v61 = vadd.f32 %v6068_v29, %v3462_v0  ;;  %v3465_v8 = vmul.f32 %v4058_v53, %v6063_v18  ;;  %v3545_v42 = vld [vmem:[%s4554_s27 + $0xd0] sm:$0xff] }
 0x4e1   : > { %v3362_v3 = vpop.f32.mrf.mxu1 }
 0x4e2   : > { %3598 = vst [vmem:[%s6079_s28 + $0x78] sm:$0xff] %v3566_v15  ;;  %v3565_v17 = vadd.f32 %v3533_v10, %v3501_v61  ;;  %v3504_v19 = vadd.f32 %v6068_v29, %v3465_v8  ;;  %v3464_v30 = vmul.f32 %v6063_v18, %v3362_v3  ;;  %v3548_v61 = vld [vmem:[%s4554_s27 + $0xe8] sm:$0xff] }
 0x4e3   : > { %v4061_v59 = vpop.f32.mrf.mxu1 }
 0x4e4   : > { %3597 = vst [vmem:[%s6079_s28 + $0x70] sm:$0xff] %v3565_v17  ;;  %v3568_v23 = vadd.f32 %v3536_v35, %v3504_v19  ;;  %v3503_v51 = vadd.f32 %v6068_v29, %v3464_v30  ;;  %v3467_v24 = vmul.f32 %v4061_v59, %v6063_v18  ;;  %v3547_v19 = vld [vmem:[%s4554_s27 + $0xe0] sm:$0xff] }
 0x4e5   : > { %v3372_v38 = vpop.f32.mrf.mxu1 }
 0x4e6   : > { %3600 = vst [vmem:[%s6079_s28 + $0x88] sm:$0xff] %v3568_v23  ;;  %v3567_v44 = vadd.f32 %v3535_v20, %v3503_v51  ;;  %v3506_v49 = vadd.f32 %v6068_v29, %v3467_v24  ;;  %v3466_v14 = vmul.f32 %v6063_v18, %v3372_v38  ;;  %v3550_v51 = vld [vmem:[%s4554_s27 + $0xf8] sm:$0xff] }
 0x4e7   : > { %v4064_v31 = vpop.f32.mrf.mxu1 }
 0x4e8   : > { %3599 = vst [vmem:[%s6079_s28 + $0x80] sm:$0xff] %v3567_v44  ;;  %v3570_v54 = vadd.f32 %v3538_v56, %v3506_v49  ;;  %v3505_v57 = vadd.f32 %v6068_v29, %v3466_v14  ;;  %v3469_v26 = vmul.f32 %v4064_v31, %v6063_v18  ;;  %v3549_v49 = vld [vmem:[%s4554_s27 + $0xf0] sm:$0xff] }
 0x4e9   : > { %v3382_v45 = vpop.f32.mrf.mxu1 }
 0x4ea   : > { %3602 = vst [vmem:[%s6079_s28 + $0x98] sm:$0xff] %v3570_v54  ;;  %v3569_v34 = vadd.f32 %v3537_v60, %v3505_v57  ;;  %v3508_v9 = vadd.f32 %v6068_v29, %v3469_v26  ;;  %v3468_v52 = vmul.f32 %v6063_v18, %v3382_v45 }
 0x4eb   : > { %v4067_v1 = vpop.f32.mrf.mxu1 }
 0x4ec   : > { %3601 = vst [vmem:[%s6079_s28 + $0x90] sm:$0xff] %v3569_v34  ;;  %v3572_v58 = vadd.f32 %v3540_v7, %v3508_v9  ;;  %v3507_v50 = vadd.f32 %v6068_v29, %v3468_v52  ;;  %v3471_v12 = vmul.f32 %v4067_v1, %v6063_v18 }
 0x4ed   : > { %v3392_v13 = vpop.f32.mrf.mxu1 }
 0x4ee   : > { %3604 = vst [vmem:[%s6079_s28 + $0xa8] sm:$0xff] %v3572_v58  ;;  %v3571_v43 = vadd.f32 %v3539_v25, %v3507_v50  ;;  %v3510_v36 = vadd.f32 %v6068_v29, %v3471_v12  ;;  %v3470_v46 = vmul.f32 %v6063_v18, %v3392_v13 }
 0x4ef   : > { %v4070_v33 = vpop.f32.mrf.mxu1 }
 0x4f0   : > { %3603 = vst [vmem:[%s6079_s28 + $0xa0] sm:$0xff] %v3571_v43  ;;  %v3574_v39 = vadd.f32 %v3542_v2, %v3510_v36  ;;  %v3509_v62 = vadd.f32 %v6068_v29, %v3470_v46  ;;  %v3473_v40 = vmul.f32 %v4070_v33, %v6063_v18 }
 0x4f1   : > { %v3402_v6 = vpop.f32.mrf.mxu1 }
 0x4f2   : > { %3606 = vst [vmem:[%s6079_s28 + $0xb8] sm:$0xff] %v3574_v39  ;;  %v3573_v5 = vadd.f32 %v3541_v16, %v3509_v62  ;;  %v3512_v22 = vadd.f32 %v6068_v29, %v3473_v40  ;;  %v3472_v41 = vmul.f32 %v6063_v18, %v3402_v6 }
 0x4f3   : > { %v4073_v37 = vpop.f32.mrf.mxu1 }
 0x4f4   : > { %3605 = vst [vmem:[%s6079_s28 + $0xb0] sm:$0xff] %v3573_v5  ;;  %v3576_v4 = vadd.f32 %v3544_v63, %v3512_v22  ;;  %v3511_v47 = vadd.f32 %v6068_v29, %v3472_v41  ;;  %v3475_v32 = vmul.f32 %v4073_v37, %v6063_v18 }
 0x4f5   : > { %v3412_v28 = vpop.f32.mrf.mxu1 }
 0x4f6   : > { %3608 = vst [vmem:[%s6079_s28 + $0xc8] sm:$0xff] %v3576_v4  ;;  %v3575_v27 = vadd.f32 %v3543_v11, %v3511_v47  ;;  %v3514_v55 = vadd.f32 %v6068_v29, %v3475_v32  ;;  %v3474_v48 = vmul.f32 %v6063_v18, %v3412_v28 }
 0x4f7   : > { %v4076_v0 = vpop.f32.mrf.mxu1 }
 0x4f8   : > { %3607 = vst [vmem:[%s6079_s28 + $0xc0] sm:$0xff] %v3575_v27  ;;  %v3578_v10 = vadd.f32 %v3546_v21, %v3514_v55  ;;  %v3513_v53 = vadd.f32 %v6068_v29, %v3474_v48  ;;  %v3477_v15 = vmul.f32 %v4076_v0, %v6063_v18 }
 0x4f9   : > { %v3422_v8 = vpop.f32.mrf.mxu1 }
 0x4fa   : > { %3610 = vst [vmem:[%s6079_s28 + $0xd8] sm:$0xff] %v3578_v10  ;;  %v3577_v35 = vadd.f32 %v3545_v42, %v3513_v53  ;;  %v3516_v3 = vadd.f32 %v6068_v29, %v3477_v15  ;;  %v3476_v17 = vmul.f32 %v6063_v18, %v3422_v8 }
 0x4fb   : > { %v4079_v30 = vpop.f32.mrf.mxu1 }
 0x4fc   : > { %3609 = vst [vmem:[%s6079_s28 + $0xd0] sm:$0xff] %v3577_v35  ;;  %v3580_v20 = vadd.f32 %v3548_v61, %v3516_v3  ;;  %v3515_v59 = vadd.f32 %v6068_v29, %v3476_v17  ;;  %v3479_v23 = vmul.f32 %v4079_v30, %v6063_v18 }
 0x4fd   : > { %v3432_v24 = vpop.f32.mrf.mxu1 }
 0x4fe   : > { %3612 = vst [vmem:[%s6079_s28 + $0xe8] sm:$0xff] %v3580_v20  ;;  %v3579_v56 = vadd.f32 %v3547_v19, %v3515_v59  ;;  %v3518_v38 = vadd.f32 %v6068_v29, %v3479_v23  ;;  %v3478_v44 = vmul.f32 %v6063_v18, %v3432_v24 }
 0x500   : > { %3611 = vst [vmem:[%s6079_s28 + $0xe0] sm:$0xff] %v3579_v56  ;;  %v3582_v14 = vadd.f32 %v3550_v51, %v3518_v38  ;;  %v3517_v60 = vadd.f32 %v6068_v29, %v3478_v44 }
 0x502   : > { %3614 = vst [vmem:[%s6079_s28 + $0xf8] sm:$0xff] %v3582_v14  ;;  %v3581_v31 = vadd.f32 %v3549_v49, %v3517_v60 }
 0x504   : > { %3613 = vst [vmem:[%s6079_s28 + $0xf0] sm:$0xff] %v3581_v31 }
 0x505 PF: > { %s24_s29 = sadd.s32 1, %s4382_s29  }
 0x506   : > { %p21_p4 = scmp.ge.s32.totalorder %s24_s29, 4  }
 0x508   :  { %23 = sbr.rel (!%p21_p4) target bundleno = 1 (0x1), region = 108 }

</bundles_post_ra>
